<compile_context>
chip_gen: v6e
topology: v6e:2x2x1
jax: 0.10.0
libtpu: 0.0.40
codegen_flags: <defaults>
</compile_context>

<pallas_src>
import jax
import jax.numpy as jnp
from jax.experimental import pallas as pl
from jax.experimental.pallas import tpu as pltpu


# ----------------------------------------------------------------------------
# In-kernel building blocks (operate on loaded bf16 values / VMEM refs)
# ----------------------------------------------------------------------------
def _conv3x3_relu(x, w_ref, b_ref):
    """3x3 valid conv + bias + ReLU as ONE im2col MXU matmul.

    x:     (1, H, W, Cin)   bf16 value
    w_ref: (9*Cin, Cout)    bf16 ref, rows ordered (kh, kw, cin) == HWIO flatten
    b_ref: (1, Cout)        f32 ref
    returns (1, H-2, W-2, Cout) bf16
    """
    TB, H, W, Cin = x.shape
    Cout = w_ref.shape[-1]
    Ho, Wo = H - 2, W - 2
    # im2col in VMEM: concat the 9 shifted views along the channel (lane) axis.
    patches = jnp.concatenate(
        [x[:, kh:kh + Ho, kw:kw + Wo, :] for kh in range(3) for kw in range(3)],
        axis=-1)                                          # (1, Ho, Wo, 9*Cin)
    patches = patches.reshape(TB * Ho * Wo, 9 * Cin)      # (M, K) bf16
    acc = jnp.dot(patches, w_ref[...],
                  preferred_element_type=jnp.float32)      # single K-deep matmul
    acc = jnp.maximum(acc + b_ref[...], 0.0)               # f32 epilogue
    return acc.astype(jnp.bfloat16).reshape(TB, Ho, Wo, Cout)


def _maxpool2x2(x):
    """2x2 / stride-2 max pool, floor mode (matches torch.nn.MaxPool2d)."""
    TB, H, W, C = x.shape
    Ho, Wo = H // 2, W // 2
    x = x[:, :2 * Ho, :2 * Wo, :]
    x = x.reshape(TB, Ho, 2, 2 * Wo, C)
    x = jnp.max(x, axis=2)
    x = x.reshape(TB, Ho, Wo, 2, C)
    return jnp.max(x, axis=3)


# ----------------------------------------------------------------------------
# Fully fused kernel: whole network for one image per grid step
# ----------------------------------------------------------------------------
def _carlini_kernel(x_ref,
                    wc0, bc0, wc1, bc1, wc2, bc2, wc3, bc3,
                    wf0, bf0, wf1, bf1, wf2, bf2,
                    o_ref):
    x = x_ref[...].astype(jnp.bfloat16)       # cast once at kernel entry
    h = _conv3x3_relu(x, wc0, bc0)            # conv0 + ReLU
    h = _conv3x3_relu(h, wc1, bc1)            # conv1 + ReLU
    h = _maxpool2x2(h)                        # mp0
    h = _conv3x3_relu(h, wc2, bc2)            # conv2 + ReLU
    h = _conv3x3_relu(h, wc3, bc3)            # conv3 + ReLU
    h = _maxpool2x2(h)                        # mp1 -> (1, Hf, Wf, C3) bf16

    TB, Hf, Wf, C = h.shape
    f = h.reshape(TB, Hf * Wf * C)            # NHWC flatten; fw0 rows pre-permuted

    f = jnp.dot(f, wf0[...], preferred_element_type=jnp.float32) + bf0[...]
    f = jnp.maximum(f, 0.0).astype(jnp.bfloat16)
    # Dropout(0.5) == identity in inference mode (see TODO at top).
    f = jnp.dot(f, wf1[...], preferred_element_type=jnp.float32) + bf1[...]
    f = jnp.maximum(f, 0.0).astype(jnp.bfloat16)
    f = jnp.dot(f, wf2[...], preferred_element_type=jnp.float32) + bf2[...]

    o_ref[...] = f.reshape(o_ref.shape).astype(o_ref.dtype)


def _const_spec(shape):
    """Full-array block with a constant index map -> stays VMEM-resident."""
    nd = len(shape)
    return pl.BlockSpec(shape, lambda i, _nd=nd: (0,) * _nd)


# ----------------------------------------------------------------------------
# Parameters (deterministic; Conv2d weights stored in HWIO (kh,kw,Cin,Cout);
# Linear weights stored as (in,out) with torch's NCHW flatten-order rows).
# ----------------------------------------------------------------------------
def init_params(image_size, num_classes=10, seed=0):
    params_ch = [64, 64, 128, 128, 256, 256]
    key = jax.random.PRNGKey(seed)
    keys = jax.random.split(key, 14)

    def w(k, shape, scale=0.05):
        return scale * jax.random.normal(k, shape, dtype=jnp.float32)

    s = image_size
    s = s - 2          # conv0
    s = s - 2          # conv1
    s = s // 2         # mp0
    s = s - 2          # conv2
    s = s - 2          # conv3
    s = s // 2         # mp1
    flat = params_ch[3] * s * s

    return {
        "w0": w(keys[0], (3, 3, 3, params_ch[0])),
        "b0": w(keys[1], (params_ch[0],)),
        "w1": w(keys[2], (3, 3, params_ch[0], params_ch[1])),
        "b1": w(keys[3], (params_ch[1],)),
        "w2": w(keys[4], (3, 3, params_ch[1], params_ch[2])),
        "b2": w(keys[5], (params_ch[2],)),
        "w3": w(keys[6], (3, 3, params_ch[2], params_ch[3])),
        "b3": w(keys[7], (params_ch[3],)),
        "fw0": w(keys[8], (flat, params_ch[4])),
        "fb0": w(keys[9], (params_ch[4],)),
        "fw1": w(keys[10], (params_ch[4], params_ch[5])),
        "fb1": w(keys[11], (params_ch[5],)),
        "fw2": w(keys[12], (params_ch[5], num_classes)),
        "fb2": w(keys[13], (num_classes,)),
    }


# ----------------------------------------------------------------------------
# Forward pass (matches CarliniNetwork.forward semantics, inference mode)
# ----------------------------------------------------------------------------
def carlini_forward(x_nchw, p):
    # NCHW in -> NHWC compute (channels on lanes); only XLA op besides the call.
    x = jnp.transpose(x_nchw.astype(jnp.float32), (0, 2, 3, 1))
    B, H, W, Cin = x.shape

    C0 = p["w0"].shape[-1]
    C1 = p["w1"].shape[-1]
    C2 = p["w2"].shape[-1]
    C3 = p["w3"].shape[-1]
    N0 = p["fw0"].shape[-1]
    N1 = p["fw1"].shape[-1]
    NC = p["fw2"].shape[-1]

    Hf = ((H - 4) // 2 - 4) // 2
    Wf = ((W - 4) // 2 - 4) // 2
    flat = C3 * Hf * Wf
    assert p["fw0"].shape[0] == flat, (p["fw0"].shape, flat)

    # Conv weights HWIO -> (9*Cin, Cout) bf16 (im2col layout).
    wc0 = p["w0"].reshape(9 * Cin, C0).astype(jnp.bfloat16)
    wc1 = p["w1"].reshape(9 * C0, C1).astype(jnp.bfloat16)
    wc2 = p["w2"].reshape(9 * C1, C2).astype(jnp.bfloat16)
    wc3 = p["w3"].reshape(9 * C2, C3).astype(jnp.bfloat16)
    bc0 = p["b0"].reshape(1, C0).astype(jnp.float32)
    bc1 = p["b1"].reshape(1, C1).astype(jnp.float32)
    bc2 = p["b2"].reshape(1, C2).astype(jnp.float32)
    bc3 = p["b3"].reshape(1, C3).astype(jnp.float32)

    # fc0: torch flattens NCHW (c,h,w); the kernel flattens NHWC (h,w,c).
    # Permute fw0's rows once on the host side so the kernel needs no transpose.
    wf0 = (p["fw0"].reshape(C3, Hf, Wf, N0).transpose(1, 2, 0, 3)
           .reshape(flat, N0).astype(jnp.bfloat16))
    wf1 = p["fw1"].astype(jnp.bfloat16)
    wf2 = p["fw2"].astype(jnp.bfloat16)
    bf0 = p["fb0"].reshape(1, N0).astype(jnp.float32)
    bf1 = p["fb1"].reshape(1, N1).astype(jnp.float32)
    bf2 = p["fb2"].reshape(1, NC).astype(jnp.float32)

    out = pl.pallas_call(
        _carlini_kernel,
        out_shape=jax.ShapeDtypeStruct((B, 1, NC), jnp.float32),
        grid=(B,),
        in_specs=[
            pl.BlockSpec((1, H, W, Cin), lambda i: (i, 0, 0, 0)),
            _const_spec(wc0.shape), _const_spec(bc0.shape),
            _const_spec(wc1.shape), _const_spec(bc1.shape),
            _const_spec(wc2.shape), _const_spec(bc2.shape),
            _const_spec(wc3.shape), _const_spec(bc3.shape),
            _const_spec(wf0.shape), _const_spec(bf0.shape),
            _const_spec(wf1.shape), _const_spec(bf1.shape),
            _const_spec(wf2.shape), _const_spec(bf2.shape),
        ],
        out_specs=pl.BlockSpec((1, 1, NC), lambda i: (i, 0, 0)),
        compiler_params=pltpu.CompilerParams(
            dimension_semantics=("parallel",)),
    )(x, wc0, bc0, wc1, bc1, wc2, bc2, wc3, bc3,
      wf0, bf0, wf1, bf1, wf2, bf2)

    return out.reshape(B, NC)


if __name__ == "__main__":
    IMAGE_SIZE = 16      # 16 -> 14 -> 12 -> 6 -> 4 -> 2 -> 1 ; flatten = 128
    BATCH = 2
    NUM_CLASSES = 10

    params = init_params(IMAGE_SIZE, NUM_CLASSES, seed=0)
    key = jax.random.PRNGKey(0)
    x = jax.random.normal(key, (BATCH, 3, IMAGE_SIZE, IMAGE_SIZE),
                          dtype=jnp.float32)

    fwd = jax.jit(carlini_forward)
    out = fwd(x, params)
    out = jax.block_until_ready(out)
    assert out.shape == (BATCH, NUM_CLASSES), out.shape
    assert bool(jnp.all(jnp.isfinite(out)))
    print("KERNEL_OK")
</pallas_src>

<mosaic_0001>
module attributes {stable_mosaic.version = 11 : i64} {
  func.func @_carlini_kernel(%arg0: i32, %arg1: memref<1x16x16x3xf32, #tpu.memory_space<vmem>>, %arg2: memref<27x64xbf16, #tpu.memory_space<vmem>>, %arg3: memref<1x64xf32, #tpu.memory_space<vmem>>, %arg4: memref<576x64xbf16, #tpu.memory_space<vmem>>, %arg5: memref<1x64xf32, #tpu.memory_space<vmem>>, %arg6: memref<576x128xbf16, #tpu.memory_space<vmem>>, %arg7: memref<1x128xf32, #tpu.memory_space<vmem>>, %arg8: memref<1152x128xbf16, #tpu.memory_space<vmem>>, %arg9: memref<1x128xf32, #tpu.memory_space<vmem>>, %arg10: memref<128x256xbf16, #tpu.memory_space<vmem>>, %arg11: memref<1x256xf32, #tpu.memory_space<vmem>>, %arg12: memref<256x256xbf16, #tpu.memory_space<vmem>>, %arg13: memref<1x256xf32, #tpu.memory_space<vmem>>, %arg14: memref<256x10xbf16, #tpu.memory_space<vmem>>, %arg15: memref<1x10xf32, #tpu.memory_space<vmem>>, %arg16: memref<1x1x10xf32, #tpu.memory_space<vmem>>) attributes {dimension_semantics = [#tpu.dimension_semantics<parallel>], iteration_bounds = array<i64: 2>, scalar_prefetch = 0 : i64, scratch_operands = 0 : i64, tpu.core_type = #tpu.core_type<tc>, window_params = [{transform_indices = @transform_0, window_bounds = array<i64: 1, 16, 16, 3>}, {pipeline_mode = #tpu.pipeline_mode<synchronous>, transform_indices = @transform_1, window_bounds = array<i64: 27, 64>}, {pipeline_mode = #tpu.pipeline_mode<synchronous>, transform_indices = @transform_2, window_bounds = array<i64: 1, 64>}, {pipeline_mode = #tpu.pipeline_mode<synchronous>, transform_indices = @transform_3, window_bounds = array<i64: 576, 64>}, {pipeline_mode = #tpu.pipeline_mode<synchronous>, transform_indices = @transform_4, window_bounds = array<i64: 1, 64>}, {pipeline_mode = #tpu.pipeline_mode<synchronous>, transform_indices = @transform_5, window_bounds = array<i64: 576, 128>}, {pipeline_mode = #tpu.pipeline_mode<synchronous>, transform_indices = @transform_6, window_bounds = array<i64: 1, 128>}, {pipeline_mode = #tpu.pipeline_mode<synchronous>, transform_indices = @transform_7, window_bounds = array<i64: 1152, 128>}, {pipeline_mode = #tpu.pipeline_mode<synchronous>, transform_indices = @transform_8, window_bounds = array<i64: 1, 128>}, {pipeline_mode = #tpu.pipeline_mode<synchronous>, transform_indices = @transform_9, window_bounds = array<i64: 128, 256>}, {pipeline_mode = #tpu.pipeline_mode<synchronous>, transform_indices = @transform_10, window_bounds = array<i64: 1, 256>}, {pipeline_mode = #tpu.pipeline_mode<synchronous>, transform_indices = @transform_11, window_bounds = array<i64: 256, 256>}, {pipeline_mode = #tpu.pipeline_mode<synchronous>, transform_indices = @transform_12, window_bounds = array<i64: 1, 256>}, {pipeline_mode = #tpu.pipeline_mode<synchronous>, transform_indices = @transform_13, window_bounds = array<i64: 256, 10>}, {pipeline_mode = #tpu.pipeline_mode<synchronous>, transform_indices = @transform_14, window_bounds = array<i64: 1, 10>}, {transform_indices = @transform_15, window_bounds = array<i64: 1, 1, 10>}]} {
    %c0 = arith.constant 0 : index
    %c0_0 = arith.constant 0 : index
    %c0_1 = arith.constant 0 : index
    %c0_2 = arith.constant 0 : index
    %0 = vector.load %arg1[%c0, %c0_0, %c0_1, %c0_2] : memref<1x16x16x3xf32, #tpu.memory_space<vmem>>, vector<1x16x16x3xf32>
    %1 = arith.truncf %0 : vector<1x16x16x3xf32> to vector<1x16x16x3xbf16>
    %2 = vector.extract_strided_slice %1 {offsets = [0, 0, 0, 0], sizes = [1, 14, 14, 3], strides = [1, 1, 1, 1]} : vector<1x16x16x3xbf16> to vector<1x14x14x3xbf16>
    %3 = vector.extract_strided_slice %1 {offsets = [0, 0, 1, 0], sizes = [1, 14, 14, 3], strides = [1, 1, 1, 1]} : vector<1x16x16x3xbf16> to vector<1x14x14x3xbf16>
    %4 = vector.extract_strided_slice %1 {offsets = [0, 0, 2, 0], sizes = [1, 14, 14, 3], strides = [1, 1, 1, 1]} : vector<1x16x16x3xbf16> to vector<1x14x14x3xbf16>
    %5 = vector.extract_strided_slice %1 {offsets = [0, 1, 0, 0], sizes = [1, 14, 14, 3], strides = [1, 1, 1, 1]} : vector<1x16x16x3xbf16> to vector<1x14x14x3xbf16>
    %6 = vector.extract_strided_slice %1 {offsets = [0, 1, 1, 0], sizes = [1, 14, 14, 3], strides = [1, 1, 1, 1]} : vector<1x16x16x3xbf16> to vector<1x14x14x3xbf16>
    %7 = vector.extract_strided_slice %1 {offsets = [0, 1, 2, 0], sizes = [1, 14, 14, 3], strides = [1, 1, 1, 1]} : vector<1x16x16x3xbf16> to vector<1x14x14x3xbf16>
    %8 = vector.extract_strided_slice %1 {offsets = [0, 2, 0, 0], sizes = [1, 14, 14, 3], strides = [1, 1, 1, 1]} : vector<1x16x16x3xbf16> to vector<1x14x14x3xbf16>
    %9 = vector.extract_strided_slice %1 {offsets = [0, 2, 1, 0], sizes = [1, 14, 14, 3], strides = [1, 1, 1, 1]} : vector<1x16x16x3xbf16> to vector<1x14x14x3xbf16>
    %10 = vector.extract_strided_slice %1 {offsets = [0, 2, 2, 0], sizes = [1, 14, 14, 3], strides = [1, 1, 1, 1]} : vector<1x16x16x3xbf16> to vector<1x14x14x3xbf16>
    %11 = tpu.concatenate %2, %3, %4, %5, %6, %7, %8, %9, %10 in 3 : vector<1x14x14x3xbf16>, vector<1x14x14x3xbf16>, vector<1x14x14x3xbf16>, vector<1x14x14x3xbf16>, vector<1x14x14x3xbf16>, vector<1x14x14x3xbf16>, vector<1x14x14x3xbf16>, vector<1x14x14x3xbf16>, vector<1x14x14x3xbf16> -> vector<1x14x14x27xbf16>
    %12 = vector.shape_cast %11 : vector<1x14x14x27xbf16> to vector<196x27xbf16>
    %c0_3 = arith.constant 0 : index
    %c0_4 = arith.constant 0 : index
    %13 = vector.load %arg2[%c0_3, %c0_4] : memref<27x64xbf16, #tpu.memory_space<vmem>>, vector<27x64xbf16>
    %cst = arith.constant dense<0.000000e+00> : vector<196x64xf32>
    %14 = tpu.matmul %12, %13, %cst {dimension_numbers = #tpu.dot_dimension_numbers<[1], [0], [0], [1], [0, 0, 1, 1], [], []>} : vector<196x27xbf16>, vector<27x64xbf16>, vector<196x64xf32> -> vector<196x64xf32>
    %c0_5 = arith.constant 0 : index
    %c0_6 = arith.constant 0 : index
    %15 = vector.load %arg3[%c0_5, %c0_6] : memref<1x64xf32, #tpu.memory_space<vmem>>, vector<1x64xf32>
    %16 = vector.broadcast %15 : vector<1x64xf32> to vector<196x64xf32>
    %17 = arith.addf %14, %16 : vector<196x64xf32>
    %cst_7 = arith.constant 0.000000e+00 : f32
    %18 = vector.broadcast %cst_7 : f32 to vector<196x64xf32>
    %19 = arith.maximumf %17, %18 : vector<196x64xf32>
    %20 = arith.truncf %19 : vector<196x64xf32> to vector<196x64xbf16>
    %21 = vector.shape_cast %20 : vector<196x64xbf16> to vector<1x14x14x64xbf16>
    %22 = vector.extract_strided_slice %21 {offsets = [0, 0, 0, 0], sizes = [1, 12, 12, 64], strides = [1, 1, 1, 1]} : vector<1x14x14x64xbf16> to vector<1x12x12x64xbf16>
    %23 = vector.extract_strided_slice %21 {offsets = [0, 0, 1, 0], sizes = [1, 12, 12, 64], strides = [1, 1, 1, 1]} : vector<1x14x14x64xbf16> to vector<1x12x12x64xbf16>
    %24 = vector.extract_strided_slice %21 {offsets = [0, 0, 2, 0], sizes = [1, 12, 12, 64], strides = [1, 1, 1, 1]} : vector<1x14x14x64xbf16> to vector<1x12x12x64xbf16>
    %25 = vector.extract_strided_slice %21 {offsets = [0, 1, 0, 0], sizes = [1, 12, 12, 64], strides = [1, 1, 1, 1]} : vector<1x14x14x64xbf16> to vector<1x12x12x64xbf16>
    %26 = vector.extract_strided_slice %21 {offsets = [0, 1, 1, 0], sizes = [1, 12, 12, 64], strides = [1, 1, 1, 1]} : vector<1x14x14x64xbf16> to vector<1x12x12x64xbf16>
    %27 = vector.extract_strided_slice %21 {offsets = [0, 1, 2, 0], sizes = [1, 12, 12, 64], strides = [1, 1, 1, 1]} : vector<1x14x14x64xbf16> to vector<1x12x12x64xbf16>
    %28 = vector.extract_strided_slice %21 {offsets = [0, 2, 0, 0], sizes = [1, 12, 12, 64], strides = [1, 1, 1, 1]} : vector<1x14x14x64xbf16> to vector<1x12x12x64xbf16>
    %29 = vector.extract_strided_slice %21 {offsets = [0, 2, 1, 0], sizes = [1, 12, 12, 64], strides = [1, 1, 1, 1]} : vector<1x14x14x64xbf16> to vector<1x12x12x64xbf16>
    %30 = vector.extract_strided_slice %21 {offsets = [0, 2, 2, 0], sizes = [1, 12, 12, 64], strides = [1, 1, 1, 1]} : vector<1x14x14x64xbf16> to vector<1x12x12x64xbf16>
    %31 = tpu.concatenate %22, %23, %24, %25, %26, %27, %28, %29, %30 in 3 : vector<1x12x12x64xbf16>, vector<1x12x12x64xbf16>, vector<1x12x12x64xbf16>, vector<1x12x12x64xbf16>, vector<1x12x12x64xbf16>, vector<1x12x12x64xbf16>, vector<1x12x12x64xbf16>, vector<1x12x12x64xbf16>, vector<1x12x12x64xbf16> -> vector<1x12x12x576xbf16>
    %32 = vector.shape_cast %31 : vector<1x12x12x576xbf16> to vector<144x576xbf16>
    %c0_8 = arith.constant 0 : index
    %c0_9 = arith.constant 0 : index
    %33 = vector.load %arg4[%c0_8, %c0_9] : memref<576x64xbf16, #tpu.memory_space<vmem>>, vector<576x64xbf16>
    %cst_10 = arith.constant dense<0.000000e+00> : vector<144x64xf32>
    %34 = tpu.matmul %32, %33, %cst_10 {dimension_numbers = #tpu.dot_dimension_numbers<[1], [0], [0], [1], [0, 0, 1, 1], [], []>} : vector<144x576xbf16>, vector<576x64xbf16>, vector<144x64xf32> -> vector<144x64xf32>
    %c0_11 = arith.constant 0 : index
    %c0_12 = arith.constant 0 : index
    %35 = vector.load %arg5[%c0_11, %c0_12] : memref<1x64xf32, #tpu.memory_space<vmem>>, vector<1x64xf32>
    %36 = vector.broadcast %35 : vector<1x64xf32> to vector<144x64xf32>
    %37 = arith.addf %34, %36 : vector<144x64xf32>
    %cst_13 = arith.constant 0.000000e+00 : f32
    %38 = vector.broadcast %cst_13 : f32 to vector<144x64xf32>
    %39 = arith.maximumf %37, %38 : vector<144x64xf32>
    %40 = arith.truncf %39 : vector<144x64xf32> to vector<144x64xbf16>
    %41 = vector.shape_cast %40 : vector<144x64xbf16> to vector<1x12x12x64xbf16>
    %42 = vector.shape_cast %41 : vector<1x12x12x64xbf16> to vector<1x6x2x12x64xbf16>
    %cst_14 = arith.constant dense<0xFF80> : vector<1x6x12x64xbf16>
    %43 = vector.multi_reduction <maximumf>, %42, %cst_14 [2] : vector<1x6x2x12x64xbf16> to vector<1x6x12x64xbf16>
    %44 = vector.shape_cast %43 : vector<1x6x12x64xbf16> to vector<1x6x6x2x64xbf16>
    %cst_15 = arith.constant dense<0xFF80> : vector<1x6x6x64xbf16>
    %45 = vector.multi_reduction <maximumf>, %44, %cst_15 [3] : vector<1x6x6x2x64xbf16> to vector<1x6x6x64xbf16>
    %46 = vector.extract_strided_slice %45 {offsets = [0, 0, 0, 0], sizes = [1, 4, 4, 64], strides = [1, 1, 1, 1]} : vector<1x6x6x64xbf16> to vector<1x4x4x64xbf16>
    %47 = vector.extract_strided_slice %45 {offsets = [0, 0, 1, 0], sizes = [1, 4, 4, 64], strides = [1, 1, 1, 1]} : vector<1x6x6x64xbf16> to vector<1x4x4x64xbf16>
    %48 = vector.extract_strided_slice %45 {offsets = [0, 0, 2, 0], sizes = [1, 4, 4, 64], strides = [1, 1, 1, 1]} : vector<1x6x6x64xbf16> to vector<1x4x4x64xbf16>
    %49 = vector.extract_strided_slice %45 {offsets = [0, 1, 0, 0], sizes = [1, 4, 4, 64], strides = [1, 1, 1, 1]} : vector<1x6x6x64xbf16> to vector<1x4x4x64xbf16>
    %50 = vector.extract_strided_slice %45 {offsets = [0, 1, 1, 0], sizes = [1, 4, 4, 64], strides = [1, 1, 1, 1]} : vector<1x6x6x64xbf16> to vector<1x4x4x64xbf16>
    %51 = vector.extract_strided_slice %45 {offsets = [0, 1, 2, 0], sizes = [1, 4, 4, 64], strides = [1, 1, 1, 1]} : vector<1x6x6x64xbf16> to vector<1x4x4x64xbf16>
    %52 = vector.extract_strided_slice %45 {offsets = [0, 2, 0, 0], sizes = [1, 4, 4, 64], strides = [1, 1, 1, 1]} : vector<1x6x6x64xbf16> to vector<1x4x4x64xbf16>
    %53 = vector.extract_strided_slice %45 {offsets = [0, 2, 1, 0], sizes = [1, 4, 4, 64], strides = [1, 1, 1, 1]} : vector<1x6x6x64xbf16> to vector<1x4x4x64xbf16>
    %54 = vector.extract_strided_slice %45 {offsets = [0, 2, 2, 0], sizes = [1, 4, 4, 64], strides = [1, 1, 1, 1]} : vector<1x6x6x64xbf16> to vector<1x4x4x64xbf16>
    %55 = tpu.concatenate %46, %47, %48, %49, %50, %51, %52, %53, %54 in 3 : vector<1x4x4x64xbf16>, vector<1x4x4x64xbf16>, vector<1x4x4x64xbf16>, vector<1x4x4x64xbf16>, vector<1x4x4x64xbf16>, vector<1x4x4x64xbf16>, vector<1x4x4x64xbf16>, vector<1x4x4x64xbf16>, vector<1x4x4x64xbf16> -> vector<1x4x4x576xbf16>
    %56 = vector.shape_cast %55 : vector<1x4x4x576xbf16> to vector<16x576xbf16>
    %c0_16 = arith.constant 0 : index
    %c0_17 = arith.constant 0 : index
    %57 = vector.load %arg6[%c0_16, %c0_17] : memref<576x128xbf16, #tpu.memory_space<vmem>>, vector<576x128xbf16>
    %cst_18 = arith.constant dense<0.000000e+00> : vector<16x128xf32>
    %58 = tpu.matmul %56, %57, %cst_18 {dimension_numbers = #tpu.dot_dimension_numbers<[1], [0], [0], [1], [0, 0, 1, 1], [], []>} : vector<16x576xbf16>, vector<576x128xbf16>, vector<16x128xf32> -> vector<16x128xf32>
    %c0_19 = arith.constant 0 : index
    %c0_20 = arith.constant 0 : index
    %59 = vector.load %arg7[%c0_19, %c0_20] : memref<1x128xf32, #tpu.memory_space<vmem>>, vector<1x128xf32>
    %60 = vector.broadcast %59 : vector<1x128xf32> to vector<16x128xf32>
    %61 = arith.addf %58, %60 : vector<16x128xf32>
    %cst_21 = arith.constant 0.000000e+00 : f32
    %62 = vector.broadcast %cst_21 : f32 to vector<16x128xf32>
    %63 = arith.maximumf %61, %62 : vector<16x128xf32>
    %64 = arith.truncf %63 : vector<16x128xf32> to vector<16x128xbf16>
    %65 = vector.shape_cast %64 : vector<16x128xbf16> to vector<1x4x4x128xbf16>
    %66 = vector.extract_strided_slice %65 {offsets = [0, 0, 0, 0], sizes = [1, 2, 2, 128], strides = [1, 1, 1, 1]} : vector<1x4x4x128xbf16> to vector<1x2x2x128xbf16>
    %67 = vector.extract_strided_slice %65 {offsets = [0, 0, 1, 0], sizes = [1, 2, 2, 128], strides = [1, 1, 1, 1]} : vector<1x4x4x128xbf16> to vector<1x2x2x128xbf16>
    %68 = vector.extract_strided_slice %65 {offsets = [0, 0, 2, 0], sizes = [1, 2, 2, 128], strides = [1, 1, 1, 1]} : vector<1x4x4x128xbf16> to vector<1x2x2x128xbf16>
    %69 = vector.extract_strided_slice %65 {offsets = [0, 1, 0, 0], sizes = [1, 2, 2, 128], strides = [1, 1, 1, 1]} : vector<1x4x4x128xbf16> to vector<1x2x2x128xbf16>
    %70 = vector.extract_strided_slice %65 {offsets = [0, 1, 1, 0], sizes = [1, 2, 2, 128], strides = [1, 1, 1, 1]} : vector<1x4x4x128xbf16> to vector<1x2x2x128xbf16>
    %71 = vector.extract_strided_slice %65 {offsets = [0, 1, 2, 0], sizes = [1, 2, 2, 128], strides = [1, 1, 1, 1]} : vector<1x4x4x128xbf16> to vector<1x2x2x128xbf16>
    %72 = vector.extract_strided_slice %65 {offsets = [0, 2, 0, 0], sizes = [1, 2, 2, 128], strides = [1, 1, 1, 1]} : vector<1x4x4x128xbf16> to vector<1x2x2x128xbf16>
    %73 = vector.extract_strided_slice %65 {offsets = [0, 2, 1, 0], sizes = [1, 2, 2, 128], strides = [1, 1, 1, 1]} : vector<1x4x4x128xbf16> to vector<1x2x2x128xbf16>
    %74 = vector.extract_strided_slice %65 {offsets = [0, 2, 2, 0], sizes = [1, 2, 2, 128], strides = [1, 1, 1, 1]} : vector<1x4x4x128xbf16> to vector<1x2x2x128xbf16>
    %75 = tpu.concatenate %66, %67, %68, %69, %70, %71, %72, %73, %74 in 3 : vector<1x2x2x128xbf16>, vector<1x2x2x128xbf16>, vector<1x2x2x128xbf16>, vector<1x2x2x128xbf16>, vector<1x2x2x128xbf16>, vector<1x2x2x128xbf16>, vector<1x2x2x128xbf16>, vector<1x2x2x128xbf16>, vector<1x2x2x128xbf16> -> vector<1x2x2x1152xbf16>
    %76 = vector.shape_cast %75 : vector<1x2x2x1152xbf16> to vector<4x1152xbf16>
    %c0_22 = arith.constant 0 : index
    %c0_23 = arith.constant 0 : index
    %77 = vector.load %arg8[%c0_22, %c0_23] : memref<1152x128xbf16, #tpu.memory_space<vmem>>, vector<1152x128xbf16>
    %cst_24 = arith.constant dense<0.000000e+00> : vector<4x128xf32>
    %78 = tpu.matmul %76, %77, %cst_24 {dimension_numbers = #tpu.dot_dimension_numbers<[1], [0], [0], [1], [0, 0, 1, 1], [], []>} : vector<4x1152xbf16>, vector<1152x128xbf16>, vector<4x128xf32> -> vector<4x128xf32>
    %c0_25 = arith.constant 0 : index
    %c0_26 = arith.constant 0 : index
    %79 = vector.load %arg9[%c0_25, %c0_26] : memref<1x128xf32, #tpu.memory_space<vmem>>, vector<1x128xf32>
    %80 = vector.broadcast %79 : vector<1x128xf32> to vector<4x128xf32>
    %81 = arith.addf %78, %80 : vector<4x128xf32>
    %cst_27 = arith.constant 0.000000e+00 : f32
    %82 = vector.broadcast %cst_27 : f32 to vector<4x128xf32>
    %83 = arith.maximumf %81, %82 : vector<4x128xf32>
    %84 = arith.truncf %83 : vector<4x128xf32> to vector<4x128xbf16>
    %85 = vector.shape_cast %84 : vector<4x128xbf16> to vector<1x2x2x128xbf16>
    %86 = vector.shape_cast %85 : vector<1x2x2x128xbf16> to vector<1x1x2x2x128xbf16>
    %cst_28 = arith.constant dense<0xFF80> : vector<1x1x2x128xbf16>
    %87 = vector.multi_reduction <maximumf>, %86, %cst_28 [2] : vector<1x1x2x2x128xbf16> to vector<1x1x2x128xbf16>
    %88 = vector.shape_cast %87 : vector<1x1x2x128xbf16> to vector<1x1x1x2x128xbf16>
    %cst_29 = arith.constant dense<0xFF80> : vector<1x1x1x128xbf16>
    %89 = vector.multi_reduction <maximumf>, %88, %cst_29 [3] : vector<1x1x1x2x128xbf16> to vector<1x1x1x128xbf16>
    %90 = vector.shape_cast %89 : vector<1x1x1x128xbf16> to vector<1x128xbf16>
    %c0_30 = arith.constant 0 : index
    %c0_31 = arith.constant 0 : index
    %91 = vector.load %arg10[%c0_30, %c0_31] : memref<128x256xbf16, #tpu.memory_space<vmem>>, vector<128x256xbf16>
    %cst_32 = arith.constant dense<0.000000e+00> : vector<1x256xf32>
    %92 = tpu.matmul %90, %91, %cst_32 {dimension_numbers = #tpu.dot_dimension_numbers<[1], [0], [0], [1], [0, 0, 1, 1], [], []>} : vector<1x128xbf16>, vector<128x256xbf16>, vector<1x256xf32> -> vector<1x256xf32>
    %c0_33 = arith.constant 0 : index
    %c0_34 = arith.constant 0 : index
    %93 = vector.load %arg11[%c0_33, %c0_34] : memref<1x256xf32, #tpu.memory_space<vmem>>, vector<1x256xf32>
    %94 = arith.addf %92, %93 : vector<1x256xf32>
    %cst_35 = arith.constant 0.000000e+00 : f32
    %95 = vector.broadcast %cst_35 : f32 to vector<1x256xf32>
    %96 = arith.maximumf %94, %95 : vector<1x256xf32>
    %97 = arith.truncf %96 : vector<1x256xf32> to vector<1x256xbf16>
    %c0_36 = arith.constant 0 : index
    %c0_37 = arith.constant 0 : index
    %98 = vector.load %arg12[%c0_36, %c0_37] : memref<256x256xbf16, #tpu.memory_space<vmem>>, vector<256x256xbf16>
    %cst_38 = arith.constant dense<0.000000e+00> : vector<1x256xf32>
    %99 = tpu.matmul %97, %98, %cst_38 {dimension_numbers = #tpu.dot_dimension_numbers<[1], [0], [0], [1], [0, 0, 1, 1], [], []>} : vector<1x256xbf16>, vector<256x256xbf16>, vector<1x256xf32> -> vector<1x256xf32>
    %c0_39 = arith.constant 0 : index
    %c0_40 = arith.constant 0 : index
    %100 = vector.load %arg13[%c0_39, %c0_40] : memref<1x256xf32, #tpu.memory_space<vmem>>, vector<1x256xf32>
    %101 = arith.addf %99, %100 : vector<1x256xf32>
    %cst_41 = arith.constant 0.000000e+00 : f32
    %102 = vector.broadcast %cst_41 : f32 to vector<1x256xf32>
    %103 = arith.maximumf %101, %102 : vector<1x256xf32>
    %104 = arith.truncf %103 : vector<1x256xf32> to vector<1x256xbf16>
    %c0_42 = arith.constant 0 : index
    %c0_43 = arith.constant 0 : index
    %105 = vector.load %arg14[%c0_42, %c0_43] : memref<256x10xbf16, #tpu.memory_space<vmem>>, vector<256x10xbf16>
    %cst_44 = arith.constant dense<0.000000e+00> : vector<1x10xf32>
    %106 = tpu.matmul %104, %105, %cst_44 {dimension_numbers = #tpu.dot_dimension_numbers<[1], [0], [0], [1], [0, 0, 1, 1], [], []>} : vector<1x256xbf16>, vector<256x10xbf16>, vector<1x10xf32> -> vector<1x10xf32>
    %c0_45 = arith.constant 0 : index
    %c0_46 = arith.constant 0 : index
    %107 = vector.load %arg15[%c0_45, %c0_46] : memref<1x10xf32, #tpu.memory_space<vmem>>, vector<1x10xf32>
    %108 = arith.addf %106, %107 : vector<1x10xf32>
    %109 = vector.shape_cast %108 : vector<1x10xf32> to vector<1x1x10xf32>
    %c0_47 = arith.constant 0 : index
    %c0_48 = arith.constant 0 : index
    %c0_49 = arith.constant 0 : index
    %110 = vector.load %arg16[%c0_47, %c0_48, %c0_49] : memref<1x1x10xf32, #tpu.memory_space<vmem>>, vector<1x1x10xf32>
    tpu.vector_store %arg16[%c0_47, %c0_48, %c0_49], %109 {strides = array<i32>} : memref<1x1x10xf32, #tpu.memory_space<vmem>>, vector<1x1x10xf32>,
    return
  }
  func.func @transform_0(%arg0: i32) -> (i32, i32, i32, i32) {
    %c0_i32 = arith.constant 0 : i32
    %c0_i32_0 = arith.constant 0 : i32
    %c0_i32_1 = arith.constant 0 : i32
    %c0_i32_2 = arith.constant 0 : i32
    return %arg0, %c0_i32, %c0_i32_0, %c0_i32_1 : i32, i32, i32, i32
  }
  func.func @transform_1(%arg0: i32) -> (i32, i32) {
    %c0_i32 = arith.constant 0 : i32
    %c0_i32_0 = arith.constant 0 : i32
    %c0_i32_1 = arith.constant 0 : i32
    return %c0_i32, %c0_i32_0 : i32, i32
  }
  func.func @transform_2(%arg0: i32) -> (i32, i32) {
    %c0_i32 = arith.constant 0 : i32
    %c0_i32_0 = arith.constant 0 : i32
    %c0_i32_1 = arith.constant 0 : i32
    return %c0_i32, %c0_i32_0 : i32, i32
  }
  func.func @transform_3(%arg0: i32) -> (i32, i32) {
    %c0_i32 = arith.constant 0 : i32
    %c0_i32_0 = arith.constant 0 : i32
    %c0_i32_1 = arith.constant 0 : i32
    return %c0_i32, %c0_i32_0 : i32, i32
  }
  func.func @transform_4(%arg0: i32) -> (i32, i32) {
    %c0_i32 = arith.constant 0 : i32
    %c0_i32_0 = arith.constant 0 : i32
    %c0_i32_1 = arith.constant 0 : i32
    return %c0_i32, %c0_i32_0 : i32, i32
  }
  func.func @transform_5(%arg0: i32) -> (i32, i32) {
    %c0_i32 = arith.constant 0 : i32
    %c0_i32_0 = arith.constant 0 : i32
    %c0_i32_1 = arith.constant 0 : i32
    return %c0_i32, %c0_i32_0 : i32, i32
  }
  func.func @transform_6(%arg0: i32) -> (i32, i32) {
    %c0_i32 = arith.constant 0 : i32
    %c0_i32_0 = arith.constant 0 : i32
    %c0_i32_1 = arith.constant 0 : i32
    return %c0_i32, %c0_i32_0 : i32, i32
  }
  func.func @transform_7(%arg0: i32) -> (i32, i32) {
    %c0_i32 = arith.constant 0 : i32
    %c0_i32_0 = arith.constant 0 : i32
    %c0_i32_1 = arith.constant 0 : i32
    return %c0_i32, %c0_i32_0 : i32, i32
  }
  func.func @transform_8(%arg0: i32) -> (i32, i32) {
    %c0_i32 = arith.constant 0 : i32
    %c0_i32_0 = arith.constant 0 : i32
    %c0_i32_1 = arith.constant 0 : i32
    return %c0_i32, %c0_i32_0 : i32, i32
  }
  func.func @transform_9(%arg0: i32) -> (i32, i32) {
    %c0_i32 = arith.constant 0 : i32
    %c0_i32_0 = arith.constant 0 : i32
    %c0_i32_1 = arith.constant 0 : i32
    return %c0_i32, %c0_i32_0 : i32, i32
  }
  func.func @transform_10(%arg0: i32) -> (i32, i32) {
    %c0_i32 = arith.constant 0 : i32
    %c0_i32_0 = arith.constant 0 : i32
    %c0_i32_1 = arith.constant 0 : i32
    return %c0_i32, %c0_i32_0 : i32, i32
  }
  func.func @transform_11(%arg0: i32) -> (i32, i32) {
    %c0_i32 = arith.constant 0 : i32
    %c0_i32_0 = arith.constant 0 : i32
    %c0_i32_1 = arith.constant 0 : i32
    return %c0_i32, %c0_i32_0 : i32, i32
  }
  func.func @transform_12(%arg0: i32) -> (i32, i32) {
    %c0_i32 = arith.constant 0 : i32
    %c0_i32_0 = arith.constant 0 : i32
    %c0_i32_1 = arith.constant 0 : i32
    return %c0_i32, %c0_i32_0 : i32, i32
  }
  func.func @transform_13(%arg0: i32) -> (i32, i32) {
    %c0_i32 = arith.constant 0 : i32
    %c0_i32_0 = arith.constant 0 : i32
    %c0_i32_1 = arith.constant 0 : i32
    return %c0_i32, %c0_i32_0 : i32, i32
  }
  func.func @transform_14(%arg0: i32) -> (i32, i32) {
    %c0_i32 = arith.constant 0 : i32
    %c0_i32_0 = arith.constant 0 : i32
    %c0_i32_1 = arith.constant 0 : i32
    return %c0_i32, %c0_i32_0 : i32, i32
  }
  func.func @transform_15(%arg0: i32) -> (i32, i32, i32) {
    %c0_i32 = arith.constant 0 : i32
    %c0_i32_0 = arith.constant 0 : i32
    %c0_i32_1 = arith.constant 0 : i32
    return %arg0, %c0_i32, %c0_i32_0 : i32, i32, i32
  }
}

</mosaic_0001>

<bundles_post_ra>
// kernel: carlini_forward.1
= control target key start
LH: loop header
LB: loop body
LE: loop exit
PB: predicated region body
PF: predicated region fallthrough
CT: control target
= control target key end

     0   :  { %s14665_s0 = inlined_call_operand.vmem [shape: f32[2,16,16,3], index: 0, kind: input, shape index: {}]   ;;  %s14666_s1 = inlined_call_operand.vmem [shape: bf16[27,64], index: 1, kind: input, shape index: {}]   ;;  %s14667_s2 = inlined_call_operand.vmem [shape: f32[1,64], index: 2, kind: input, shape index: {}]   ;;  %s14668_s3 = inlined_call_operand.vmem [shape: bf16[576,64], index: 3, kind: input, shape index: {}]   ;;  %s14669_s4 = inlined_call_operand.vmem [shape: f32[1,64], index: 4, kind: input, shape index: {}]   ;;  %s14670_s5 = inlined_call_operand.vmem [shape: bf16[576,128], index: 5, kind: input, shape index: {}]   ;;  %s14671_s6 = inlined_call_operand.vmem [shape: f32[1,128], index: 6, kind: input, shape index: {}]   ;;  %s14672_s7 = inlined_call_operand.vmem [shape: bf16[1152,128], index: 7, kind: input, shape index: {}]   ;;  %s14673_s8 = inlined_call_operand.vmem [shape: f32[1,128], index: 8, kind: input, shape index: {}]   ;;  %s14674_s9 = inlined_call_operand.vmem [shape: bf16[128,256], index: 9, kind: input, shape index: {}]   ;;  %s14675_s10 = inlined_call_operand.vmem [shape: f32[1,256], index: 10, kind: input, shape index: {}]   ;;  %s14676_s11 = inlined_call_operand.vmem [shape: bf16[256,256], index: 11, kind: input, shape index: {}]   ;;  %s14677_s12 = inlined_call_operand.vmem [shape: f32[1,256], index: 12, kind: input, shape index: {}]   ;;  %s14678_s13 = inlined_call_operand.vmem [shape: bf16[256,10], index: 13, kind: input, shape index: {}]   ;;  %s14679_s14 = inlined_call_operand.vmem [shape: f32[1,10], index: 14, kind: input, shape index: {}]   ;;  %s14680_s15 = inlined_call_operand.hbm [shape: f32[2,1,10], index: 15, kind: output, shape index: {}]  }
   0x1   :  { %14716 = sst [smem:[#allocation20_spill]] %s14665_s0 }
   0x2   :  { %20 = vsyncpa [#allocation3], 0 }
   0x3   :  { %22 = vsyncpa [#allocation3 + $0x1], 0  ;;  %s11487_s18 = smov 0   ;;  %s11489_s19 = smov 0  }
   0x4   :  { %s11491_s20 = smov 0   ;;  %s11493_s21 = smov 0  }
   0x5 LB: > { %14717 = sst [smem:[#allocation5_spill]] %s11385_s20  ;;  %s11508_s22 = sadd.s32 4294967295, %s11389_s21   ;;  %s11389_s21 = sphi %s11493_s21, %s14775_s21   ;;  %s11385_s20 = sphi %s11491_s20, %s14777_s20   ;;  %s11381_s19 = sphi %s11489_s19, %s14779_s19   ;;  %s11377_s18 = sphi %s11487_s18, %s14778_s18  }
   0x6   : > { %s10234_s23 = sadd.s32 4294967294, %s11389_s21   ;;  %s11512_s24 = sadd.s32 1, %s11389_s21  }
   0x7   : > { %14718 = sst [smem:[#allocation6_spill]] %s11512_s24  ;;  %s355_s25 = sadd.s32 1, %s11385_s20 }
   0x8   : > { %s352_s26 = ssub.s32 %s11389_s21, %s11512_s24  ;;  %p365_p0 = scmp.ne.s32.totalorder %s11385_s20, %s11381_s19 }
   0x9   : > { %p353_p1 = scmp.eq.s32.totalorder %s352_s26, 0  ;;  %p366_p2 = scmp.eq.s32.totalorder %s11508_s22, 1 }
   0xa   : > { %p371_p3 = scmp.ne.s32.totalorder %s11381_s19, %s11377_s18  ;;  %p372_p4 = scmp.eq.s32.totalorder %s10234_s23, 1 }
   0xb   : > { %s11523_s27 = scalar_select %p353_p1, %s11385_s20, %s355_s25  }
   0xc   : > { %p11525_p5 = por %p366_p2, %p365_p0  ;;  %p11529_p6 = por %p372_p4, %p371_p3 }
   0xd   : > { %14719 = sst [smem:[#allocation7_spill]] %s11523_s27  ;;  %p10237_p7 = scmp.ge.s32.totalorder %s11389_s21, 1 }
   0xe   : > { %s14721_s29 = scalar_select %p11529_p6, 1, 0 }
   0xf   : > { %p440_p8 = scmp.lt.s32.totalorder %s11389_s21, 3 }
  0x10   : > { %14722 = sst [smem:[#allocation8_spill]] %s14721_s29 }
  0x11   : > { %p441_p9 = pnand %p10237_p7, %p440_p8 }
  0x13   : > { %444 = sbr.rel (%p441_p9) target bundleno = 2423 (0x977), region = 80 }
  0x18   : > { %p487_p10 = scmp.lt.s32.totalorder %s11508_s22, 1  ;;  %s14723_s0 = sld [smem:[#allocation20_spill]]  ;;  %vm2493_vm0 = vcmask 1044480   ;;  %v11094_v31 = vld [vmem:[%s14666_s1 + $0x8] sm:$0x3f]   ;;  %vm2494_vm1 = vcmask 1045504  }
  0x19   : > { %s14681_s26 = smov 9   ;;  %s14685_s17 = smov 15   ;;  %v11399_v32 = vmov 65535   ;;  %v14701_v39 = vmov 0.0   ;;  %v11095_v41 = vld [vmem:[%s14666_s1] sm:$0xff]   ;;  %vm11401_vm2 = vmmov 0  }
  0x1a   : > { %s488_s30 = scalar_select %p487_p10, %s11508_s22, 1  ;;  %v2495_v33 = vsel %vm2493_vm0, 4294967295, %v11399_v32  ;;  %10908 = vmatprep.subr.bf16.mxu0 %v14701_v39  ;;  %10912 = vmatprep.mubr.msk.bf16.mxu0 %vm11401_vm2, %v14701_v39  ;;  %vm910_vm3 = vcmask 23552   ;;  %vm939_vm4 = vcmask 48128   ;;  %vm968_vm5 = vcmask 72704  }
  0x1b   : > { %s14689_s23 = smov 3   ;;  %v2496_v37 = vsel %vm2494_vm1, %v2495_v33, 0  ;;  %s14729_s20 = smov 24   ;;  %vm997_vm6 = vcmask 97280   ;;  %vm1026_vm7 = vcmask 121856   ;;  %vm1055_vm8 = vcmask 146432  }
  0x1c   : > { %s10571_s16 = sshll.u32 %s488_s30, 8  ;;  %s14683_s30 = smov 6   ;;  %v2498_v38 = vand.u32 %v11094_v31, %v2496_v37  ;;  %v1160_v31 = vlaneseq  ;;  %vm1084_vm9 = vcmask 171008   ;;  %vm1113_vm10 = vcmask 195584  }
  0x1d   : > { %s14730_s24 = smov 6   ;;  %s14731_s29 = smov 12   ;;  %vm2453_vm11 = vcmask 220160   ;;  %vm4815_vm12 = vcmask 523264   ;;  %vm6919_vm13 = vcmask 517120   ;;  %vm7209_vm14 = vcmask 516096  }
  0x1e   : > { %s11540_s25 = scalar_lea.vmem %s14723_s0, %s10571_s16  ;;  %s14687_s16 = smov 18   ;;  %10909 = vmatpush3.bf16.msra.mxu0 %v2498_v38  ;;  %v11709_v38 = vshrl.u32 %v1160_v31, 7  ;;  %vm7710_vm15 = vcmask 1041409   ;;  %vm7712_vm0 = vcmask 1042434   ;;  %vm7714_vm1 = vcmask 1043459  }
  0x1f   : > { %v496_v0 = vld [vmem:[%s11540_s25 + $0x10] sm:$0xff]  ;;  %v497_v1 = vld [vmem:[%s11540_s25 + $0x18] sm:$0xff]  ;;  %v494_v2 = vld [vmem:[%s11540_s25] sm:$0xff]  ;;  %10910 = vmatprep.subr.bf16.mxu0 %v14701_v39  ;;  %s14728_s0 = smov 3   ;;  %s485_s27 = sand.u32 1, %s11381_s19  }
  0x20   : > { %v11545_v3 = vpack.c.bf16 %v497_v1, %v496_v0  ;;  %v495_v4 = vld [vmem:[%s11540_s25 + $0x8] sm:$0xff]  ;;  %v498_v5 = vld [vmem:[%s11540_s25 + $0x20] sm:$0xff]  ;;  %v500_v22 = vld [vmem:[%s11540_s25 + $0x30] sm:$0xff]  ;;  %14732 = vst [vmem:[#allocation9_spill] sm:$0xff] %v11709_v38 }
  0x21   : > { %v499_v6 = vld [vmem:[%s11540_s25 + $0x28] sm:$0xff]  ;;  %v11550_v7 = vpack.c.bf16 %v495_v4, %v494_v2  ;;  %v501_v23 = vld [vmem:[%s11540_s25 + $0x38] sm:$0xff]  ;;  %v502_v35 = vld [vmem:[%s11540_s25 + $0x40] sm:$0xff] }
  0x22   : > { %725 = vrot.lane.b32.xlu1 %v11545_v3, %s14681_s26  ;;  %v11554_v8 = vpack.c.bf16 %v499_v6, %v498_v5  ;;  %v552_v9 = vshll.u32 %v11545_v3, 16  ;;  %v683_v12 = vrot.slane %v11545_v3, 1  ;;  %v550_v15 = vshrl.u32 %v11545_v3, 16  ;;  %s14695_s26 = smov 12   ;;  %v503_v36 = vld [vmem:[%s11540_s25 + $0x48] sm:$0xff]  ;;  %10911 = vmatpush3.bf16.msra.mxu0 %v11095_v41  ;;  %v504_v43 = vld [vmem:[%s11540_s25 + $0x50] sm:$0xff] }
  0x23   : > { %v682_v10 = vrot.slane %v11550_v7, 1  ;;  %v545_v11 = vshll.u32 %v11550_v7, 16  ;;  %v543_v13 = vshrl.u32 %v11550_v7, 16  ;;  %v11573_v25 = vpack.c.bf16 %v501_v23, %v500_v22  ;;  %10964 = vmatprep.subr.bf16.mxu0 %v14701_v39  ;;  %v505_v44 = vld [vmem:[%s11540_s25 + $0x58] sm:$0xff]  ;;  %v506_v51 = vld [vmem:[%s11540_s25 + $0x60] sm:$0xff]  ;;  %v507_v52 = vld [vmem:[%s11540_s25 + $0x68] sm:$0xff] }
  0x24   : > { %v554_v16 = vrot.slane %v552_v9, 1  ;;  %v559_v17 = vshll.u32 %v11554_v8, 16  ;;  %v557_v20 = vshrl.u32 %v11554_v8, 16  ;;  %v684_v26 = vrot.slane %v11554_v8, 1  ;;  %v508_v61 = vld [vmem:[%s11540_s25 + $0x70] sm:$0xff]  ;;  %v509_v62 = vld [vmem:[%s11540_s25 + $0x78] sm:$0xff] }
  0x25   : > { %696 = vrot.lane.b32.xlu0 %v682_v10, %s14683_s30  ;;  %v547_v14 = vrot.slane %v545_v11, 1  ;;  %v566_v27 = vshll.u32 %v11573_v25, 16  ;;  %v564_v28 = vshrl.u32 %v11573_v25, 16  ;;  %v685_v34 = vrot.slane %v11573_v25, 1  ;;  %v510_v4 = vld [vmem:[%s11540_s25 + $0x80] sm:$0xff]  ;;  %v511_v5 = vld [vmem:[%s11540_s25 + $0x88] sm:$0xff] }
  0x26   : > { %818 = vrot.lane.b32.xlu1 %v11554_v8, %s14687_s16  ;;  %v555_v19 = vor.u32 %v554_v16, %v550_v15  ;;  %v561_v21 = vrot.slane %v559_v17, 1  ;;  %s14693_s16 = smov 24   ;;  %v11597_v40 = vpack.c.bf16 %v503_v36, %v502_v35  ;;  %v11617_v48 = vpack.c.bf16 %v505_v44, %v504_v43  ;;  %v512_v6 = vld [vmem:[%s11540_s25 + $0x90] sm:$0xff]  ;;  %v513_v9 = vld [vmem:[%s11540_s25 + $0x98] sm:$0xff]  ;;  %v514_v23 = vld [vmem:[%s11540_s25 + $0xa0] sm:$0xff] }
  0x27   : > { %v548_v18 = vor.u32 %v547_v14, %v543_v13  ;;  %v568_v29 = vrot.slane %v566_v27, 1  ;;  %v11627_v53 = vpack.c.bf16 %v507_v52, %v506_v51  ;;  %v11652_v1 = vpack.c.bf16 %v509_v62, %v508_v61 }
  0x28   : > { %v562_v24 = vor.u32 %v561_v21, %v557_v20  ;;  %v573_v42 = vshll.u32 %v11597_v40, 16  ;;  %v686_v45 = vrot.slane %v11597_v40, 1  ;;  %v571_v46 = vshrl.u32 %v11597_v40, 16 }
  0x29   : > { %698 = vrot.lane.b32.xlu0 %v683_v12, %s14683_s30  ;;  %s14691_s30 = smov 21   ;;  %v569_v30 = vor.u32 %v568_v29, %v564_v28  ;;  %v580_v50 = vshll.u32 %v11617_v48, 16  ;;  %v687_v54 = vrot.slane %v11617_v48, 1  ;;  %v578_v55 = vshrl.u32 %v11617_v48, 16 }
  0x2a   : > { %789 = vrot.lane.b32.xlu1 %v683_v12, %s14685_s17  ;;  %s14724_s17 = smov 9   ;;  %v575_v47 = vrot.slane %v573_v42, 1  ;;  %v587_v57 = vshll.u32 %v11627_v53, 16  ;;  %v585_v59 = vshrl.u32 %v11627_v53, 16  ;;  %v688_v0 = vrot.slane %v11627_v53, 1 }
  0x2b   : > { %v582_v56 = vrot.slane %v580_v50, 1  ;;  %v594_v2 = vshll.u32 %v11652_v1, 16  ;;  %v11664_v10 = vpack.c.bf16 %v511_v5, %v510_v4  ;;  %v689_v11 = vrot.slane %v11652_v1, 1  ;;  %v517_v4 = vld [vmem:[%s11540_s25 + $0xb8] sm:$0xff] }
  0x2c   : > { %v576_v49 = vor.u32 %v575_v47, %v571_v46  ;;  %v589_v60 = vrot.slane %v587_v57, 1  ;;  %v592_v12 = vshrl.u32 %v11652_v1, 16  ;;  %v11673_v15 = vpack.c.bf16 %v513_v9, %v512_v6 }
  0x2d   : > { %640 = vrot.lane.b32.xlu0 %v548_v18, %s14689_s23  ;;  %v583_v58 = vor.u32 %v582_v56, %v578_v55  ;;  %v596_v13 = vrot.slane %v594_v2, 1  ;;  %v690_v14 = vrot.slane %v11664_v10, 1  ;;  %v601_v16 = vshll.u32 %v11664_v10, 16  ;;  %v516_v2 = vld [vmem:[%s11540_s25 + $0xb0] sm:$0xff] }
  0x2e   : > { %760 = vrot.lane.b32.xlu1 %v555_v19, %s14695_s26  ;;  %v590_v63 = vor.u32 %v589_v60, %v585_v59  ;;  %v599_v18 = vshrl.u32 %v11664_v10, 16  ;;  %v606_v28 = vshrl.u32 %v11673_v15, 16  ;;  %v11402_v36 = vmov 1966171168  }
  0x2f   : > { %v597_v17 = vor.u32 %v596_v13, %v592_v12  ;;  %v603_v20 = vrot.slane %v601_v16, 1  ;;  %v1158_v37 = vunpack.c.l.s4 %v11402_v36  ;;  %v11746_v13 = vpack.c.bf16 %v517_v4, %v516_v2 }
  0x31   : > { %642 = vrot.lane.b32.xlu0 %v555_v19, %s14689_s23  ;;  %s14725_s23 = smov 18   ;;  %v608_v19 = vshll.u32 %v11673_v15, 16  ;;  %v604_v21 = vor.u32 %v603_v20, %v599_v18  ;;  %v1159_v47 = vunpack.c.0.s8 %v1158_v37  ;;  %v620_v36 = vshrl.u32 %v11746_v13, 16 }
  0x32   : > { %853 = vrot.lane.b32.xlu1 %v562_v24, %s14691_s30  ;;  %v11795_v2 = vrot.slane %v11746_v13, 1 }
  0x33   : > { %v610_v29 = vrot.slane %v608_v19, 1 }
  0x35   : > { %727 = vrot.lane.b32.xlu0 %v11554_v8, %s14724_s17  ;;  %v611_v35 = vor.u32 %v610_v29, %v606_v28 }
  0x36   : > { %882 = vrot.lane.b32.xlu1 %v684_v26, %s14693_s16  ;;  %s14726_s16 = smov 15  }
  0x39   : > { %762 = vrot.lane.b32.xlu0 %v562_v24, %s14695_s26  ;;  %s14727_s26 = smov 21  }
  0x3a   : > { %820 = vrot.lane.b32.xlu1 %v11573_v25, %s14725_s23 }
  0x3d   : > { %791 = vrot.lane.b32.xlu0 %v684_v26, %s14726_s16 }
  0x3e   : > { %855 = vrot.lane.b32.xlu1 %v569_v30, %s14727_s26 }
  0x41   : > { %644 = vrot.lane.b32.xlu0 %v562_v24, %s14728_s0  ;;  %v515_v24 = vld [vmem:[%s11540_s25 + $0xa8] sm:$0xff] }
  0x42   : > { %884 = vrot.lane.b32.xlu1 %v685_v34, %s14729_s20  ;;  %v11704_v32 = vpack.c.bf16 %v515_v24, %v514_v23  ;;  %v622_v23 = vshll.u32 %v11746_v13, 16 }
  0x44   : > { %v615_v41 = vshll.u32 %v11704_v32, 16  ;;  %v613_v59 = vshrl.u32 %v11704_v32, 16  ;;  %v624_v37 = vrot.slane %v622_v23, 1 }
  0x45   : > { %700 = vrot.lane.b32.xlu0 %v684_v26, %s14730_s24 }
  0x46   : > { %764 = vrot.lane.b32.xlu1 %v569_v30, %s14731_s29 }
  0x49   : > { %729 = vrot.lane.b32.xlu0 %v11573_v25, %s14724_s17 }
  0x4a   : > { %822 = vrot.lane.b32.xlu1 %v11597_v40, %s14725_s23 }
  0x4d   : > { %793 = vrot.lane.b32.xlu0 %v685_v34, %s14726_s16 }
  0x4e   : > { %886 = vrot.lane.b32.xlu1 %v686_v45, %s14729_s20 }
  0x51   : > { %857 = vrot.lane.b32.xlu0 %v576_v49, %s14727_s26 }
  0x52   : > { %702 = vrot.lane.b32.xlu1 %v685_v34, %s14730_s24 }
  0x55   : > { %646 = vrot.lane.b32.xlu0 %v569_v30, %s14728_s0  ;;  %v11702_v30 = vrot.slane %v11673_v15, 1 }
  0x56   : > { %766 = vrot.lane.b32.xlu1 %v576_v49, %s14731_s29 }
  0x59   : > { %731 = vrot.lane.b32.xlu0 %v11597_v40, %s14724_s17 }
  0x5a   : > { %824 = vrot.lane.b32.xlu1 %v11617_v48, %s14725_s23 }
  0x5d   : > { %795 = vrot.lane.b32.xlu0 %v686_v45, %s14726_s16 }
  0x5e   : > { %888 = vrot.lane.b32.xlu1 %v687_v54, %s14729_s20 }
  0x61   : > { %859 = vrot.lane.b32.xlu0 %v583_v58, %s14727_s26 }
  0x62   : > { %704 = vrot.lane.b32.xlu1 %v686_v45, %s14730_s24 }
  0x65   : > { %648 = vrot.lane.b32.xlu0 %v576_v49, %s14728_s0 }
  0x66   : > { %768 = vrot.lane.b32.xlu1 %v583_v58, %s14731_s29 }
  0x69   : > { %733 = vrot.lane.b32.xlu0 %v11617_v48, %s14724_s17 }
  0x6a   : > { %826 = vrot.lane.b32.xlu1 %v11627_v53, %s14725_s23 }
  0x6d   : > { %797 = vrot.lane.b32.xlu0 %v687_v54, %s14726_s16 }
  0x6e   : > { %861 = vrot.lane.b32.xlu1 %v590_v63, %s14727_s26 }
  0x71   : > { %650 = vrot.lane.b32.xlu0 %v583_v58, %s14728_s0 }
  0x72   : > { %890 = vrot.lane.b32.xlu1 %v688_v0, %s14729_s20 }
  0x75   : > { %706 = vrot.lane.b32.xlu0 %v687_v54, %s14730_s24 }
  0x76   : > { %770 = vrot.lane.b32.xlu1 %v590_v63, %s14731_s29 }
  0x79   : > { %735 = vrot.lane.b32.xlu0 %v11627_v53, %s14724_s17 }
  0x7a   : > { %828 = vrot.lane.b32.xlu1 %v11652_v1, %s14725_s23 }
  0x7d   : > { %799 = vrot.lane.b32.xlu0 %v688_v0, %s14726_s16 }
  0x7e   : > { %892 = vrot.lane.b32.xlu1 %v689_v11, %s14729_s20 }
  0x81   : > { %863 = vrot.lane.b32.xlu0 %v597_v17, %s14727_s26 }
  0x82   : > { %708 = vrot.lane.b32.xlu1 %v688_v0, %s14730_s24 }
  0x85   : > { %652 = vrot.lane.b32.xlu0 %v590_v63, %s14728_s0  ;;  %v617_v63 = vrot.slane %v615_v41, 1 }
  0x86   : > { %772 = vrot.lane.b32.xlu1 %v597_v17, %s14731_s29 }
  0x87   : > { %v11744_v12 = vor.u32 %v617_v63, %v613_v59  ;;  %v518_v63 = vld [vmem:[%s11540_s25 + $0xc0] sm:$0xff] }
  0x89   : > { %737 = vrot.lane.b32.xlu0 %v11652_v1, %s14724_s17 }
  0x8a   : > { %830 = vrot.lane.b32.xlu1 %v11664_v10, %s14725_s23 }
  0x8d   : > { %801 = vrot.lane.b32.xlu0 %v689_v11, %s14726_s16 }
  0x8e   : > { %894 = vrot.lane.b32.xlu1 %v690_v14, %s14729_s20 }
  0x91   : > { %865 = vrot.lane.b32.xlu0 %v604_v21, %s14727_s26 }
  0x92   : > { %710 = vrot.lane.b32.xlu1 %v689_v11, %s14730_s24 }
  0x94   : > { %v726_v22 = vpop.permute.xlu1 %725 }
  0x95   : > { %654 = vrot.lane.b32.xlu0 %v597_v17, %s14728_s0 }
  0x96   : > { %774 = vrot.lane.b32.xlu1 %v604_v21, %s14731_s29 }
  0x97   : > { %v697_v26 = vpop.permute.xlu0 %696 }
  0x98   : > { %v819_v27 = vpop.permute.xlu1 %818 }
  0x99   : > { %739 = vrot.lane.b32.xlu0 %v11664_v10, %s14724_s17 }
  0x9a   : > { %832 = vrot.lane.b32.xlu1 %v11673_v15, %s14725_s23 }
  0x9b   : > { %v699_v33 = vpop.permute.xlu0 %698 }
  0x9c   : > { %v790_v34 = vpop.permute.xlu1 %789 }
  0x9d   : > { %803 = vrot.lane.b32.xlu0 %v690_v14, %s14726_s16 }
  0x9e   : > { %896 = vrot.lane.b32.xlu1 %v11702_v30, %s14729_s20 }
  0x9f   : > { %v641_v42 = vpop.permute.xlu0 %640 }
  0xa0   : > { %v912_v43 = vsel %vm910_vm3, %v11550_v7, %v641_v42  ;;  %v761_v44 = vpop.permute.xlu1 %760  ;;  %v11724_v7 = vsub.s32 %v1159_v47, %v11709_v38 }
  0xa1   : > { %v941_v45 = vsel %vm939_vm4, %v912_v43, %v697_v26  ;;  %867 = vrot.lane.b32.xlu0 %v611_v35, %s14727_s26 }
  0xa2   : > { %v970_v46 = vsel %vm968_vm5, %v941_v45, %v726_v22  ;;  %712 = vrot.lane.b32.xlu1 %v690_v14, %s14730_s24  ;;  %v11757_v22 = vrot.slane %v11704_v32, 1 }
  0xa3   : > { %v999_v49 = vsel %vm997_vm6, %v970_v46, %v761_v44  ;;  %v643_v50 = vpop.permute.xlu0 %642 }
  0xa4   : > { %v1028_v51 = vsel %vm1026_vm7, %v999_v49, %v790_v34  ;;  %v854_v52 = vpop.permute.xlu1 %853  ;;  %v914_v60 = vsel %vm910_vm3, %v11545_v3, %v643_v50 }
  0xa5   : > { %v1057_v54 = vsel %vm1055_vm8, %v1028_v51, %v819_v27  ;;  %656 = vrot.lane.b32.xlu0 %v604_v21, %s14728_s0  ;;  %v943_v9 = vsel %vm939_vm4, %v914_v60, %v699_v33  ;;  %v11778_v51 = vor.u32 %v624_v37, %v620_v36 }
  0xa6   : > { %776 = vrot.lane.b32.xlu1 %v611_v35, %s14731_s29  ;;  %v1086_v56 = vsel %vm1084_vm9, %v1057_v54, %v854_v52 }
  0xa7   : > { %v728_v55 = vpop.permute.xlu0 %727 }
  0xa8   : > { %v883_v57 = vpop.permute.xlu1 %882  ;;  %v972_v3 = vsel %vm968_vm5, %v943_v9, %v728_v55 }
  0xa9   : > { %v1115_v58 = vsel %vm1113_vm10, %v1086_v56, %v883_v57  ;;  %741 = vrot.lane.b32.xlu0 %v11673_v15, %s14724_s17 }
  0xaa   : > { %v1156_v61 = vcombine.high %v1115_v58, %v1115_v58  ;;  %v1163_v62 = vrot.slane %v1115_v58, %v11724_v7  ;;  %805 = vrot.lane.b32.xlu1 %v11702_v30, %s14726_s16 }
  0xab   : > { %v763_v0 = vpop.permute.xlu0 %762 }
  0xac   : > { %v1170_v5 = vrot.slane %v1156_v61, %v11724_v7  ;;  %v821_v6 = vpop.permute.xlu1 %820  ;;  %v1171_v11 = vcombine.high %v1163_v62, %v1163_v62  ;;  %v1001_v14 = vsel %vm997_vm6, %v972_v3, %v763_v0  ;;  %v1179_v24 = vrot.slane %v1163_v62, %v11724_v7  ;;  %v519_v0 = vld [vmem:[%s11540_s25 + $0xc8] sm:$0xff] }
  0xad   : > { %658 = vrot.lane.b32.xlu0 %v611_v35, %s14728_s0  ;;  %v11799_v3 = vpack.c.bf16 %v519_v0, %v518_v63  ;;  %v520_v63 = vld [vmem:[%s11540_s25 + $0xd0] sm:$0xff]  ;;  %v521_v0 = vld [vmem:[%s11540_s25 + $0xd8] sm:$0xff] }
  0xae   : > { %834 = vrot.lane.b32.xlu1 %v11704_v32, %s14725_s23  ;;  %v1172_v17 = vcombine.high %v1170_v5, %v1170_v5  ;;  %v1193_v20 = vrot.slane %v1171_v11, %v11724_v7  ;;  %v1186_v31 = vrot.slane %v1170_v5, %v11724_v7 }
  0xaf   : > { %v792_v16 = vpop.permute.xlu0 %791 }
  0xb0   : > { %v1030_v18 = vsel %vm1026_vm7, %v1001_v14, %v792_v16  ;;  %v856_v19 = vpop.permute.xlu1 %855  ;;  %v1200_v27 = vrot.slane %v1172_v17, %v11724_v7  ;;  %v1839_v33 = vcombine.low %v1179_v24, %v1193_v20  ;;  %v1202_v47 = vcombine.high %v1186_v31, %v1186_v31 }
  0xb1   : > { %v1059_v21 = vsel %vm1055_vm8, %v1030_v18, %v821_v6  ;;  %714 = vrot.lane.b32.xlu0 %v11702_v30, %s14730_s24  ;;  %v10241_v30 = vcombine.high %v1179_v24, %v1193_v20 }
  0xb2   : > { %869 = vrot.lane.b32.xlu1 %v11744_v12, %s14727_s26  ;;  %v1088_v28 = vsel %vm1084_vm9, %v1059_v21, %v856_v19  ;;  %v1841_v42 = vcombine.low %v1186_v31, %v1200_v27  ;;  %v1849_v45 = vrot.slane %v1839_v33, %v11724_v7  ;;  %v629_v31 = vshll.u32 %v11799_v3, 16 }
  0xb3   : > { %v645_v26 = vpop.permute.xlu0 %644  ;;  %v1856_v46 = vrot.slane %v10241_v30, %v11724_v7 }
  0xb4   : > { %v885_v29 = vpop.permute.xlu1 %884  ;;  %v916_v52 = vsel %vm910_vm3, %v11554_v8, %v645_v26  ;;  %v1863_v56 = vrot.slane %v1841_v42, %v11724_v7 }
  0xb5   : > { %v1117_v34 = vsel %vm1113_vm10, %v1088_v28, %v885_v29  ;;  %743 = vrot.lane.b32.xlu0 %v11704_v32, %s14724_s17  ;;  %v1871_v59 = vcombine.low %v1849_v45, %v1856_v46  ;;  %v631_v45 = vrot.slane %v629_v31, 1 }
  0xb6   : > { %v1211_v35 = vrot.slane %v1117_v34, %v11724_v7  ;;  %898 = vrot.lane.b32.xlu1 %v11757_v22, %s14729_s20  ;;  %v1204_v49 = vcombine.high %v1117_v34, %v1117_v34 }
  0xb7   : > { %v701_v41 = vpop.permute.xlu0 %700  ;;  %v1879_v17 = vrot.slane %v1871_v59, %v11724_v7 }
  0xb8   : > { %v1227_v43 = vrot.slane %v1211_v35, %v11724_v7  ;;  %v765_v44 = vpop.permute.xlu1 %764  ;;  %v1219_v50 = vcombine.high %v1211_v35, %v1211_v35  ;;  %v945_v57 = vsel %vm939_vm4, %v916_v52, %v701_v41  ;;  %v1218_v60 = vrot.slane %v1204_v49, %v11724_v7 }
  0xb9   : > { %778 = vrot.lane.b32.xlu0 %v11744_v12, %s14731_s29 }
  0xba   : > { %836 = vrot.lane.b32.xlu1 %v11746_v13, %s14725_s23  ;;  %v1842_v54 = vcombine.low %v1202_v47, %v1227_v43  ;;  %v1241_v8 = vrot.slane %v1219_v50, %v11724_v7  ;;  %v1220_v14 = vcombine.high %v1218_v60, %v1218_v60  ;;  %v1234_v16 = vrot.slane %v1218_v60, %v11724_v7 }
  0xbb   : > { %v730_v55 = vpop.permute.xlu0 %729  ;;  %v1249_v24 = vcombine.high %v1227_v43, %v1227_v43  ;;  %v11827_v43 = vrot.slane %v11799_v3, 1 }
  0xbc   : > { %v823_v58 = vpop.permute.xlu1 %822  ;;  %v1870_v61 = vrot.slane %v1842_v54, %v11724_v7  ;;  %v974_v62 = vsel %vm968_vm5, %v945_v57, %v730_v55  ;;  %v1251_v19 = vcombine.high %v1241_v8, %v1241_v8  ;;  %v1248_v28 = vrot.slane %v1220_v14, %v11724_v7 }
  0xbd   : > { %807 = vrot.lane.b32.xlu0 %v11757_v22, %s14726_s16  ;;  %v1003_v5 = vsel %vm997_vm6, %v974_v62, %v765_v44  ;;  %v1888_v36 = vcombine.low %v1241_v8, %v1249_v24  ;;  %v627_v44 = vshrl.u32 %v11799_v3, 16  ;;  %v11856_v14 = vpack.c.bf16 %v521_v0, %v520_v63 }
  0xbe   : > { %871 = vrot.lane.b32.xlu1 %v11778_v51, %s14727_s26  ;;  %v1872_v4 = vcombine.low %v1863_v56, %v1870_v61  ;;  %v1889_v33 = vcombine.low %v1251_v19, %v1234_v16 }
  0xbf   : > { %v794_v6 = vpop.permute.xlu0 %793  ;;  %v1898_v54 = vrot.slane %v1888_v36, %v11724_v7  ;;  %v11843_v59 = vor.u32 %v631_v45, %v627_v44  ;;  %v11888_v45 = vrot.slane %v11856_v14, 1 }
  0xc0   : > { %v1032_v9 = vsel %vm1026_vm7, %v1003_v5, %v794_v6  ;;  %v887_v11 = vpop.permute.xlu1 %886  ;;  %v1886_v18 = vrot.slane %v1872_v4, %v11724_v7  ;;  %v1905_v47 = vrot.slane %v1889_v33, %v11724_v7 }
  0xc1   : > { %660 = vrot.lane.b32.xlu0 %v11744_v12, %s14728_s0  ;;  %v1061_v20 = vsel %vm1055_vm8, %v1032_v9, %v823_v58  ;;  %v1250_v12 = vcombine.high %v1234_v16, %v1234_v16 }
  0xc2   : > { %900 = vrot.lane.b32.xlu1 %v11795_v2, %s14729_s20  ;;  %v1887_v23 = vcombine.low %v1879_v17, %v1886_v18  ;;  %v1920_v62 = vcombine.low %v1898_v54, %v1905_v47  ;;  %v523_v47 = vld [vmem:[%s11540_s25 + $0xe8] sm:$0xff] }
  0xc3   : > { %v858_v21 = vpop.permute.xlu0 %857  ;;  %v1890_v46 = vcombine.low %v1248_v28, %v1250_v12 }
  0xc4   : > { %v1090_v26 = vsel %vm1084_vm9, %v1061_v20, %v858_v21  ;;  %v703_v27 = vpop.permute.xlu1 %702  ;;  %10913 = vmatmul.mubr.msk.bf16.vlgmr.msra.gmra.mxu0 %vm2453_vm11, %v1887_v23  ;;  %v1928_v16 = vrot.slane %v1920_v62, %v11724_v7 }
  0xc5   : > { %v1119_v29 = vsel %vm1113_vm10, %v1090_v26, %v887_v11  ;;  %716 = vrot.lane.b32.xlu0 %v11757_v22, %s14730_s24  ;;  %10916 = vmatprep.mubr.msk.bf16.mxu0 %vm11401_vm2, %v14701_v39  ;;  %v1912_v60 = vrot.slane %v1890_v46, %v11724_v7  ;;  %v522_v46 = vld [vmem:[%s11540_s25 + $0xe0] sm:$0xff] }
  0xc6   : > { %v1252_v30 = vcombine.high %v1119_v29, %v1119_v29  ;;  %v1259_v34 = vrot.slane %v1119_v29, %v11724_v7  ;;  %780 = vrot.lane.b32.xlu1 %v11778_v51, %s14731_s29 }
  0xc7   : > { %v647_v35 = vpop.permute.xlu0 %646 }
  0xc8   : > { %v1267_v37 = vcombine.high %v1259_v34, %v1259_v34  ;;  %v918_v22 = vsel %vm910_vm3, %v11573_v25, %v647_v35  ;;  %v767_v41 = vpop.permute.xlu1 %766  ;;  %v1266_v42 = vrot.slane %v1252_v30, %v11724_v7  ;;  %v11832_v49 = vrot.slane %v1259_v34, %v11724_v7 }
  0xc9   : > { %745 = vrot.lane.b32.xlu0 %v11746_v13, %s14724_s17  ;;  %v947_v50 = vsel %vm939_vm4, %v918_v22, %v703_v27  ;;  %v634_v34 = vshrl.u32 %v11856_v14, 16 }
  0xca   : > { %v1289_v25 = vrot.slane %v1267_v37, %v11724_v7  ;;  %838 = vrot.lane.b32.xlu1 %v11799_v3, %s14725_s23  ;;  %v1268_v58 = vcombine.high %v1266_v42, %v1266_v42  ;;  %v1282_v18 = vrot.slane %v1266_v42, %v11724_v7 }
  0xcb   : > { %v732_v52 = vpop.permute.xlu0 %731 }
  0xcc   : > { %v1891_v55 = vcombine.low %v11832_v49, %v1289_v25  ;;  %v976_v56 = vsel %vm968_vm5, %v947_v50, %v732_v52  ;;  %v825_v57 = vpop.permute.xlu1 %824  ;;  %v1296_v11 = vrot.slane %v1268_v58, %v11724_v7  ;;  %v10242_v29 = vcombine.high %v11832_v49, %v1289_v25 }
  0xcd   : > { %809 = vrot.lane.b32.xlu0 %v11795_v2, %s14726_s16  ;;  %v1005_v8 = vsel %vm997_vm6, %v976_v56, %v767_v41  ;;  %v1298_v36 = vcombine.high %v1282_v18, %v1282_v18  ;;  %v11899_v58 = vpack.c.bf16 %v523_v47, %v522_v46 }
  0xce   : > { %v1919_v61 = vrot.slane %v1891_v55, %v11724_v7  ;;  %902 = vrot.lane.b32.xlu1 %v11827_v43, %s14729_s20  ;;  %v1938_v26 = vcombine.low %v1282_v18, %v1296_v11  ;;  %v1947_v49 = vrot.slane %v10242_v29, %v11724_v7 }
  0xcf   : > { %v796_v4 = vpop.permute.xlu0 %795 }
  0xd0   : > { %v1034_v5 = vsel %vm1026_vm7, %v1005_v8, %v796_v4  ;;  %v889_v6 = vpop.permute.xlu1 %888  ;;  %v1921_v9 = vcombine.low %v1912_v60, %v1919_v61  ;;  %v1954_v35 = vrot.slane %v1938_v26, %v11724_v7 }
  0xd1   : > { %873 = vrot.lane.b32.xlu0 %v11843_v59, %s14727_s26  ;;  %v1063_v19 = vsel %vm1055_vm8, %v1034_v5, %v825_v57 }
  0xd2   : > { %718 = vrot.lane.b32.xlu1 %v11795_v2, %s14730_s24  ;;  %v1935_v17 = vrot.slane %v1921_v9, %v11724_v7  ;;  %v636_v2 = vshll.u32 %v11856_v14, 16  ;;  %v1969_v57 = vcombine.low %v1947_v49, %v1954_v35 }
  0xd3   : > { %v860_v20 = vpop.permute.xlu0 %859 }
  0xd4   : > { %v1092_v21 = vsel %vm1084_vm9, %v1063_v19, %v860_v20  ;;  %v705_v23 = vpop.permute.xlu1 %704  ;;  %v1936_v24 = vcombine.low %v1928_v16, %v1935_v17  ;;  %v638_v22 = vrot.slane %v636_v2, 1  ;;  %v756_v16 = vshll.u32 %v11899_v58, 16 }
  0xd5   : > { %v1121_v27 = vsel %vm1113_vm10, %v1092_v21, %v889_v6  ;;  %662 = vrot.lane.b32.xlu0 %v11778_v51, %s14728_s0  ;;  %v1977_v19 = vrot.slane %v1969_v57, %v11724_v7 }
  0xd6   : > { %v1300_v28 = vcombine.high %v1121_v27, %v1121_v27  ;;  %v1307_v12 = vrot.slane %v1121_v27, %v11724_v7  ;;  %10917 = vmatmul.mubr.msk.bf16.gmra.mxu0 %vm2453_vm11, %v1936_v24  ;;  %782 = vrot.lane.b32.xlu1 %v11843_v59, %s14731_s29  ;;  %v11897_v56 = vor.u32 %v638_v22, %v634_v34 }
  0xd7   : > { %v649_v31 = vpop.permute.xlu0 %648  ;;  %10920 = vmatprep.mubr.msk.bf16.mxu0 %vm11401_vm2, %v14701_v39 }
  0xd8   : > { %v1315_v33 = vcombine.high %v1307_v12, %v1307_v12  ;;  %v1323_v51 = vrot.slane %v1307_v12, %v11724_v7  ;;  %v769_v30 = vpop.permute.xlu1 %768  ;;  %v920_v37 = vsel %vm910_vm3, %v11597_v40, %v649_v31  ;;  %v1314_v41 = vrot.slane %v1300_v28, %v11724_v7 }
  0xd9   : > { %747 = vrot.lane.b32.xlu0 %v11799_v3, %s14724_s17  ;;  %v949_v52 = vsel %vm939_vm4, %v920_v37, %v705_v23  ;;  %v754_v28 = vshrl.u32 %v11899_v58, 16  ;;  %v758_v12 = vrot.slane %v756_v16, 1 }
  0xda   : > { %v1337_v42 = vrot.slane %v1315_v33, %v11724_v7  ;;  %v1345_v44 = vcombine.high %v1323_v51, %v1323_v51  ;;  %840 = vrot.lane.b32.xlu1 %v11856_v14, %s14725_s23  ;;  %v1939_v40 = vcombine.low %v1298_v36, %v1323_v51  ;;  %v1316_v60 = vcombine.high %v1314_v41, %v1314_v41 }
  0xdb   : > { %v734_v25 = vpop.permute.xlu0 %733  ;;  %v1330_v61 = vrot.slane %v1314_v41, %v11724_v7 }
  0xdc   : > { %v1940_v50 = vcombine.low %v1337_v42, %v1345_v44  ;;  %v827_v54 = vpop.permute.xlu1 %826  ;;  %v978_v55 = vsel %vm968_vm5, %v949_v52, %v734_v25  ;;  %v1961_v62 = vrot.slane %v1939_v40, %v11724_v7  ;;  %v1347_v9 = vcombine.high %v1337_v42, %v1337_v42 }
  0xdd   : > { %811 = vrot.lane.b32.xlu0 %v11827_v43, %s14726_s16  ;;  %v1007_v0 = vsel %vm997_vm6, %v978_v55, %v769_v30  ;;  %v1344_v17 = vrot.slane %v1316_v60, %v11724_v7  ;;  %v1346_v18 = vcombine.high %v1330_v61, %v1330_v61  ;;  %v788_v40 = vrot.slane %v11899_v58, 1  ;;  %v525_v55 = vld [vmem:[%s11540_s25 + $0xf8] sm:$0xff] }
  0xde   : > { %v1968_v63 = vrot.slane %v1940_v50, %v11724_v7  ;;  %904 = vrot.lane.b32.xlu1 %v11888_v45, %s14729_s20  ;;  %v1986_v27 = vcombine.low %v1347_v9, %v1330_v61 }
  0xdf   : > { %v798_v8 = vpop.permute.xlu0 %797  ;;  %v1987_v29 = vcombine.low %v1344_v17, %v1346_v18 }
  0xe0   : > { %v1036_v4 = vsel %vm1026_vm7, %v1007_v0, %v798_v8  ;;  %v862_v5 = vpop.permute.xlu1 %861  ;;  %v1970_v6 = vcombine.low %v1961_v62, %v1968_v63  ;;  %v1996_v30 = vrot.slane %v1986_v27, %v11724_v7 }
  0xe1   : > { %v1065_v11 = vsel %vm1055_vm8, %v1036_v4, %v827_v54  ;;  %875 = vrot.lane.b32.xlu0 %v11897_v56, %s14727_s26  ;;  %v2003_v37 = vrot.slane %v1987_v29, %v11724_v7  ;;  %v524_v54 = vld [vmem:[%s11540_s25 + $0xf0] sm:$0xff] }
  0xe2   : > { %720 = vrot.lane.b32.xlu1 %v11827_v43, %s14730_s24  ;;  %v1984_v20 = vrot.slane %v1970_v6, %v11724_v7  ;;  %v1094_v23 = vsel %vm1084_vm9, %v1065_v11, %v862_v5  ;;  %v541_v0 = vpack.c.bf16 %v525_v55, %v524_v54 }
  0xe3   : > { %v651_v21 = vpop.permute.xlu0 %650 }
  0xe4   : > { %v891_v24 = vpop.permute.xlu1 %890  ;;  %v1985_v26 = vcombine.low %v1977_v19, %v1984_v20  ;;  %v922_v22 = vsel %vm910_vm3, %v11617_v48, %v651_v21  ;;  %v2018_v48 = vcombine.low %v1996_v30, %v2003_v37  ;;  %v847_v29 = vshrl.u32 %v541_v0, 16 }
  0xe5   : > { %v1123_v2 = vsel %vm1113_vm10, %v1094_v23, %v891_v24  ;;  %664 = vrot.lane.b32.xlu0 %v11843_v59, %s14728_s0  ;;  %v759_v59 = vor.u32 %v758_v12, %v754_v28  ;;  %v881_v30 = vrot.slane %v541_v0, 1 }
  0xe6   : > { %v1355_v43 = vrot.slane %v1123_v2, %v11724_v7  ;;  %10921 = vmatmul.mubr.msk.bf16.gmra.mxu0 %vm2453_vm11, %v1985_v26  ;;  %784 = vrot.lane.b32.xlu1 %v11897_v56, %s14731_s29  ;;  %v1348_v34 = vcombine.high %v1123_v2, %v1123_v2  ;;  %v2026_v4 = vrot.slane %v2018_v48, %v11724_v7 }
  0xe7   : > { %v707_v31 = vpop.permute.xlu0 %706  ;;  %10924 = vmatprep.mubr.msk.bf16.mxu0 %vm11401_vm2, %v14701_v39 }
  0xe8   : > { %v1363_v33 = vcombine.high %v1355_v43, %v1355_v43  ;;  %v771_v51 = vpop.permute.xlu1 %770  ;;  %v1371_v35 = vrot.slane %v1355_v43, %v11724_v7  ;;  %v951_v46 = vsel %vm939_vm4, %v922_v22, %v707_v31  ;;  %v1362_v25 = vrot.slane %v1348_v34, %v11724_v7 }
  0xe9   : > { %749 = vrot.lane.b32.xlu0 %v11856_v14, %s14724_s17 }
  0xea   : > { %v1385_v36 = vrot.slane %v1363_v33, %v11724_v7  ;;  %842 = vrot.lane.b32.xlu1 %v11899_v58, %s14725_s23  ;;  %v1364_v8 = vcombine.high %v1362_v25, %v1362_v25  ;;  %v1378_v18 = vrot.slane %v1362_v25, %v11724_v7 }
  0xeb   : > { %v736_v41 = vpop.permute.xlu0 %735 }
  0xec   : > { %v1988_v42 = vcombine.low %v1371_v35, %v1385_v36  ;;  %v10243_v44 = vcombine.high %v1371_v35, %v1385_v36  ;;  %v829_v47 = vpop.permute.xlu1 %828  ;;  %v980_v49 = vsel %vm968_vm5, %v951_v46, %v736_v41  ;;  %v1392_v20 = vrot.slane %v1364_v8, %v11724_v7 }
  0xed   : > { %813 = vrot.lane.b32.xlu0 %v11888_v45, %s14726_s16  ;;  %v1009_v57 = vsel %vm997_vm6, %v980_v49, %v771_v51  ;;  %v1394_v28 = vcombine.high %v1378_v18, %v1378_v18 }
  0xee   : > { %v2010_v50 = vrot.slane %v1988_v42, %v11724_v7  ;;  %v2017_v52 = vrot.slane %v10243_v44, %v11724_v7  ;;  %877 = vrot.lane.b32.xlu1 %v759_v59, %s14727_s26  ;;  %v2035_v31 = vcombine.low %v1378_v18, %v1392_v20 }
  0xef   : > { %v800_v60 = vpop.permute.xlu0 %799 }
  0xf0   : > { %v2019_v61 = vcombine.low %v2010_v50, %v2017_v52  ;;  %v1038_v62 = vsel %vm1026_vm7, %v1009_v57, %v800_v60  ;;  %v893_v63 = vpop.permute.xlu1 %892  ;;  %v2045_v44 = vrot.slane %v2035_v31, %v11724_v7 }
  0xf1   : > { %666 = vrot.lane.b32.xlu0 %v11897_v56, %s14728_s0  ;;  %v1067_v6 = vsel %vm1055_vm8, %v1038_v62, %v829_v47  ;;  %v849_v56 = vshll.u32 %v541_v0, 16 }
  0xf2   : > { %906 = vrot.lane.b32.xlu1 %v788_v40, %s14729_s20  ;;  %v2033_v5 = vrot.slane %v2019_v61, %v11724_v7 }
  0xf3   : > { %v864_v9 = vpop.permute.xlu0 %863  ;;  %v851_v43 = vrot.slane %v849_v56, 1 }
  0xf4   : > { %v1096_v11 = vsel %vm1084_vm9, %v1067_v6, %v864_v9  ;;  %v709_v16 = vpop.permute.xlu1 %708  ;;  %v2034_v17 = vcombine.low %v2026_v4, %v2033_v5 }
  0xf5   : > { %v1125_v19 = vsel %vm1113_vm10, %v1096_v11, %v893_v63  ;;  %722 = vrot.lane.b32.xlu0 %v11888_v45, %s14730_s24  ;;  %v852_v42 = vor.u32 %v851_v43, %v847_v29 }
  0xf6   : > { %v1396_v21 = vcombine.high %v1125_v19, %v1125_v19  ;;  %v1403_v23 = vrot.slane %v1125_v19, %v11724_v7  ;;  %10925 = vmatmul.mubr.msk.bf16.gmra.mxu0 %vm2453_vm11, %v2034_v17  ;;  %786 = vrot.lane.b32.xlu1 %v759_v59, %s14731_s29 }
  0xf7   : > { %v653_v24 = vpop.permute.xlu0 %652  ;;  %10928 = vmatprep.mubr.msk.bf16.mxu0 %vm11401_vm2, %v14701_v39 }
  0xf8   : > { %v1410_v26 = vrot.slane %v1396_v21, %v11724_v7  ;;  %v1411_v27 = vcombine.high %v1403_v23, %v1403_v23  ;;  %v1419_v2 = vrot.slane %v1403_v23, %v11724_v7  ;;  %v773_v45 = vpop.permute.xlu1 %772  ;;  %v924_v12 = vsel %vm910_vm3, %v11627_v53, %v653_v24 }
  0xf9   : > { %751 = vrot.lane.b32.xlu0 %v11899_v58, %s14724_s17  ;;  %v953_v53 = vsel %vm939_vm4, %v924_v12, %v709_v16  ;;  %s486_s17 = scalar_lea.vmem [#allocation2], %s485_s27 }
  0xfa   : > { %v1433_v33 = vrot.slane %v1411_v27, %v11724_v7  ;;  %v1441_v51 = vcombine.high %v1419_v2, %v1419_v2  ;;  %844 = vrot.lane.b32.xlu1 %v541_v0, %s14725_s23  ;;  %v2036_v59 = vcombine.low %v1394_v28, %v1419_v2  ;;  %v1426_v35 = vrot.slane %v1410_v26, %v11724_v7  ;;  %s10179_s23 = sshll.u32 %s486_s17, 4  ;;  %s10180_s23 = int_to_ptr.vmem [resolvable:$true] %s10179_s23 }
  0xfb   : > { %v738_v34 = vpop.permute.xlu0 %737  ;;  %v1412_v55 = vcombine.high %v1410_v26, %v1410_v26  ;;  %s11329_s24 = scalar_lea.vmem %s10180_s23, 16 }
  0xfc   : > { %v1443_v36 = vcombine.high %v1433_v33, %v1433_v33  ;;  %v2037_v37 = vcombine.low %v1433_v33, %v1441_v51  ;;  %v831_v22 = vpop.permute.xlu1 %830  ;;  %v2052_v58 = vrot.slane %v2036_v59, %v11724_v7  ;;  %v982_v41 = vsel %vm968_vm5, %v953_v53, %v738_v34  ;;  %p11330_p11 = scmp.ne.s32.totalorder %s10180_s23, %s11329_s24 }
  0xfd   : > { %815 = vrot.lane.b32.xlu0 %v788_v40, %s14726_s16  ;;  %v1011_v47 = vsel %vm997_vm6, %v982_v41, %v773_v45  ;;  %v1440_v8 = vrot.slane %v1412_v55, %v11724_v7  ;;  %v1442_v5 = vcombine.high %v1426_v35, %v1426_v35  ;;  %s10568_s16 = sshll.u32 %s11508_s22, 4  ;;  %s11406_s22 = smov [#allocation2]  }
  0xfe   : > { %v2038_v46 = vcombine.low %v1443_v36, %v1426_v35  ;;  %908 = vrot.lane.b32.xlu1 %v881_v30, %s14729_s20  ;;  %v2059_v25 = vrot.slane %v2037_v37, %v11724_v7  ;;  %v2067_v54 = vcombine.low %v2045_v44, %v2052_v58  ;;  %s14630_s20 = scalar_lea.hbm %s14680_s15, %s10568_s16  ;;  %p11331_p12 = pnand %p11330_p11, %p11525_p5 }
  0xff   : > { %v802_v49 = vpop.permute.xlu0 %801  ;;  %v2084_v20 = vcombine.low %v1440_v8, %v1442_v5  ;;  %s11333_s29 = sshll.u32 %s11406_s22, 4  ;;  %s11334_s29 = int_to_ptr.vmem [resolvable:$false] %s11333_s29 }
 0x100   : > { %v2066_v50 = vrot.slane %v2038_v46, %v11724_v7  ;;  %v1040_v52 = vsel %vm1026_vm7, %v1011_v47, %v802_v49  ;;  %v895_v48 = vpop.permute.xlu1 %894  ;;  %v2075_v63 = vrot.slane %v2067_v54, %v11724_v7  ;;  %p11332_p13 = pneg %p11331_p12  ;;  %s11335_s25 = scalar_lea.vmem %s11334_s29, 32 }
 0x101   : > { %879 = vrot.lane.b32.xlu0 %v852_v42, %s14727_s26  ;;  %v1069_v57 = vsel %vm1055_vm8, %v1040_v52, %v831_v22  ;;  %v2094_v33 = vrot.slane %v2084_v20, %v11724_v7  ;;  %s11403_s26 = smov 64   ;;  %p11336_p0 = scmp.lt.s32.totalorder %s10180_s23, %s11334_s29 }
 0x102   : > { %v2068_v40 = vcombine.low %v2059_v25, %v2066_v50  ;;  %p11337_p1 = scmp.lt.s32.totalorder %s11335_s25, %s11329_s24 }
 0x103   : > { %v866_v60 = vpop.permute.xlu0 %865 }
 0x104   : > { %v1098_v61 = vsel %vm1084_vm9, %v1069_v57, %v866_v60  ;;  %v711_v62 = vpop.permute.xlu1 %710  ;;  %v2082_v0 = vrot.slane %v2068_v40, %v11724_v7  ;;  %p11338_p2 = por %p11337_p1, %p11336_p0 }
 0x105   : > { %v1127_v4 = vsel %vm1113_vm10, %v1098_v61, %v895_v48 }
 0x106   : > { %v1444_v6 = vcombine.high %v1127_v4, %v1127_v4  ;;  %v1451_v9 = vrot.slane %v1127_v4, %v11724_v7  ;;  %v2083_v11 = vcombine.low %v2075_v63, %v2082_v0  ;;  %p11339_p3 = pnand %p11338_p2, %p11332_p13 }
 0x107   : > { %v655_v16 = vpop.permute.xlu0 %654 }
 0x108   : > { %v1458_v17 = vrot.slane %v1444_v6, %v11724_v7  ;;  %v1459_v18 = vcombine.high %v1451_v9, %v1451_v9  ;;  %v926_v19 = vsel %vm910_vm3, %v11652_v1, %v655_v16  ;;  %10929 = vmatmul.mubr.msk.bf16.gmra.mxu0 %vm2453_vm11, %v2083_v11  ;;  %v775_v56 = vpop.permute.xlu1 %774  ;;  %v1467_v23 = vrot.slane %v1451_v9, %v11724_v7 }
 0x109   : > { %10932 = vmatprep.mubr.msk.bf16.mxu0 %vm11401_vm2, %v14701_v39  ;;  %v955_v27 = vsel %vm939_vm4, %v926_v19, %v711_v62 }
 0x10a   : > { %v1460_v21 = vcombine.high %v1458_v17, %v1458_v17  ;;  %v1481_v24 = vrot.slane %v1459_v18, %v11724_v7  ;;  %v1474_v26 = vrot.slane %v1458_v17, %v11724_v7 }
 0x10b   : > { %v740_v2 = vpop.permute.xlu0 %739 }
 0x10c   : > { %v1488_v45 = vrot.slane %v1460_v21, %v11724_v7  ;;  %v2085_v1 = vcombine.low %v1467_v23, %v1481_v24  ;;  %v10244_v28 = vcombine.high %v1467_v23, %v1481_v24  ;;  %v984_v12 = vsel %vm968_vm5, %v955_v27, %v740_v2  ;;  %v833_v29 = vpop.permute.xlu1 %832 }
 0x10d   : > { %v1013_v51 = vsel %vm997_vm6, %v984_v12, %v775_v56  ;;  %v1490_v57 = vcombine.high %v1474_v26, %v1474_v26 }
 0x10e   : > { %v2087_v43 = vcombine.low %v1474_v26, %v1488_v45  ;;  %v2101_v31 = vrot.slane %v2085_v1, %v11724_v7  ;;  %v2108_v59 = vrot.slane %v10244_v28, %v11724_v7 }
 0x10f   : > { %v804_v30 = vpop.permute.xlu0 %803 }
 0x110   : > { %v2115_v34 = vrot.slane %v2087_v43, %v11724_v7  ;;  %v1042_v35 = vsel %vm1026_vm7, %v1013_v51, %v804_v30  ;;  %v897_v36 = vpop.permute.xlu1 %896  ;;  %v2116_v37 = vcombine.low %v2094_v33, %v2101_v31 }
 0x111   : > { %v1071_v22 = vsel %vm1055_vm8, %v1042_v35, %v833_v29 }
 0x112   : > { %v2117_v53 = vcombine.low %v2108_v59, %v2115_v34  ;;  %v2124_v44 = vrot.slane %v2116_v37, %v11724_v7 }
 0x113   : > { %v868_v58 = vpop.permute.xlu0 %867 }
 0x114   : > { %v1100_v41 = vsel %vm1084_vm9, %v1071_v22, %v868_v58  ;;  %v713_v42 = vpop.permute.xlu1 %712  ;;  %v2131_v46 = vrot.slane %v2117_v53, %v11724_v7 }
 0x115   : > { %v1129_v47 = vsel %vm1113_vm10, %v1100_v41, %v897_v36 }
 0x116   : > { %v1492_v49 = vcombine.high %v1129_v47, %v1129_v47  ;;  %v1499_v25 = vrot.slane %v1129_v47, %v11724_v7  ;;  %v2132_v50 = vcombine.low %v2124_v44, %v2131_v46 }
 0x117   : > { %v657_v52 = vpop.permute.xlu0 %656 }
 0x118   : > { %v1506_v48 = vrot.slane %v1492_v49, %v11724_v7  ;;  %v1507_v54 = vcombine.high %v1499_v25, %v1499_v25  ;;  %v1515_v55 = vrot.slane %v1499_v25, %v11724_v7  ;;  %10933 = vmatmul.mubr.msk.bf16.gmra.mxu0 %vm2453_vm11, %v2132_v50  ;;  %v777_v40 = vpop.permute.xlu1 %776  ;;  %v928_v8 = vsel %vm910_vm3, %v11664_v10, %v657_v52 }
 0x119   : > { %10936 = vmatprep.mubr.msk.bf16.mxu0 %vm11401_vm2, %v14701_v39  ;;  %v957_v20 = vsel %vm939_vm4, %v928_v8, %v713_v42 }
 0x11a   : > { %v1508_v60 = vcombine.high %v1506_v48, %v1506_v48  ;;  %v1522_v61 = vrot.slane %v1506_v48, %v11724_v7  ;;  %v1529_v62 = vrot.slane %v1507_v54, %v11724_v7  ;;  %v1537_v63 = vcombine.high %v1515_v55, %v1515_v55 }
 0x11b   : > { %v2133_v0 = vcombine.low %v1490_v57, %v1515_v55  ;;  %v742_v4 = vpop.permute.xlu0 %741 }
 0x11c   : > { %v1536_v5 = vrot.slane %v1508_v60, %v11724_v7  ;;  %v1538_v6 = vcombine.high %v1522_v61, %v1522_v61  ;;  %v1539_v9 = vcombine.high %v1529_v62, %v1529_v62  ;;  %v2134_v11 = vcombine.low %v1529_v62, %v1537_v63  ;;  %v806_v16 = vpop.permute.xlu1 %805 }
 0x11d   : > { %v2143_v19 = vrot.slane %v2133_v0, %v11724_v7  ;;  %v986_v10 = vsel %vm968_vm5, %v957_v20, %v742_v4 }
 0x11e   : > { %v2135_v17 = vcombine.low %v1539_v9, %v1522_v61  ;;  %v2136_v18 = vcombine.low %v1536_v5, %v1538_v6  ;;  %v2150_v56 = vrot.slane %v2134_v11, %v11724_v7  ;;  %v1015_v45 = vsel %vm997_vm6, %v986_v10, %v777_v40 }
 0x11f   : > { %v659_v21 = vpop.permute.xlu0 %658  ;;  %v1044_v43 = vsel %vm1026_vm7, %v1015_v45, %v806_v16 }
 0x120   : > { %v2157_v23 = vrot.slane %v2135_v17, %v11724_v7  ;;  %v835_v24 = vpop.permute.xlu1 %834  ;;  %v2164_v26 = vrot.slane %v2136_v18, %v11724_v7  ;;  %v2165_v27 = vcombine.low %v2143_v19, %v2150_v56  ;;  %v930_v53 = vsel %vm910_vm3, %v11673_v15, %v659_v21 }
 0x121   : > { %v1073_v33 = vsel %vm1055_vm8, %v1044_v43, %v835_v24 }
 0x122   : > { %v2166_v2 = vcombine.low %v2157_v23, %v2164_v26  ;;  %v2173_v12 = vrot.slane %v2165_v27, %v11724_v7 }
 0x123   : > { %v715_v1 = vpop.permute.xlu0 %714 }
 0x124   : > { %v870_v28 = vpop.permute.xlu1 %869  ;;  %v2180_v29 = vrot.slane %v2166_v2, %v11724_v7  ;;  %v959_v41 = vsel %vm939_vm4, %v930_v53, %v715_v1 }
 0x125   : > { %v1102_v30 = vsel %vm1084_vm9, %v1073_v33, %v870_v28 }
 0x126   : > { %v2181_v31 = vcombine.low %v2173_v12, %v2180_v29 }
 0x127   : > { %v744_v51 = vpop.permute.xlu0 %743 }
 0x128   : > { %10937 = vmatmul.mubr.msk.bf16.gmra.mxu0 %vm2453_vm11, %v2181_v31  ;;  %v899_v59 = vpop.permute.xlu1 %898  ;;  %v988_v44 = vsel %vm968_vm5, %v959_v41, %v744_v51 }
 0x129   : > { %v1131_v34 = vsel %vm1113_vm10, %v1102_v30, %v899_v59  ;;  %10940 = vmatprep.mubr.msk.bf16.mxu0 %vm11401_vm2, %v14701_v39 }
 0x12a   : > { %v1540_v35 = vcombine.high %v1131_v34, %v1131_v34  ;;  %v1547_v36 = vrot.slane %v1131_v34, %v11724_v7 }
 0x12b   : > { %v779_v37 = vpop.permute.xlu0 %778 }
 0x12c   : > { %v1554_v22 = vrot.slane %v1540_v35, %v11724_v7  ;;  %v837_v58 = vpop.permute.xlu1 %836  ;;  %v1555_v42 = vcombine.high %v1547_v36, %v1547_v36  ;;  %v1017_v46 = vsel %vm997_vm6, %v988_v44, %v779_v37  ;;  %v1563_v15 = vrot.slane %v1547_v36, %v11724_v7 }
 0x12e   : > { %v1556_v49 = vcombine.high %v1554_v22, %v1554_v22  ;;  %v1577_v52 = vrot.slane %v1555_v42, %v11724_v7  ;;  %v1570_v60 = vrot.slane %v1554_v22, %v11724_v7 }
 0x12f   : > { %v808_v47 = vpop.permute.xlu0 %807 }
 0x130   : > { %v1046_v25 = vsel %vm1026_vm7, %v1017_v46, %v808_v47  ;;  %v872_v50 = vpop.permute.xlu1 %871  ;;  %v1584_v55 = vrot.slane %v1556_v49, %v11724_v7  ;;  %v2182_v61 = vcombine.low %v1563_v15, %v1577_v52  ;;  %v10245_v62 = vcombine.high %v1563_v15, %v1577_v52 }
 0x131   : > { %v1075_v48 = vsel %vm1055_vm8, %v1046_v25, %v837_v58  ;;  %v1586_v16 = vcombine.high %v1570_v60, %v1570_v60 }
 0x132   : > { %v1104_v40 = vsel %vm1084_vm9, %v1075_v48, %v872_v50  ;;  %v2184_v4 = vcombine.low %v1570_v60, %v1584_v55  ;;  %v2192_v9 = vrot.slane %v2182_v61, %v11724_v7  ;;  %v2199_v11 = vrot.slane %v10245_v62, %v11724_v7 }
 0x133   : > { %v661_v54 = vpop.permute.xlu0 %660 }
 0x134   : > { %v901_v57 = vpop.permute.xlu1 %900  ;;  %v932_v19 = vsel %vm910_vm3, %v11704_v32, %v661_v54  ;;  %v2206_v21 = vrot.slane %v2184_v4, %v11724_v7  ;;  %v2214_v24 = vcombine.low %v2192_v9, %v2199_v11 }
 0x135   : > { %v1133_v63 = vsel %vm1113_vm10, %v1104_v40, %v901_v57 }
 0x136   : > { %v1595_v0 = vrot.slane %v1133_v63, %v11724_v7  ;;  %v1588_v17 = vcombine.high %v1133_v63, %v1133_v63  ;;  %v2222_v33 = vrot.slane %v2214_v24, %v11724_v7 }
 0x137   : > { %v717_v8 = vpop.permute.xlu0 %716 }
 0x138   : > { %v1611_v5 = vrot.slane %v1595_v0, %v11724_v7  ;;  %v781_v6 = vpop.permute.xlu1 %780  ;;  %v1603_v18 = vcombine.high %v1595_v0, %v1595_v0  ;;  %v961_v23 = vsel %vm939_vm4, %v932_v19, %v717_v8  ;;  %v1602_v26 = vrot.slane %v1588_v17, %v11724_v7  ;;  %v11097_v19 = vld [vmem:[%s14668_s3 + $0x110] sm:$0xff]  }
 0x13a   : > { %v2185_v56 = vcombine.low %v1586_v16, %v1611_v5  ;;  %v1625_v45 = vrot.slane %v1603_v18, %v11724_v7  ;;  %v1604_v43 = vcombine.high %v1602_v26, %v1602_v26  ;;  %v1618_v31 = vrot.slane %v1602_v26, %v11724_v7 }
 0x13b   : > { %v746_v20 = vpop.permute.xlu0 %745  ;;  %v1633_v36 = vcombine.high %v1611_v5, %v1611_v5 }
 0x13c   : > { %v839_v10 = vpop.permute.xlu1 %838  ;;  %v2213_v27 = vrot.slane %v2185_v56, %v11724_v7  ;;  %v990_v2 = vsel %vm968_vm5, %v961_v23, %v746_v20  ;;  %v1635_v30 = vcombine.high %v1625_v45, %v1625_v45  ;;  %v1632_v22 = vrot.slane %v1604_v43, %v11724_v7 }
 0x13d   : > { %v1019_v28 = vsel %vm997_vm6, %v990_v2, %v781_v6  ;;  %v1634_v58 = vcombine.high %v1618_v31, %v1618_v31  ;;  %v2231_v49 = vcombine.low %v1625_v45, %v1633_v36  ;;  %v11098_v45 = vld [vmem:[%s14668_s3 + $0x108] sm:$0xff]  }
 0x13e   : > { %v2215_v1 = vcombine.low %v2206_v21, %v2213_v27  ;;  %v2232_v42 = vcombine.low %v1635_v30, %v1618_v31  ;;  %v11099_v30 = vld [vmem:[%s14668_s3 + $0x100] sm:$0xff]  }
 0x13f   : > { %v810_v32 = vpop.permute.xlu0 %809  ;;  %v2233_v48 = vcombine.low %v1632_v22, %v1634_v58  ;;  %v2241_v61 = vrot.slane %v2231_v49, %v11724_v7 }
 0x140   : > { %v1048_v12 = vsel %vm1026_vm7, %v1019_v28, %v810_v32  ;;  %v903_v29 = vpop.permute.xlu1 %902  ;;  %v2229_v51 = vrot.slane %v2215_v1, %v11724_v7  ;;  %v2248_v15 = vrot.slane %v2232_v42, %v11724_v7 }
 0x141   : > { %v1077_v59 = vsel %vm1055_vm8, %v1048_v12, %v839_v10  ;;  %v2255_v8 = vrot.slane %v2233_v48, %v11724_v7 }
 0x142   : > { %v2230_v35 = vcombine.low %v2222_v33, %v2229_v51  ;;  %v2263_v6 = vcombine.low %v2241_v61, %v2248_v15 }
 0x143   : > { %v874_v34 = vpop.permute.xlu0 %873 }
 0x144   : > { %v1106_v37 = vsel %vm1084_vm9, %v1077_v59, %v874_v34  ;;  %v719_v53 = vpop.permute.xlu1 %718  ;;  %10941 = vmatmul.mubr.msk.bf16.gmra.mxu0 %vm2453_vm11, %v2230_v35  ;;  %v2271_v20 = vrot.slane %v2263_v6, %v11724_v7 }
 0x145   : > { %v1135_v41 = vsel %vm1113_vm10, %v1106_v37, %v903_v29  ;;  %10944 = vmatprep.mubr.msk.bf16.mxu0 %vm11401_vm2, %v14701_v39 }
 0x146   : > { %v1636_v44 = vcombine.high %v1135_v41, %v1135_v41  ;;  %v1643_v46 = vrot.slane %v1135_v41, %v11724_v7 }
 0x147   : > { %v663_v47 = vpop.permute.xlu0 %662 }
 0x148   : > { %v1651_v25 = vcombine.high %v1643_v46, %v1643_v46  ;;  %v934_v50 = vsel %vm910_vm3, %v11746_v13, %v663_v47  ;;  %v783_v52 = vpop.permute.xlu1 %782  ;;  %v1650_v54 = vrot.slane %v1636_v44, %v11724_v7  ;;  %v1659_v55 = vrot.slane %v1643_v46, %v11724_v7  ;;  %v11096_v13 = vld [vmem:[%s14668_s3 + $0x118] sm:$0xff]  }
 0x149   : > { %v963_v57 = vsel %vm939_vm4, %v934_v50, %v719_v53  ;;  %10965 = vmatpush3.bf16.msra.mxu0 %v11096_v13 }
 0x14a   : > { %v1673_v40 = vrot.slane %v1651_v25, %v11724_v7  ;;  %v1652_v4 = vcombine.high %v1650_v54, %v1650_v54  ;;  %10966 = vmatprep.subr.bf16.mxu0 %v14701_v39  ;;  %v1666_v24 = vrot.slane %v1650_v54, %v11724_v7 }
 0x14b   : > { %v748_v60 = vpop.permute.xlu0 %747 }
 0x14c   : > { %v2234_v62 = vcombine.low %v1659_v55, %v1673_v40  ;;  %v992_v63 = vsel %vm968_vm5, %v963_v57, %v748_v60  ;;  %v841_v0 = vpop.permute.xlu1 %840  ;;  %v1680_v56 = vrot.slane %v1652_v4, %v11724_v7  ;;  %v10246_v43 = vcombine.high %v1659_v55, %v1673_v40 }
 0x14d   : > { %v1021_v9 = vsel %vm997_vm6, %v992_v63, %v783_v52  ;;  %10967 = vmatpush3.bf16.msra.mxu0 %v11097_v19  ;;  %v1682_v59 = vcombine.high %v1666_v24, %v1666_v24 }
 0x14e   : > { %v2262_v5 = vrot.slane %v2234_v62, %v11724_v7  ;;  %10968 = vmatprep.subr.bf16.mxu0 %v14701_v39  ;;  %v2281_v28 = vcombine.low %v1666_v24, %v1680_v56  ;;  %v2290_v41 = vrot.slane %v10246_v43, %v11724_v7 }
 0x14f   : > { %v812_v11 = vpop.permute.xlu0 %811 }
 0x150   : > { %v1050_v16 = vsel %vm1026_vm7, %v1021_v9, %v812_v11  ;;  %v905_v17 = vpop.permute.xlu1 %904  ;;  %v2264_v18 = vcombine.low %v2255_v8, %v2262_v5  ;;  %v2297_v36 = vrot.slane %v2281_v28, %v11724_v7 }
 0x151   : > { %v1079_v23 = vsel %vm1055_vm8, %v1050_v16, %v841_v0  ;;  %10969 = vmatpush3.bf16.msra.mxu0 %v11098_v45 }
 0x152   : > { %v2278_v21 = vrot.slane %v2264_v18, %v11724_v7  ;;  %10970 = vmatprep.subr.bf16.mxu0 %v14701_v39  ;;  %v2312_v52 = vcombine.low %v2290_v41, %v2297_v36 }
 0x153   : > { %v876_v10 = vpop.permute.xlu0 %875 }
 0x154   : > { %v1108_v26 = vsel %vm1084_vm9, %v1079_v23, %v876_v10  ;;  %v721_v27 = vpop.permute.xlu1 %720  ;;  %v2279_v2 = vcombine.low %v2271_v20, %v2278_v21  ;;  %v2320_v63 = vrot.slane %v2312_v52, %v11724_v7 }
 0x155   : > { %v1137_v1 = vsel %vm1113_vm10, %v1108_v26, %v905_v17  ;;  %10971 = vmatpush3.bf16.msra.mxu0 %v11099_v30 }
 0x156   : > { %v1684_v32 = vcombine.high %v1137_v1, %v1137_v1  ;;  %v1691_v12 = vrot.slane %v1137_v1, %v11724_v7  ;;  %10945 = vmatmul.mubr.msk.bf16.gmra.mxu0 %vm2453_vm11, %v2279_v2 }
 0x157   : > { %v665_v29 = vpop.permute.xlu0 %664  ;;  %10948 = vmatprep.mubr.msk.bf16.mxu0 %vm11401_vm2, %v14701_v39 }
 0x158   : > { %v1699_v31 = vcombine.high %v1691_v12, %v1691_v12  ;;  %v1707_v33 = vrot.slane %v1691_v12, %v11724_v7  ;;  %v785_v51 = vpop.permute.xlu1 %784  ;;  %v1698_v34 = vrot.slane %v1684_v32, %v11724_v7  ;;  %v936_v35 = vsel %vm910_vm3, %v11799_v3, %v665_v29 }
 0x159   : > { %v965_v44 = vsel %vm939_vm4, %v936_v35, %v721_v27 }
 0x15a   : > { %v1721_v37 = vrot.slane %v1699_v31, %v11724_v7  ;;  %v1729_v53 = vcombine.high %v1707_v33, %v1707_v33  ;;  %v2282_v22 = vcombine.low %v1682_v59, %v1707_v33  ;;  %v1700_v47 = vcombine.high %v1698_v34, %v1698_v34 }
 0x15b   : > { %v750_v58 = vpop.permute.xlu0 %749  ;;  %v1714_v49 = vrot.slane %v1698_v34, %v11724_v7 }
 0x15c   : > { %v2283_v42 = vcombine.low %v1721_v37, %v1729_v53  ;;  %v843_v46 = vpop.permute.xlu1 %842  ;;  %v994_v25 = vsel %vm968_vm5, %v965_v44, %v750_v58  ;;  %v2304_v3 = vrot.slane %v2282_v22, %v11724_v7  ;;  %v1728_v57 = vrot.slane %v1700_v47, %v11724_v7 }
 0x15d   : > { %v1023_v48 = vsel %vm997_vm6, %v994_v25, %v785_v51  ;;  %v1730_v60 = vcombine.high %v1714_v49, %v1714_v49  ;;  %v1731_v61 = vcombine.high %v1721_v37, %v1721_v37 }
 0x15e   : > { %v2311_v50 = vrot.slane %v2283_v42, %v11724_v7 }
 0x15f   : > { %v814_v15 = vpop.permute.xlu0 %813  ;;  %v2329_v6 = vcombine.low %v1731_v61, %v1714_v49  ;;  %v2330_v9 = vcombine.low %v1728_v57, %v1730_v60 }
 0x160   : > { %v1052_v54 = vsel %vm1026_vm7, %v1023_v48, %v814_v15  ;;  %v878_v55 = vpop.permute.xlu1 %877  ;;  %v2313_v40 = vcombine.low %v2304_v3, %v2311_v50 }
 0x161   : > { %v1081_v62 = vsel %vm1055_vm8, %v1052_v54, %v843_v46  ;;  %v2339_v56 = vrot.slane %v2329_v6, %v11724_v7  ;;  %v2346_v20 = vrot.slane %v2330_v9, %v11724_v7 }
 0x162   : > { %v2327_v0 = vrot.slane %v2313_v40, %v11724_v7  ;;  %v1110_v8 = vsel %vm1084_vm9, %v1081_v62, %v878_v55 }
 0x163   : > { %v667_v13 = vpop.permute.xlu0 %666 }
 0x164   : > { %v907_v4 = vpop.permute.xlu1 %906  ;;  %v2328_v5 = vcombine.low %v2320_v63, %v2327_v0  ;;  %v938_v21 = vsel %vm910_vm3, %v11856_v14, %v667_v13  ;;  %v2361_v14 = vcombine.low %v2339_v56, %v2346_v20  ;;  %vm10164_vm3 = vcmask 73728  }
 0x165   : > { %v1139_v11 = vsel %vm1113_vm10, %v1110_v8, %v907_v4 }
 0x166   : > { %v1739_v16 = vrot.slane %v1139_v11, %v11724_v7  ;;  %10949 = vmatmul.mubr.msk.bf16.gmra.mxu0 %vm2453_vm11, %v2328_v5  ;;  %v1732_v23 = vcombine.high %v1139_v11, %v1139_v11  ;;  %v2369_v34 = vrot.slane %v2361_v14, %v11724_v7  ;;  %v12186_v11 = vld [vmem:[%s14667_s2] ss:$0 sm:$0xff] }
 0x167   : > { %v723_v17 = vpop.permute.xlu0 %722  ;;  %10952 = vmatprep.mubr.msk.bf16.mxu0 %vm11401_vm2, %v14701_v39 }
 0x168   : > { %v1747_v18 = vcombine.high %v1739_v16, %v1739_v16  ;;  %v787_v19 = vpop.permute.xlu1 %786  ;;  %v1755_v10 = vrot.slane %v1739_v16, %v11724_v7  ;;  %v967_v26 = vsel %vm939_vm4, %v938_v21, %v723_v17  ;;  %v1746_v32 = vrot.slane %v1732_v23, %v11724_v7 }
 0x16a   : > { %v1769_v24 = vrot.slane %v1747_v18, %v11724_v7  ;;  %v1748_v30 = vcombine.high %v1746_v32, %v1746_v32  ;;  %v1762_v58 = vrot.slane %v1746_v32, %v11724_v7 }
 0x16b   : > { %v752_v27 = vpop.permute.xlu0 %751 }
 0x16c   : > { %v2331_v2 = vcombine.low %v1755_v10, %v1769_v24  ;;  %v10247_v45 = vcombine.high %v1755_v10, %v1769_v24  ;;  %v996_v1 = vsel %vm968_vm5, %v967_v26, %v752_v27  ;;  %v845_v28 = vpop.permute.xlu1 %844  ;;  %v1776_v42 = vrot.slane %v1748_v30, %v11724_v7 }
 0x16d   : > { %v1025_v43 = vsel %vm997_vm6, %v996_v1, %v787_v19  ;;  %v1778_v3 = vcombine.high %v1762_v58, %v1762_v58 }
 0x16e   : > { %v2353_v12 = vrot.slane %v2331_v2, %v11724_v7  ;;  %v2360_v29 = vrot.slane %v10247_v45, %v11724_v7  ;;  %v2378_v50 = vcombine.low %v1762_v58, %v1776_v42 }
 0x16f   : > { %v816_v31 = vpop.permute.xlu0 %815 }
 0x170   : > { %v2362_v33 = vcombine.low %v2353_v12, %v2360_v29  ;;  %v1054_v51 = vsel %vm1026_vm7, %v1025_v43, %v816_v31  ;;  %v909_v59 = vpop.permute.xlu1 %908  ;;  %v2388_v60 = vrot.slane %v2378_v50, %v11724_v7 }
 0x171   : > { %v1083_v36 = vsel %vm1055_vm8, %v1054_v51, %v845_v28 }
 0x172   : > { %v2376_v35 = vrot.slane %v2362_v33, %v11724_v7 }
 0x173   : > { %v880_v37 = vpop.permute.xlu0 %879 }
 0x174   : > { %v1112_v53 = vsel %vm1084_vm9, %v1083_v36, %v880_v37  ;;  %v2377_v22 = vcombine.low %v2369_v34, %v2376_v35 }
 0x175   : > { %v1141_v41 = vsel %vm1113_vm10, %v1112_v53, %v909_v59 }
 0x176   : > { %v1780_v44 = vcombine.high %v1141_v41, %v1141_v41  ;;  %v1787_v46 = vrot.slane %v1141_v41, %v11724_v7  ;;  %10953 = vmatmul.mubr.msk.bf16.gmra.mxu0 %vm2453_vm11, %v2377_v22 }
 0x177   : > { %10956 = vmatprep.mubr.msk.bf16.mxu0 %vm11401_vm2, %v14701_v39 }
 0x178   : > { %v1794_v47 = vrot.slane %v1780_v44, %v11724_v7  ;;  %v1795_v49 = vcombine.high %v1787_v46, %v1787_v46  ;;  %v1803_v25 = vrot.slane %v1787_v46, %v11724_v7 }
 0x17a   : > { %v1817_v52 = vrot.slane %v1795_v49, %v11724_v7  ;;  %v1825_v48 = vcombine.high %v1803_v25, %v1803_v25  ;;  %v2379_v15 = vcombine.low %v1778_v3, %v1803_v25  ;;  %v1810_v54 = vrot.slane %v1794_v47, %v11724_v7 }
 0x17b   : > { %v1796_v61 = vcombine.high %v1794_v47, %v1794_v47 }
 0x17c   : > { %v1827_v55 = vcombine.high %v1817_v52, %v1817_v52  ;;  %v2380_v40 = vcombine.low %v1817_v52, %v1825_v48  ;;  %v2395_v57 = vrot.slane %v2379_v15, %v11724_v7  ;;  %v1826_v4 = vcombine.high %v1810_v54, %v1810_v54 }
 0x17d   : > { %v1824_v8 = vrot.slane %v1796_v61, %v11724_v7 }
 0x17e   : > { %v2381_v62 = vcombine.low %v1827_v55, %v1810_v54  ;;  %v2402_v63 = vrot.slane %v2380_v40, %v11724_v7  ;;  %v2410_v13 = vcombine.low %v2388_v60, %v2395_v57 }
 0x17f   : > { %v2427_v17 = vcombine.low %v1824_v8, %v1826_v4 }
 0x180   : > { %v2409_v0 = vrot.slane %v2381_v62, %v11724_v7  ;;  %v2418_v6 = vrot.slane %v2410_v13, %v11724_v7 }
 0x181   : > { %v2434_v23 = vrot.slane %v2427_v17, %v11724_v7 }
 0x182   : > { %v2411_v5 = vcombine.low %v2402_v63, %v2409_v0 }
 0x183   : > { %v2441_v45 = vrot.slane %v2434_v23, %v11724_v7 }
 0x184   : > { %v2425_v9 = vrot.slane %v2411_v5, %v11724_v7  ;;  %v2534_v16 = vpop.f32.mrf.mxu0 }
 0x185   : > { %v2535_v56 = vadd.f32 %v12186_v11, %v2534_v16 }
 0x186   : > { %v2426_v18 = vcombine.low %v2418_v6, %v2425_v9  ;;  %v10914_v19 = vpop.f32.mrf.mxu0 }
 0x187   : > { %v2636_v24 = vmax.f32 %v2535_v56, 0.0 }
 0x188   : > { %10957 = vmatmul.mubr.msk.bf16.gmra.mxu0 %vm2453_vm11, %v2426_v18  ;;  %v2537_v20 = vpop.f32.mrf.mxu0 }
 0x189   : > { %10960 = vmatprep.mubr.msk.bf16.mxu0 %vm11401_vm2, %v14701_v39  ;;  %v2538_v21 = vadd.f32 %v12186_v11, %v2537_v20  ;;  %v11100_v20 = vld [vmem:[%s14668_s3 + $0x78] sm:$0xff]  }
 0x18a   : > { %v10915_v10 = vpop.f32.mrf.mxu0  ;;  %10587 = vmatprep.subr.bf16.mxu1 %v11100_v20 }
 0x18b   : > { %v2637_v26 = vmax.f32 %v2538_v21, 0.0 }
 0x18d   : > { %v2661_v27 = vpack.c.bf16 %v2637_v26, %v2636_v24  ;;  %v10263_v2 = vpack.c.bf16 %v2637_v26, %v2637_v26  ;;  %v11101_v24 = vld [vmem:[%s14668_s3 + $0x38] sm:$0xff]  }
 0x18e   : > { %10588 = vmatpush3.bf16.msra.mxu1 %v11101_v24 }
 0x18f   : > { %v2694_v1 = vrot.slane %v2661_v27, %v11724_v7  ;;  %v2701_v28 = vrot.slane %v10263_v2, %v11724_v7 }
 0x190   : > { %10961 = vmatmul.mubr.msk.bf16.gmra.mxu0 %vm2453_vm11, %v2441_v45 }
 0x191   : > { %10972 = vmatprep.mubr.msk.bf16.mxu0 %vm11401_vm2, %v14701_v39  ;;  %v2702_v32 = vcombine.high %v2694_v1, %v2694_v1  ;;  %v2703_v12 = vcombine.high %v2701_v28, %v2701_v28  ;;  %v2710_v29 = vrot.slane %v2694_v1, %v11724_v7  ;;  %v2717_v14 = vrot.slane %v2701_v28, %v11724_v7 }
 0x193   : > { %v2724_v43 = vrot.slane %v2702_v32, %v11724_v7  ;;  %v2731_v31 = vrot.slane %v2703_v12, %v11724_v7  ;;  %v2732_v33 = vcombine.high %v2710_v29, %v2710_v29  ;;  %v2733_v51 = vcombine.high %v2717_v14, %v2717_v14 }
 0x195   : > { %v2734_v30 = vcombine.high %v2724_v43, %v2724_v43  ;;  %v3297_v59 = vcombine.low %v2710_v29, %v2724_v43  ;;  %v10275_v34 = vcombine.high %v2710_v29, %v2724_v43  ;;  %v3299_v36 = vcombine.low %v2717_v14, %v2731_v31 }
 0x196   : > { %v2542_v35 = vpop.f32.mrf.mxu0  ;;  %v4077_v37 = vcombine.low %v2724_v43, %v2732_v33  ;;  %v4079_v42 = vcombine.low %v2731_v31, %v2733_v51  ;;  %v3783_v46 = vrot.slane %v2733_v51, %v11724_v7  ;;  %v2735_v21 = vcombine.high %v2731_v31, %v2731_v31  ;;  %v11103_v33 = vld [vmem:[%s14668_s3 + $0x30] sm:$0xff]  }
 0x197   : > { %v3306_v53 = vrot.slane %v3297_v59, %v11724_v7  ;;  %v3313_v22 = vrot.slane %v10275_v34, %v11724_v7  ;;  %v4078_v58 = vcombine.low %v2734_v30, %v2717_v14  ;;  %v3320_v44 = vrot.slane %v3299_v36, %v11724_v7  ;;  %v11102_v14 = vld [vmem:[%s14668_s3 + $0x70] sm:$0xff]  }
 0x198   : > { %v10918_v41 = vpop.f32.mrf.mxu0  ;;  %v2543_v47 = vadd.f32 %v12186_v11, %v2542_v35  ;;  %v4086_v3 = vrot.slane %v4077_v37, %v11724_v7  ;;  %v4100_v52 = vrot.slane %v4079_v42, %v11724_v7  ;;  %10589 = vmatprep.subr.bf16.mxu1 %v11102_v14 }
 0x199   : > { %v3321_v25 = vcombine.low %v3306_v53, %v3313_v22  ;;  %v4093_v50 = vrot.slane %v4078_v58, %v11724_v7  ;;  %v3784_v15 = vcombine.low %v3320_v44, %v3783_v46  ;;  %v3335_v40 = vrot.slane %v3320_v44, %v11724_v7  ;;  %10590 = vmatpush3.bf16.msra.mxu1 %v11103_v33  ;;  %v11104_v41 = vld [vmem:[%s14668_s3 + $0x68] sm:$0xff]  }
 0x19a   : > { %v2545_v49 = vpop.f32.mrf.mxu0  ;;  %v2638_v60 = vmax.f32 %v2543_v47, 0.0  ;;  %v4115_v13 = vrot.slane %v4100_v52, %v11724_v7  ;;  %v11105_v47 = vld [vmem:[%s14668_s3 + $0x28] sm:$0xff]   ;;  %10591 = vmatprep.subr.bf16.mxu1 %v11104_v41 }
 0x19b   : > { %v2546_v48 = vadd.f32 %v12186_v11, %v2545_v49  ;;  %v3328_v55 = vrot.slane %v3321_v25, %v11724_v7  ;;  %v4101_v57 = vcombine.low %v4086_v3, %v4093_v50  ;;  %v3791_v62 = vrot.slane %v3784_v15, %v11724_v7 }
 0x19c   : > { %v10919_v54 = vpop.f32.mrf.mxu0 }
 0x19d   : > { %v2639_v61 = vmax.f32 %v2546_v48, 0.0  ;;  %v12216_v63 = vcombine.low %v3328_v55, %v3335_v40  ;;  %v4108_v0 = vrot.slane %v4101_v57, %v11724_v7  ;;  %v3792_v5 = vcombine.low %v3328_v55, %v3791_v62  ;;  %10592 = vmatpush3.bf16.msra.mxu1 %v11105_v47  ;;  %v11107_v62 = vld [vmem:[%s14668_s3 + $0x20] sm:$0xff]  }
 0x19f   : > { %v2662_v8 = vpack.c.bf16 %v2639_v61, %v2638_v60  ;;  %v10264_v4 = vpack.c.bf16 %v2639_v61, %v2639_v61  ;;  %v12220_v6 = vcombine.low %v4108_v0, %v4115_v13  ;;  %v3972_v17 = vshll.u32 %v3792_v5, 16  ;;  %v11106_v60 = vld [vmem:[%s14668_s3 + $0x60] sm:$0xff]  }
 0x1a0   : > { %v3970_v23 = vshrl.u32 %v3792_v5, 16  ;;  %10593 = vmatprep.subr.bf16.mxu1 %v11106_v60 }
 0x1a1   : > { %v2743_v9 = vrot.slane %v2662_v8, %v11724_v7  ;;  %v2750_v16 = vrot.slane %v10264_v4, %v11724_v7  ;;  %v3974_v10 = vrot.slane %v3972_v17, 1  ;;  %10594 = vmatpush3.bf16.msra.mxu1 %v11107_v62 }
 0x1a3   : > { %v2751_v18 = vcombine.high %v2743_v9, %v2743_v9  ;;  %v2752_v19 = vcombine.high %v2750_v16, %v2750_v16  ;;  %v2759_v56 = vrot.slane %v2743_v9, %v11724_v7  ;;  %v12232_v26 = vrot.slane %v2750_v16, %v11724_v7 }
 0x1a4   : > { %v3975_v28 = vor.u32 %v3974_v10, %v3970_v23 }
 0x1a5   : > { %v2773_v27 = vrot.slane %v2751_v18, %v11724_v7  ;;  %v12236_v2 = vrot.slane %v2752_v19, %v11724_v7  ;;  %v2781_v45 = vcombine.high %v2759_v56, %v2759_v56  ;;  %v3337_v1 = vcombine.low %v2735_v21, %v2759_v56  ;;  %v11108_v18 = vld [vmem:[%s14668_s3 + $0x58] sm:$0xff]  }
 0x1a6   : > { %v2550_v32 = vpop.f32.mrf.mxu0  ;;  %4053 = vrot.lane.b32.xlu0 %v3975_v28, %s11403_s26  ;;  %10595 = vmatprep.subr.bf16.mxu1 %v11108_v18 }
 0x1a7   : > { %v2783_v12 = vcombine.high %v2773_v27, %v2773_v27  ;;  %v4119_v29 = vcombine.low %v12232_v26, %v12236_v2  ;;  %v3338_v31 = vcombine.low %v2773_v27, %v2781_v45  ;;  %v2551_v30 = vadd.f32 %v12186_v11, %v2550_v32 }
 0x1a8   : > { %v10922_v43 = vpop.f32.mrf.mxu0  ;;  %v4117_v59 = vcombine.low %v2759_v56, %v2773_v27  ;;  %v3346_v35 = vrot.slane %v3337_v1, %v11724_v7  ;;  %v10284_v37 = vcombine.high %v2759_v56, %v2773_v27  ;;  %v3799_v58 = vrot.slane %v12236_v2, %v11724_v7  ;;  %v11109_v56 = vld [vmem:[%s14668_s3 + $0x18] sm:$0xff]  }
 0x1a9   : > { %v3339_v51 = vcombine.low %v2783_v12, %v12232_v26  ;;  %v3353_v36 = vrot.slane %v3338_v31, %v11724_v7  ;;  %v4140_v25 = vrot.slane %v4119_v29, %v11724_v7  ;;  %v2640_v3 = vmax.f32 %v2551_v30, 0.0  ;;  %10596 = vmatpush3.bf16.msra.mxu1 %v11109_v56  ;;  %v11111_v31 = vld [vmem:[%s14668_s3 + $0x10] sm:$0xff]  }
 0x1aa   : > { %v2553_v34 = vpop.f32.mrf.mxu0  ;;  %v4126_v42 = vrot.slane %v4117_v59, %v11724_v7  ;;  %v4133_v49 = vrot.slane %v10284_v37, %v11724_v7  ;;  %v10276_v20 = vcombine.high %v12232_v26, %v12236_v2  ;;  %v2784_v21 = vcombine.high %v12236_v2, %v12236_v2  ;;  %v11110_v26 = vld [vmem:[%s14668_s3 + $0x50] sm:$0xff]   ;;  %v11112_v37 = vld [vmem:[%s14668_s3 + $0x48] sm:$0xff]  }
 0x1ab   : > { %v2554_v53 = vadd.f32 %v12186_v11, %v2553_v34  ;;  %v3360_v22 = vrot.slane %v3339_v51, %v11724_v7  ;;  %v3361_v46 = vcombine.low %v3346_v35, %v3353_v36  ;;  %v4155_v13 = vrot.slane %v4140_v25, %v11724_v7  ;;  %10597 = vmatprep.subr.bf16.mxu1 %v11110_v26 }
 0x1ac   : > { %v10923_v44 = vpop.f32.mrf.mxu0  ;;  %v4141_v54 = vcombine.low %v4126_v42, %v4133_v49  ;;  %v3386_v33 = vrot.slane %v10276_v20, %v11724_v7 }
 0x1ad   : > { %v2641_v50 = vmax.f32 %v2554_v53, 0.0  ;;  %v3375_v52 = vrot.slane %v3360_v22, %v11724_v7  ;;  %v3800_v48 = vcombine.low %v3360_v22, %v3799_v58  ;;  %v3368_v15 = vrot.slane %v3361_v46, %v11724_v7  ;;  %10598 = vmatpush3.bf16.msra.mxu1 %v11111_v31  ;;  %v11113_v53 = vld [vmem:[%s14668_s3 + $0x8] sm:$0xff]  }
 0x1ae   : > { %v4148_v0 = vrot.slane %v4141_v54, %v11724_v7  ;;  %10599 = vmatprep.subr.bf16.mxu1 %v11112_v37  ;;  %v11404_v54 = vmov 1983009808  }
 0x1af   : > { %v2663_v55 = vpack.c.bf16 %v2641_v50, %v2640_v3  ;;  %v10265_v40 = vpack.c.bf16 %v2641_v50, %v2641_v50  ;;  %v3807_v57 = vrot.slane %v3800_v48, %v11724_v7  ;;  %v12270_v61 = vcombine.low %v3368_v15, %v3375_v52 }
 0x1b0   : > { %v12283_v9 = vcombine.low %v4148_v0, %v4155_v13 }
 0x1b1   : > { %v2792_v8 = vrot.slane %v2663_v55, %v11724_v7  ;;  %v3808_v4 = vcombine.low %v3368_v15, %v3807_v57  ;;  %v12279_v5 = vrot.slane %v10265_v40, %v11724_v7  ;;  %4597 = vrot.lane.b32.xlu0 %v12270_v61, %s11403_s26  ;;  %v4973_v55 = vunpack.c.l.s4 %v11404_v54  ;;  %10600 = vmatpush3.bf16.msra.mxu1 %v11113_v53 }
 0x1b3   : > { %v2800_v16 = vcombine.high %v2792_v8, %v2792_v8  ;;  %v2808_v17 = vrot.slane %v2792_v8, %v11724_v7  ;;  %v3979_v19 = vshll.u32 %v3808_v4, 16  ;;  %v12299_v24 = vrot.slane %v12279_v5, %v11724_v7 }
 0x1b4   : > { %v3977_v45 = vshrl.u32 %v3808_v4, 16  ;;  %v2801_v44 = vcombine.high %v12279_v5, %v12279_v5  ;;  %v11114_v4 = vld [vmem:[%s14668_s3 + $0x40] sm:$0xff]  }
 0x1b5   : > { %v2822_v23 = vrot.slane %v2800_v16, %v11724_v7  ;;  %v2830_v10 = vcombine.high %v2808_v17, %v2808_v17  ;;  %v3981_v1 = vrot.slane %v3979_v19, 1  ;;  %v4157_v32 = vcombine.low %v2784_v21, %v2808_v17  ;;  %10601 = vmatprep.subr.bf16.mxu1 %v11114_v4 }
 0x1b6   : > { %v2558_v27 = vpop.f32.mrf.mxu0  ;;  %v3815_v59 = vrot.slane %v12299_v24, %v11724_v7  ;;  %v2829_v13 = vrot.slane %v2801_v44, %v11724_v7  ;;  %v2831_v5 = vcombine.high %v12299_v24, %v12299_v24  ;;  %v4974_v19 = vunpack.c.0.s8 %v4973_v55 }
 0x1b7   : > { %v3378_v28 = vcombine.low %v2808_v17, %v2822_v23  ;;  %v2559_v2 = vadd.f32 %v12186_v11, %v2558_v27  ;;  %v12305_v12 = vor.u32 %v3981_v1, %v3977_v45  ;;  %v10277_v14 = vcombine.high %v2808_v17, %v2822_v23  ;;  %v11115_v17 = vld [vmem:[%s14668_s3] sm:$0xff]  }
 0x1b8   : > { %v10926_v29 = vpop.f32.mrf.mxu0  ;;  %v2832_v43 = vcombine.high %v2822_v23, %v2822_v23  ;;  %v4158_v30 = vcombine.low %v2822_v23, %v2830_v10  ;;  %v4166_v41 = vrot.slane %v4157_v32, %v11724_v7  ;;  %10602 = vmatpush3.bf16.msra.mxu1 %v11115_v17  ;;  %v2833_v10 = vcombine.high %v2829_v13, %v2829_v13 }
 0x1b9   : > { %14733 = vst [vmem:[#allocation10_spill] sm:$0xff] %v12305_v12  ;;  %v3393_v51 = vrot.slane %v3378_v28, %v11724_v7  ;;  %4055 = vrot.lane.b32.xlu1 %v12305_v12, %s11403_s26  ;;  %v3400_v35 = vrot.slane %v10277_v14, %v11724_v7  ;;  %v2642_v46 = vmax.f32 %v2559_v2, 0.0  ;;  %v10285_v27 = vcombine.high %v12299_v24, %v2829_v13 }
 0x1ba   : > { %v2561_v34 = vpop.f32.mrf.mxu0  ;;  %v4159_v36 = vcombine.low %v2832_v43, %v12299_v24  ;;  %v4173_v42 = vrot.slane %v4158_v30, %v11724_v7  ;;  %v3417_v28 = vcombine.low %v2829_v13, %v2831_v5  ;;  %v12361_v14 = vsub.s32 %v4974_v19, %v11709_v38 }
 0x1bb   : > { %v2562_v22 = vadd.f32 %v12186_v11, %v2561_v34  ;;  %v3401_v58 = vcombine.low %v3386_v33, %v3393_v51  ;;  %v3816_v49 = vcombine.low %v3400_v35, %v3815_v59  ;;  %v3415_v52 = vrot.slane %v3400_v35, %v11724_v7 }
 0x1bc   : > { %v10927_v47 = vpop.f32.mrf.mxu0  ;;  %v4180_v25 = vrot.slane %v4159_v36, %v11724_v7  ;;  %v4181_v48 = vcombine.low %v4166_v41, %v4173_v42  ;;  %v4206_v24 = vrot.slane %v10285_v27, %v11724_v7  ;;  %v3426_v35 = vrot.slane %v3417_v28, %v11724_v7 }
 0x1bd   : > { %v2643_v3 = vmax.f32 %v2562_v22, 0.0  ;;  %v3408_v50 = vrot.slane %v3401_v58, %v11724_v7  ;;  %v3823_v40 = vrot.slane %v3816_v49, %v11724_v7 }
 0x1be   : > { %v12333_v15 = vrot.slane %v4180_v25, %v11724_v7  ;;  %v4188_v0 = vrot.slane %v4181_v48, %v11724_v7 }
 0x1bf   : > { %v2664_v57 = vpack.c.bf16 %v2643_v3, %v2642_v46  ;;  %v10266_v60 = vpack.c.bf16 %v2643_v3, %v2643_v3  ;;  %v12336_v62 = vcombine.low %v3408_v50, %v3415_v52  ;;  %v3824_v8 = vcombine.low %v3408_v50, %v3823_v40 }
 0x1c0   : > { %v12354_v23 = vcombine.low %v4188_v0, %v12333_v15  ;;  %v10295_v3 = vcombine.low %v12333_v15, %v12333_v15 }
 0x1c1   : > { %v2841_v16 = vrot.slane %v2664_v57, %v11724_v7  ;;  %4599 = vrot.lane.b32.xlu1 %v12336_v62, %s11403_s26  ;;  %v2848_v18 = vrot.slane %v10266_v60, %v11724_v7  ;;  %v3986_v56 = vshll.u32 %v3824_v8, 16  ;;  %v3984_v45 = vshrl.u32 %v3824_v8, 16 }
 0x1c2   : > { %v5010_v22 = vrot.slane %v12354_v23, %v12361_v14 }
 0x1c3   : > { %v2849_v20 = vcombine.high %v2841_v16, %v2841_v16  ;;  %v2857_v21 = vrot.slane %v2841_v16, %v11724_v7  ;;  %v3988_v1 = vrot.slane %v3986_v56, 1  ;;  %v2850_v2 = vcombine.high %v2848_v18, %v2848_v18 }
 0x1c4   : > { %v2864_v49 = vrot.slane %v2848_v18, %v11724_v7  ;;  %v5018_v60 = vcombine.high %v5010_v22, %v5010_v22  ;;  %v5017_v18 = vrot.slane %v10295_v3, %v12361_v14 }
 0x1c5   : > { %v2871_v32 = vrot.slane %v2849_v20, %v11724_v7  ;;  %v2879_v26 = vcombine.high %v2857_v21, %v2857_v21  ;;  %4686 = vrot.lane.b32.xlu1 %v12354_v23, %s11403_s26  ;;  %v3418_v29 = vcombine.low %v2833_v10, %v2857_v21  ;;  %v12363_v43 = vor.u32 %v3988_v1, %v3984_v45 }
 0x1c6   : > { %v2878_v37 = vrot.slane %v2850_v2, %v11724_v7  ;;  %v2880_v16 = vcombine.high %v2864_v49, %v2864_v49 }
 0x1c7   : > { %v2881_v31 = vcombine.high %v2871_v32, %v2871_v32  ;;  %v4198_v33 = vcombine.low %v2857_v21, %v2871_v32  ;;  %v10286_v51 = vcombine.high %v2857_v21, %v2871_v32  ;;  %4057 = vrot.lane.b32.xlu0 %v12363_v43, %s11403_s26  ;;  %v3419_v34 = vcombine.low %v2871_v32, %v2879_v26 }
 0x1c8   : > { %v2566_v30 = vpop.f32.mrf.mxu0  ;;  %v3433_v36 = vrot.slane %v3418_v29, %v11724_v7  ;;  %v3457_v40 = vcombine.low %v2864_v49, %v2878_v37  ;;  %v10278_v57 = vcombine.high %v2864_v49, %v2878_v37  ;;  %v5695_v21 = vcombine.low %v5010_v22, %v5018_v60 }
 0x1c9   : > { %v4213_v59 = vrot.slane %v4198_v33, %v11724_v7  ;;  %v4220_v53 = vrot.slane %v10286_v51, %v11724_v7  ;;  %v3831_v41 = vrot.slane %v2881_v31, %v11724_v7  ;;  %v2567_v44 = vadd.f32 %v12186_v11, %v2566_v30 }
 0x1ca   : > { %v10930_v58 = vpop.f32.mrf.mxu0  ;;  %v3440_v46 = vrot.slane %v3419_v34, %v11724_v7  ;;  %v3441_v47 = vcombine.low %v3426_v35, %v3433_v36  ;;  %v3466_v27 = vrot.slane %v3457_v40, %v11724_v7  ;;  %v3473_v45 = vrot.slane %v10278_v57, %v11724_v7 }
 0x1cb   : > { %v4221_v42 = vcombine.low %v4206_v24, %v4213_v59  ;;  %v12380_v25 = vrot.slane %v4220_v53, %v11724_v7  ;;  %v2644_v4 = vmax.f32 %v2567_v44, 0.0  ;;  %v4237_v26 = vcombine.low %v2878_v37, %v2880_v16 }
 0x1cc   : > { %v2569_v50 = vpop.f32.mrf.mxu0  ;;  %v3448_v54 = vrot.slane %v3441_v47, %v11724_v7  ;;  %v3455_v55 = vrot.slane %v3440_v46, %v11724_v7  ;;  %v3832_v13 = vcombine.low %v3440_v46, %v3831_v41  ;;  %v2882_v31 = vcombine.high %v2878_v37, %v2878_v37 }
 0x1cd   : > { %v4228_v52 = vrot.slane %v4221_v42, %v11724_v7  ;;  %v2570_v48 = vadd.f32 %v12186_v11, %v2569_v50  ;;  %v5703_v51 = vrot.slane %v5695_v21, %v12361_v14  ;;  %v3481_v34 = vcombine.low %v3466_v27, %v3473_v45 }
 0x1ce   : > { %v10931_v0 = vpop.f32.mrf.mxu0  ;;  %v12391_v15 = vcombine.low %v3448_v54, %v3455_v55  ;;  %v3839_v17 = vrot.slane %v3832_v13, %v11724_v7  ;;  %v10296_v47 = vcombine.low %v12380_v25, %v12380_v25  ;;  %v4246_v49 = vrot.slane %v4237_v26, %v11724_v7 }
 0x1cf   : > { %v12389_v8 = vcombine.low %v4228_v52, %v12380_v25  ;;  %v2645_v5 = vmax.f32 %v2570_v48, 0.0  ;;  %v3488_v55 = vrot.slane %v3481_v34, %v11724_v7 }
 0x1d0   : > { %4601 = vrot.lane.b32.xlu1 %v12391_v15, %s11403_s26  ;;  %v3840_v10 = vcombine.low %v3448_v54, %v3839_v17  ;;  %v5068_v16 = vrot.slane %v10296_v47, %v12361_v14 }
 0x1d1   : > { %v12397_v19 = vrot.slane %v12389_v8, %v12361_v14  ;;  %v2665_v56 = vpack.c.bf16 %v2645_v5, %v2644_v4  ;;  %v10267_v20 = vpack.c.bf16 %v2645_v5, %v2645_v5 }
 0x1d2   : > { %v3993_v2 = vshll.u32 %v3840_v10, 16  ;;  %v3991_v30 = vshrl.u32 %v3840_v10, 16 }
 0x1d3   : > { %v5696_v1 = vcombine.low %v5017_v18, %v12397_v19  ;;  %v2890_v28 = vrot.slane %v2665_v56, %v11724_v7  ;;  %v2897_v32 = vrot.slane %v10267_v20, %v11724_v7  ;;  %v5069_v21 = vcombine.high %v12397_v19, %v12397_v19 }
 0x1d4   : > { %v3995_v59 = vrot.slane %v3993_v2, 1 }
 0x1d5   : > { %v5710_v29 = vrot.slane %v5696_v1, %v12361_v14  ;;  %v2898_v33 = vcombine.high %v2890_v28, %v2890_v28  ;;  %v2906_v24 = vrot.slane %v2890_v28, %v11724_v7  ;;  %v2899_v35 = vcombine.high %v2897_v32, %v2897_v32 }
 0x1d6   : > { %v12410_v58 = vor.u32 %v3995_v59, %v3991_v30  ;;  %v2913_v37 = vrot.slane %v2897_v32, %v11724_v7 }
 0x1d7   : > { %v2920_v36 = vrot.slane %v2898_v33, %v11724_v7  ;;  %v2928_v53 = vcombine.high %v2906_v24, %v2906_v24  ;;  %v4238_v22 = vcombine.low %v2882_v31, %v2906_v24  ;;  %v5711_v42 = vcombine.low %v5703_v51, %v5710_v29 }
 0x1d8   : > { %14734 = vst [vmem:[#allocation11_spill] sm:$0xff] %v12410_v58  ;;  %v2574_v41 = vpop.f32.mrf.mxu0  ;;  %4059 = vrot.lane.b32.xlu0 %v12410_v58, %s11403_s26  ;;  %v2927_v52 = vrot.slane %v2899_v35, %v11724_v7  ;;  %v2929_v13 = vcombine.high %v2913_v37, %v2913_v37  ;;  %v5748_v51 = vcombine.low %v5069_v21, %v5068_v16 }
 0x1d9   : > { %v3459_v44 = vcombine.low %v2906_v24, %v2920_v36  ;;  %v4239_v46 = vcombine.low %v2920_v36, %v2928_v53  ;;  %v4253_v3 = vrot.slane %v4238_v22, %v11724_v7  ;;  %v2575_v54 = vadd.f32 %v12186_v11, %v2574_v41  ;;  %10973 = vmatmul.mubr.msk.bf16.vlgmr.msra.gmra.mxu0 %vm4815_vm12, %v5711_v42 }
 0x1da   : > { %v10934_v50 = vpop.f32.mrf.mxu0  ;;  %v2930_v40 = vcombine.high %v2920_v36, %v2920_v36  ;;  %v3847_v25 = vrot.slane %v2928_v53, %v11724_v7  ;;  %10976 = vmatprep.mubr.msk.bf16.mxu0 %vm11401_vm2, %v14701_v39  ;;  %v4277_v10 = vcombine.low %v2913_v37, %v2927_v52  ;;  %v10287_v27 = vcombine.high %v2913_v37, %v2927_v52 }
 0x1db   : > { %v4260_v48 = vrot.slane %v4239_v46, %v11724_v7  ;;  %v4261_v57 = vcombine.low %v4246_v49, %v4253_v3  ;;  %v3480_v0 = vrot.slane %v3459_v44, %v11724_v7  ;;  %v2646_v45 = vmax.f32 %v2575_v54, 0.0 }
 0x1dc   : > { %v2577_v60 = vpop.f32.mrf.mxu0  ;;  %v3497_v28 = vcombine.low %v2930_v40, %v2913_v37  ;;  %v3498_v29 = vcombine.low %v2927_v52, %v2929_v13  ;;  %v4286_v30 = vrot.slane %v4277_v10, %v11724_v7  ;;  %v2931_v59 = vcombine.high %v2927_v52, %v2927_v52 }
 0x1dd   : > { %v12429_v4 = vrot.slane %v4260_v48, %v11724_v7  ;;  %v2578_v5 = vadd.f32 %v12186_v11, %v2577_v60  ;;  %v4268_v17 = vrot.slane %v4261_v57, %v11724_v7  ;;  %v3495_v56 = vrot.slane %v3480_v0, %v11724_v7 }
 0x1de   : > { %v10935_v18 = vpop.f32.mrf.mxu0  ;;  %v3848_v20 = vcombine.low %v3480_v0, %v3847_v25  ;;  %v3506_v36 = vrot.slane %v3497_v28, %v11724_v7  ;;  %v4293_v53 = vrot.slane %v10287_v27, %v11724_v7  ;;  %v3513_v46 = vrot.slane %v3498_v29, %v11724_v7 }
 0x1df   : > { %v2647_v1 = vmax.f32 %v2578_v5, 0.0  ;;  %v12437_v32 = vcombine.low %v3488_v55, %v3495_v56  ;;  %v12441_v2 = vcombine.low %v4268_v17, %v12429_v4 }
 0x1e0   : > { %v3855_v26 = vrot.slane %v3848_v20, %v11724_v7  ;;  %v4301_v40 = vcombine.low %v4286_v30, %v4293_v53  ;;  %v3521_v0 = vcombine.low %v3506_v36, %v3513_v46 }
 0x1e1   : > { %v2666_v31 = vpack.c.bf16 %v2647_v1, %v2646_v45  ;;  %v10268_v33 = vpack.c.bf16 %v2647_v1, %v2647_v1  ;;  %4603 = vrot.lane.b32.xlu1 %v12437_v32, %s11403_s26  ;;  %v5112_v19 = vrot.slane %v12441_v2, %v12361_v14 }
 0x1e2   : > { %v3856_v24 = vcombine.low %v3488_v55, %v3855_v26  ;;  %v5756_v55 = vrot.slane %v5748_v51, %v12361_v14  ;;  %v12486_v36 = vrot.slane %v3521_v0, %v11724_v7 }
 0x1e3   : > { %v2939_v34 = vrot.slane %v2666_v31, %v11724_v7  ;;  %v2946_v35 = vrot.slane %v10268_v33, %v11724_v7  ;;  %v5120_v41 = vcombine.high %v5112_v19, %v5112_v19 }
 0x1e4   : > { %v4000_v22 = vshll.u32 %v3856_v24, 16  ;;  %v3998_v49 = vshrl.u32 %v3856_v24, 16  ;;  %v10297_v24 = vcombine.low %v12429_v4, %v12429_v4 }
 0x1e5   : > { %v2947_v42 = vcombine.high %v2939_v34, %v2939_v34  ;;  %v2948_v37 = vcombine.high %v2946_v35, %v2946_v35  ;;  %v2955_v44 = vrot.slane %v2939_v34, %v11724_v7  ;;  %v2962_v47 = vrot.slane %v2946_v35, %v11724_v7 }
 0x1e6   : > { %v4002_v3 = vrot.slane %v4000_v22, 1  ;;  %v5749_v50 = vcombine.low %v5112_v19, %v5120_v41  ;;  %v4308_v19 = vrot.slane %v4301_v40, %v11724_v7 }
 0x1e7   : > { %v2969_v52 = vrot.slane %v2947_v42, %v11724_v7  ;;  %v12457_v48 = vrot.slane %v2948_v37, %v11724_v7  ;;  %v3499_v54 = vcombine.low %v2931_v59, %v2955_v44  ;;  %v2978_v18 = vcombine.high %v2962_v47, %v2962_v47 }
 0x1e8   : > { %v2582_v25 = vpop.f32.mrf.mxu0  ;;  %v12460_v57 = vor.u32 %v4002_v3, %v3998_v49  ;;  %v5763_v60 = vrot.slane %v5749_v50, %v12361_v14 }
 0x1e9   : > { %v2979_v13 = vcombine.high %v2969_v52, %v2969_v52  ;;  %v12464_v5 = vrot.slane %v3499_v54, %v11724_v7  ;;  %v10279_v16 = vcombine.high %v2955_v44, %v2969_v52  ;;  %v3538_v17 = vcombine.low %v2962_v47, %v12457_v48 }
 0x1ea   : > { %v3863_v56 = vrot.slane %v2969_v52, %v11724_v7  ;;  %v4279_v20 = vcombine.low %v2955_v44, %v2969_v52  ;;  %4061 = vrot.lane.b32.xlu1 %v12460_v57, %s11403_s26  ;;  %v10938_v21 = vpop.f32.mrf.mxu0  ;;  %v5764_v10 = vcombine.low %v5756_v55, %v5763_v60  ;;  %v2583_v27 = vadd.f32 %v12186_v11, %v2582_v25 }
 0x1eb   : > { %v10280_v45 = vcombine.high %v2962_v47, %v12457_v48  ;;  %v3546_v1 = vrot.slane %v10279_v16, %v11724_v7  ;;  %v3553_v28 = vrot.slane %v3538_v17, %v11724_v7  ;;  %v4317_v29 = vcombine.low %v2979_v13, %v2962_v47 }
 0x1ec   : > { %v4300_v26 = vrot.slane %v4279_v20, %v11724_v7  ;;  %10977 = vmatmul.mubr.msk.bf16.gmra.mxu0 %vm4815_vm12, %v5764_v10  ;;  %v2585_v31 = vpop.f32.mrf.mxu0  ;;  %v3864_v33 = vcombine.low %v12464_v5, %v3863_v56  ;;  %v4318_v4 = vcombine.low %v12457_v48, %v2978_v18  ;;  %v2648_v22 = vmax.f32 %v2583_v27, 0.0 }
 0x1ed   : > { %v2586_v51 = vadd.f32 %v12186_v11, %v2585_v31  ;;  %v3560_v30 = vrot.slane %v10280_v45, %v11724_v7  ;;  %v3561_v59 = vcombine.low %v3546_v1, %v3553_v28  ;;  %10980 = vmatprep.mubr.msk.bf16.mxu0 %vm11401_vm2, %v14701_v39  ;;  %v4326_v49 = vrot.slane %v4317_v29, %v11724_v7 }
 0x1ee   : > { %v4315_v34 = vrot.slane %v4300_v26, %v11724_v7  ;;  %v10939_v35 = vpop.f32.mrf.mxu0  ;;  %v3871_v53 = vrot.slane %v3864_v33, %v11724_v7  ;;  %v5119_v54 = vrot.slane %v10297_v24, %v12361_v14  ;;  %v3535_v25 = vrot.slane %v12464_v5, %v11724_v7 }
 0x1ef   : > { %v2649_v41 = vmax.f32 %v2586_v51, 0.0  ;;  %v12491_v42 = vrot.slane %v3561_v59, %v11724_v7  ;;  %v3575_v37 = vrot.slane %v3560_v30, %v11724_v7  ;;  %v4333_v60 = vrot.slane %v4318_v4, %v11724_v7 }
 0x1f0   : > { %v12494_v44 = vcombine.low %v4308_v19, %v4315_v34  ;;  %v3872_v46 = vcombine.low %v12486_v36, %v3871_v53  ;;  %v10298_v47 = vcombine.low %v4315_v34, %v4315_v34  ;;  %v2980_v29 = vcombine.high %v12457_v48, %v12457_v48 }
 0x1f1   : > { %v2667_v3 = vpack.c.bf16 %v2649_v41, %v2648_v22  ;;  %v10269_v50 = vpack.c.bf16 %v2649_v41, %v2649_v41  ;;  %v12499_v52 = vcombine.low %v12491_v42, %v3575_v37  ;;  %v4341_v21 = vcombine.low %v4326_v49, %v4333_v60 }
 0x1f2   : > { %v4007_v55 = vshll.u32 %v3872_v46, 16  ;;  %v5163_v40 = vrot.slane %v12494_v44, %v12361_v14  ;;  %v4005_v16 = vshrl.u32 %v3872_v46, 16  ;;  %v5170_v17 = vrot.slane %v10298_v47, %v12361_v14 }
 0x1f3   : > { %v2988_v0 = vrot.slane %v2667_v3, %v11724_v7  ;;  %v2995_v13 = vrot.slane %v10269_v50, %v11724_v7  ;;  %4607 = vrot.lane.b32.xlu1 %v12499_v52, %s11403_s26  ;;  %v4348_v35 = vrot.slane %v4341_v21, %v11724_v7 }
 0x1f4   : > { %v4009_v18 = vrot.slane %v4007_v55, 1  ;;  %v5171_v56 = vcombine.high %v5163_v40, %v5163_v40  ;;  %v5801_v20 = vcombine.low %v5119_v54, %v5163_v40 }
 0x1f5   : > { %v2996_v10 = vcombine.high %v2988_v0, %v2988_v0  ;;  %v2997_v27 = vcombine.high %v2995_v13, %v2995_v13  ;;  %v3004_v5 = vrot.slane %v2988_v0, %v11724_v7  ;;  %v3011_v45 = vrot.slane %v2995_v13, %v11724_v7 }
 0x1f6   : > { %v12514_v1 = vor.u32 %v4009_v18, %v4005_v16  ;;  %v5802_v28 = vcombine.low %v5171_v56, %v5170_v17  ;;  %v5809_v26 = vrot.slane %v5801_v20, %v12361_v14  ;;  %v12541_v18 = vcombine.low %v12486_v36, %v3535_v25 }
 0x1f7   : > { %v3018_v31 = vrot.slane %v2996_v10, %v11724_v7  ;;  %v3025_v33 = vrot.slane %v2997_v27, %v11724_v7  ;;  %v3026_v24 = vcombine.high %v3004_v5, %v3004_v5  ;;  %v3027_v19 = vcombine.high %v3011_v45, %v3011_v45 }
 0x1f8   : > { %14735 = vst [vmem:[#allocation12_spill] sm:$0xff] %v12514_v1  ;;  %v3879_v51 = vrot.slane %v3004_v5, %v11724_v7  ;;  %4063 = vrot.lane.b32.xlu0 %v12514_v1, %s11403_s26  ;;  %v5816_v59 = vrot.slane %v5802_v28, %v12361_v14  ;;  %v4319_v34 = vcombine.low %v2980_v29, %v3004_v5 }
 0x1f9   : > { %v3028_v53 = vcombine.high %v3018_v31, %v3018_v31  ;;  %v3029_v4 = vcombine.high %v3025_v33, %v3025_v33  ;;  %v3577_v22 = vcombine.low %v3018_v31, %v3026_v24  ;;  %v10288_v48 = vcombine.high %v3004_v5, %v3018_v31 }
 0x1fa   : > { %v4358_v41 = vcombine.low %v3011_v45, %v3025_v33  ;;  %v10289_v37 = vcombine.high %v3011_v45, %v3025_v33  ;;  %v3880_v46 = vcombine.low %v3560_v30, %v3879_v51  ;;  %v5817_v47 = vcombine.low %v5809_v26, %v5816_v59 }
 0x1fb   : > { %v3578_v49 = vcombine.low %v3028_v53, %v3011_v45  ;;  %v4366_v3 = vrot.slane %v10288_v48, %v11724_v7  ;;  %v4340_v50 = vrot.slane %v4319_v34, %v11724_v7  ;;  %v3579_v54 = vcombine.low %v3025_v33, %v3027_v19 }
 0x1fc   : > { %v4373_v55 = vrot.slane %v4358_v41, %v11724_v7  ;;  %v4380_v40 = vrot.slane %v10289_v37, %v11724_v7  ;;  %4690 = vrot.lane.b32.xlu0 %v12441_v2, %s11403_s26  ;;  %10981 = vmatmul.mubr.msk.bf16.gmra.mxu0 %vm4815_vm12, %v5817_v47  ;;  %v3887_v60 = vrot.slane %v3880_v46, %v11724_v7 }
 0x1fd   : > { %v4355_v30 = vrot.slane %v4340_v50, %v11724_v7  ;;  %v3586_v0 = vrot.slane %v3577_v22, %v11724_v7  ;;  %v3593_v13 = vrot.slane %v3578_v49, %v11724_v7  ;;  %v3600_v16 = vrot.slane %v3579_v54, %v11724_v7  ;;  %10984 = vmatprep.mubr.msk.bf16.mxu0 %vm11401_vm2, %v14701_v39 }
 0x1fe   : > { %v4381_v17 = vcombine.low %v4366_v3, %v4373_v55  ;;  %v3888_v56 = vcombine.low %v12491_v42, %v3887_v60  ;;  %v3895_v20 = vrot.slane %v3029_v4, %v11724_v7  ;;  %v12546_v21 = vrot.slane %v4380_v40, %v11724_v7 }
 0x1ff   : > { %v12548_v10 = vcombine.low %v4348_v35, %v4355_v30  ;;  %v3601_v27 = vcombine.low %v3586_v0, %v3593_v13  ;;  %v10299_v45 = vcombine.low %v4355_v30, %v4355_v30  ;;  %v3615_v25 = vrot.slane %v3600_v16, %v11724_v7 }
 0x200   : > { %v4388_v5 = vrot.slane %v4381_v17, %v11724_v7  ;;  %4605 = vrot.lane.b32.xlu0 %v12541_v18, %s11403_s26  ;;  %v4014_v28 = vshll.u32 %v3888_v56, 16  ;;  %v3896_v26 = vcombine.low %v3600_v16, %v3895_v20  ;;  %v4012_v29 = vshrl.u32 %v3888_v56, 16 }
 0x201   : > { %4694 = vrot.lane.b32.xlu1 %v12548_v10, %s11403_s26  ;;  %v5214_v36 = vrot.slane %v12548_v10, %v12361_v14  ;;  %v3608_v42 = vrot.slane %v3601_v27, %v11724_v7  ;;  %v5221_v35 = vrot.slane %v10299_v45, %v12361_v14 }
 0x202   : > { %v4016_v31 = vrot.slane %v4014_v28, 1  ;;  %v3903_v33 = vrot.slane %v3896_v26, %v11724_v7  ;;  %v12561_v24 = vcombine.low %v4388_v5, %v12546_v21 }
 0x203   : > { %v12563_v19 = vcombine.low %v3608_v42, %v3615_v25  ;;  %v5222_v51 = vcombine.high %v5214_v36, %v5214_v36 }
 0x204   : > { %v12565_v59 = vor.u32 %v4016_v31, %v4012_v29  ;;  %v3904_v34 = vcombine.low %v3608_v42, %v3903_v33  ;;  %v12570_v53 = vrot.slane %v12561_v24, %v12361_v14  ;;  %v2590_v4 = vpop.f32.mrf.mxu0 }
 0x205   : > { %4609 = vrot.lane.b32.xlu1 %v12563_v19, %s11403_s26  ;;  %v5854_v22 = vcombine.low %v5214_v36, %v5222_v51  ;;  %v2591_v37 = vadd.f32 %v12186_v11, %v2590_v4 }
 0x206   : > { %4065 = vrot.lane.b32.xlu0 %v12565_v59, %s11403_s26  ;;  %v4021_v48 = vshll.u32 %v3904_v34, 16  ;;  %v5855_v41 = vcombine.low %v5221_v35, %v12570_v53  ;;  %v10942_v46 = vpop.f32.mrf.mxu0  ;;  %v4019_v47 = vshrl.u32 %v3904_v34, 16 }
 0x207   : > { %v5862_v3 = vrot.slane %v5854_v22, %v12361_v14  ;;  %v2650_v0 = vmax.f32 %v2591_v37, 0.0  ;;  %v12604_v46 = vld [vmem:[%s14667_s2] ss:$0 sm:$0xff] }
 0x208   : > { %v4023_v49 = vrot.slane %v4021_v48, 1  ;;  %v5869_v50 = vrot.slane %v5855_v41, %v12361_v14  ;;  %v2593_v54 = vpop.f32.mrf.mxu0 }
 0x209   : > { %v2594_v55 = vadd.f32 %v12186_v11, %v2593_v54 }
 0x20a   : > { %v12581_v40 = vor.u32 %v4023_v49, %v4019_v47  ;;  %v5870_v60 = vcombine.low %v5862_v3, %v5869_v50  ;;  %v10943_v30 = vpop.f32.mrf.mxu0 }
 0x20b   : > { %v2651_v13 = vmax.f32 %v2594_v55, 0.0 }
 0x20c   : > { %14736 = vst [vmem:[#allocation13_spill] sm:$0xff] %v12581_v40  ;;  %4067 = vrot.lane.b32.xlu0 %v12581_v40, %s11403_s26  ;;  %10985 = vmatmul.mubr.msk.bf16.gmra.mxu0 %vm4815_vm12, %v5870_v60 }
 0x20d   : > { %10988 = vmatprep.mubr.msk.bf16.mxu0 %vm11401_vm2, %v14701_v39  ;;  %v2668_v16 = vpack.c.bf16 %v2651_v13, %v2650_v0  ;;  %v10270_v17 = vpack.c.bf16 %v2651_v13, %v2651_v13 }
 0x20f   : > { %v3037_v56 = vrot.slane %v2668_v16, %v11724_v7  ;;  %v3044_v11 = vrot.slane %v10270_v17, %v11724_v7 }
 0x211   : > { %v3045_v20 = vcombine.high %v3037_v56, %v3037_v56  ;;  %v3046_v27 = vcombine.high %v3044_v11, %v3044_v11  ;;  %v3053_v5 = vrot.slane %v3037_v56, %v11724_v7  ;;  %v3060_v45 = vrot.slane %v3044_v11, %v11724_v7 }
 0x213   : > { %v3067_v28 = vrot.slane %v3045_v20, %v11724_v7  ;;  %v12594_v26 = vrot.slane %v3046_v27, %v11724_v7  ;;  %v3075_v36 = vcombine.high %v3053_v5, %v3053_v5  ;;  %v3076_v42 = vcombine.high %v3060_v45, %v3060_v45 }
 0x215   : > { %v3077_v25 = vcombine.high %v3067_v28, %v3067_v28  ;;  %v3617_v29 = vcombine.low %v3053_v5, %v3067_v28  ;;  %v10281_v31 = vcombine.high %v3053_v5, %v3067_v28  ;;  %v3619_v51 = vcombine.low %v3060_v45, %v12594_v26 }
 0x216   : > { %v2598_v33 = vpop.f32.mrf.mxu0  ;;  %v4397_v34 = vcombine.low %v3067_v28, %v3075_v36  ;;  %v4399_v35 = vcombine.low %v12594_v26, %v3076_v42  ;;  %v3911_v37 = vrot.slane %v3076_v42, %v11724_v7 }
 0x217   : > { %v4398_v4 = vcombine.low %v3077_v25, %v3060_v45  ;;  %v3626_v48 = vrot.slane %v3617_v29, %v11724_v7  ;;  %v3633_v41 = vrot.slane %v10281_v31, %v11724_v7  ;;  %v2599_v47 = vadd.f32 %v12604_v46, %v2598_v33 }
 0x218   : > { %v10946_v22 = vpop.f32.mrf.mxu0  ;;  %v3640_v49 = vrot.slane %v3619_v51, %v11724_v7  ;;  %v4406_v3 = vrot.slane %v4397_v34, %v11724_v7  ;;  %v4420_v54 = vrot.slane %v4399_v35, %v11724_v7  ;;  %v4054_v25 = vpop.permute.xlu0 %4053  ;;  %v10300_v33 = vcombine.low %v12546_v21, %v12546_v21  ;;  %v11116_v35 = vld [vmem:[%s14668_s3 + $0xf8] sm:$0xff]  }
 0x219   : > { %v4413_v50 = vrot.slane %v4398_v4, %v11724_v7  ;;  %v3641_v60 = vcombine.low %v3626_v48, %v3633_v41  ;;  %v2652_v11 = vmax.f32 %v2599_v47, 0.0  ;;  %v5273_v22 = vcombine.high %v12570_v53, %v12570_v53  ;;  %10657 = vmatprep.subr.bf16.mxu1 %v11116_v35 }
 0x21a   : > { %v2601_v55 = vpop.f32.mrf.mxu0  ;;  %v3655_v17 = vrot.slane %v3640_v49, %v11724_v7  ;;  %v3912_v56 = vcombine.low %v3640_v49, %v3911_v37  ;;  %v12616_v5 = vrot.slane %v4420_v54, %v11724_v7 }
 0x21b   : > { %v2602_v30 = vadd.f32 %v12604_v46, %v2601_v55  ;;  %v4421_v0 = vcombine.low %v4406_v3, %v4413_v50  ;;  %v3648_v16 = vrot.slane %v3641_v60, %v11724_v7  ;;  %v5272_v50 = vrot.slane %v10300_v33, %v12361_v14 }
 0x21c   : > { %v10947_v13 = vpop.f32.mrf.mxu0  ;;  %v3919_v28 = vrot.slane %v3912_v56, %v11724_v7  ;;  %v3078_v55 = vcombine.high %v12594_v26, %v12594_v26  ;;  %v12656_v26 = vsel %vm4815_vm12, %v12216_v63, %v4054_v25 }
 0x21d   : > { %v2653_v20 = vmax.f32 %v2602_v30, 0.0  ;;  %v4428_v27 = vrot.slane %v4421_v0, %v11724_v7  ;;  %v12618_v45 = vcombine.low %v3648_v16, %v3655_v17  ;;  %v5907_v56 = vcombine.low %v5273_v22, %v5272_v50 }
 0x21e   : > { %v3920_v29 = vcombine.low %v3648_v16, %v3919_v28 }
 0x21f   : > { %v2669_v36 = vpack.c.bf16 %v2653_v20, %v2652_v11  ;;  %v10271_v42 = vpack.c.bf16 %v2653_v20, %v2653_v20  ;;  %4611 = vrot.lane.b32.xlu1 %v12618_v45, %s11403_s26  ;;  %v12624_v31 = vcombine.low %v4428_v27, %v12616_v5 }
 0x220   : > { %v4028_v4 = vshll.u32 %v3920_v29, 16  ;;  %v4026_v49 = vshrl.u32 %v3920_v29, 16 }
 0x221   : > { %v3086_v51 = vrot.slane %v2669_v36, %v11724_v7  ;;  %v3093_v34 = vrot.slane %v10271_v42, %v11724_v7  ;;  %v5316_v48 = vrot.slane %v12624_v31, %v12361_v14 }
 0x222   : > { %v4030_v3 = vrot.slane %v4028_v4, 1 }
 0x223   : > { %v3094_v41 = vcombine.high %v3086_v51, %v3086_v51  ;;  %v3095_v37 = vcombine.high %v3093_v34, %v3093_v34  ;;  %v3102_v47 = vrot.slane %v3086_v51, %v11724_v7  ;;  %v4598_v21 = vpop.permute.xlu0 %4597  ;;  %v5324_v54 = vcombine.high %v5316_v48, %v5316_v48 }
 0x224   : > { %v12646_v0 = vrot.slane %v3093_v34, %v11724_v7  ;;  %v12650_v13 = vsel %vm4815_vm12, %v12220_v6, %v4598_v21  ;;  %v12652_v16 = vor.u32 %v4030_v3, %v4026_v49 }
 0x225   : > { %v3116_v60 = vrot.slane %v3094_v41, %v11724_v7  ;;  %v12643_v53 = vrot.slane %v3095_v37, %v11724_v7  ;;  %v3124_v30 = vcombine.high %v3102_v47, %v3102_v47  ;;  %v3657_v20 = vcombine.low %v3078_v55, %v3102_v47 }
 0x226   : > { %v2606_v17 = vpop.f32.mrf.mxu0  ;;  %v5908_v27 = vcombine.low %v5316_v48, %v5324_v54  ;;  %4069 = vrot.lane.b32.xlu1 %v12652_v16, %s11403_s26  ;;  %v4968_v51 = vcombine.low %v12656_v26, %v12650_v13  ;;  %v4969_v63 = vcombine.high %v12656_v26, %v12650_v13 }
 0x227   : > { %v3126_v11 = vcombine.high %v3116_v60, %v3116_v60  ;;  %v3658_v28 = vcombine.low %v3116_v60, %v3124_v30  ;;  %v4437_v36 = vcombine.low %v3102_v47, %v3116_v60  ;;  %v10290_v42 = vcombine.high %v3102_v47, %v3116_v60 }
 0x228   : > { %v4439_v29 = vcombine.low %v12646_v0, %v12643_v53  ;;  %v10950_v6 = vpop.f32.mrf.mxu0  ;;  %v2607_v25 = vadd.f32 %v12604_v46, %v2606_v17  ;;  %v3927_v41 = vrot.slane %v12643_v53, %v11724_v7  ;;  %v5915_v47 = vrot.slane %v5907_v56, %v12361_v14 }
 0x229   : > { %v3659_v33 = vcombine.low %v3126_v11, %v12646_v0  ;;  %v4446_v34 = vrot.slane %v4437_v36, %v11724_v7  ;;  %v4453_v35 = vrot.slane %v10290_v42, %v11724_v7  ;;  %v3666_v21 = vrot.slane %v3657_v20, %v11724_v7 }
 0x22a   : > { %v4460_v4 = vrot.slane %v4439_v29, %v11724_v7  ;;  %v2609_v22 = vpop.f32.mrf.mxu0  ;;  %v5922_v50 = vrot.slane %v5908_v27, %v12361_v14  ;;  %v3673_v54 = vrot.slane %v3658_v28, %v11724_v7  ;;  %v2654_v55 = vmax.f32 %v2607_v25, 0.0 }
 0x22b   : > { %v12672_v48 = vrot.slane %v3659_v33, %v11724_v7  ;;  %v2610_v37 = vadd.f32 %v12604_v46, %v2609_v22  ;;  %v4461_v49 = vcombine.low %v4446_v34, %v4453_v35  ;;  %v4056_v42 = vpop.permute.xlu1 %4055  ;;  %v10301_v27 = vcombine.low %v12616_v5, %v12616_v5 }
 0x22c   : > { %v10951_v3 = vpop.f32.mrf.mxu0  ;;  %v4475_v17 = vrot.slane %v4460_v4, %v11724_v7  ;;  %v5923_v26 = vcombine.low %v5915_v47, %v5922_v50  ;;  %v3681_v11 = vcombine.low %v3666_v21, %v3673_v54  ;;  %v4978_v35 = vrot.slane %v4968_v51, %v12361_v14 }
 0x22d   : > { %v2655_v60 = vmax.f32 %v2610_v37, 0.0  ;;  %v3928_v30 = vcombine.low %v12672_v48, %v3927_v41  ;;  %v4468_v13 = vrot.slane %v4461_v49, %v11724_v7  ;;  %v10282_v4 = vcombine.high %v12646_v0, %v12643_v53 }
 0x22e   : > { %10989 = vmatmul.mubr.msk.bf16.gmra.mxu0 %vm4815_vm12, %v5923_v26  ;;  %v12691_v28 = vrot.slane %v3681_v11, %v11724_v7  ;;  %v10302_v34 = vcombine.low %v4475_v17, %v4475_v17  ;;  %v3127_v22 = vcombine.high %v12643_v53, %v12643_v53  ;;  %v5323_v47 = vrot.slane %v10301_v27, %v12361_v14 }
 0x22f   : > { %v2670_v36 = vpack.c.bf16 %v2655_v60, %v2654_v55  ;;  %v10272_v56 = vpack.c.bf16 %v2655_v60, %v2655_v60  ;;  %v3935_v20 = vrot.slane %v3928_v30, %v11724_v7  ;;  %v12687_v29 = vcombine.low %v4468_v13, %v4475_v17  ;;  %10992 = vmatprep.mubr.msk.bf16.mxu0 %vm11401_vm2, %v14701_v39 }
 0x230   : > { %v12717_v0 = vsel %vm4815_vm12, %v12270_v61, %v4056_v42  ;;  %v4985_v55 = vrot.slane %v4969_v63, %v12361_v14  ;;  %v5374_v13 = vrot.slane %v10302_v34, %v12361_v14  ;;  %v5669_v17 = vrot.slane %v4978_v35, %v12361_v14 }
 0x231   : > { %v3135_v6 = vrot.slane %v2670_v36, %v11724_v7  ;;  %v3142_v33 = vrot.slane %v10272_v56, %v11724_v7  ;;  %v3936_v25 = vcombine.low %v12691_v28, %v3935_v20  ;;  %v5367_v5 = vrot.slane %v12687_v29, %v12361_v14 }
 0x232   : > { %v3695_v36 = vrot.slane %v12672_v48, %v11724_v7  ;;  %v3706_v61 = vrot.slane %v10282_v4, %v11724_v7 }
 0x233   : > { %v3143_v41 = vcombine.high %v3135_v6, %v3135_v6  ;;  %v4600_v37 = vpop.permute.xlu1 %4599  ;;  %v3144_v21 = vcombine.high %v3142_v33, %v3142_v33  ;;  %v3151_v49 = vrot.slane %v3135_v6, %v11724_v7  ;;  %v12708_v3 = vrot.slane %v3142_v33, %v11724_v7 }
 0x234   : > { %v12712_v50 = vsel %vm4815_vm12, %v12283_v9, %v4600_v37  ;;  %v4035_v53 = vshll.u32 %v3936_v25, 16  ;;  %v5375_v54 = vcombine.high %v5367_v5, %v5367_v5  ;;  %v4033_v11 = vshrl.u32 %v3936_v25, 16 }
 0x235   : > { %v3165_v51 = vrot.slane %v3143_v41, %v11724_v7  ;;  %v5019_v60 = vcombine.low %v12717_v0, %v12712_v50  ;;  %v12728_v56 = vrot.slane %v3144_v21, %v11724_v7  ;;  %v3173_v42 = vcombine.high %v3151_v49, %v3151_v49 }
 0x236   : > { %v2614_v30 = vpop.f32.mrf.mxu0  ;;  %v4037_v33 = vrot.slane %v4035_v53, 1  ;;  %v5960_v25 = vcombine.low %v5323_v47, %v5367_v5  ;;  %v5961_v34 = vcombine.low %v5375_v54, %v5374_v13  ;;  %v3943_v48 = vrot.slane %v12708_v3, %v11724_v7 }
 0x237   : > { %v3698_v26 = vcombine.low %v3151_v49, %v3165_v51  ;;  %v12733_v20 = vrot.slane %v5019_v60, %v12361_v14  ;;  %v2615_v6 = vadd.f32 %v12604_v46, %v2614_v30  ;;  %v10283_v41 = vcombine.high %v3151_v49, %v3165_v51 }
 0x238   : > { %v10954_v27 = vpop.f32.mrf.mxu0  ;;  %v4477_v21 = vcombine.low %v3127_v22, %v3151_v49  ;;  %v12740_v63 = vor.u32 %v4037_v33, %v4033_v11  ;;  %v5975_v53 = vrot.slane %v5961_v34, %v12361_v14  ;;  %v3175_v22 = vcombine.high %v3165_v51, %v3165_v51  ;;  %v11117_v34 = vld [vmem:[%s14668_s3 + $0xb8] sm:$0xff]  }
 0x239   : > { %v10308_v4 = vcombine.low %v4985_v55, %v12733_v20  ;;  %v3713_v37 = vrot.slane %v3698_v26, %v11724_v7  ;;  %v5968_v27 = vrot.slane %v5960_v25, %v12361_v14  ;;  %v3720_v54 = vrot.slane %v10283_v41, %v11724_v7 }
 0x23a   : > { %v2617_v35 = vpop.f32.mrf.mxu0  ;;  %14737 = vst [vmem:[#allocation14_spill] sm:$0xff] %v12740_v63  ;;  %v2656_v13 = vmax.f32 %v2615_v6, 0.0  ;;  %4071 = vrot.lane.b32.xlu0 %v12740_v63, %s11403_s26  ;;  %v4478_v49 = vcombine.low %v3165_v51, %v3173_v42  ;;  %v4479_v51 = vcombine.low %v3175_v22, %v12708_v3  ;;  %v4486_v42 = vrot.slane %v4477_v21, %v11724_v7 }
 0x23b   : > { %v2618_v60 = vadd.f32 %v12604_v46, %v2617_v35  ;;  %v5683_v47 = vrot.slane %v10308_v4, %v12361_v14  ;;  %v3721_v30 = vcombine.low %v3706_v61, %v3713_v37  ;;  %v5976_v26 = vcombine.low %v5968_v27, %v5975_v53  ;;  %v4687_v35 = vpop.permute.xlu1 %4686  ;;  %v11118_v37 = vld [vmem:[%s14668_s3 + $0xf0] sm:$0xff]  }
 0x23c   : > { %v10955_v5 = vpop.f32.mrf.mxu0  ;;  %v3735_v61 = vrot.slane %v3720_v54, %v11724_v7  ;;  %v3944_v6 = vcombine.low %v3720_v54, %v3943_v48  ;;  %v4500_v53 = vrot.slane %v4479_v51, %v11724_v7  ;;  %v11121_v51 = vld [vmem:[%s14668_s3 + $0xa8] sm:$0xff]  }
 0x23d   : > { %v2657_v55 = vmax.f32 %v2618_v60, 0.0  ;;  %v5692_v11 = vcombine.high %v5669_v17, %v5683_v47  ;;  %v5691_v33 = vcombine.low %v5669_v17, %v5683_v47  ;;  %v3728_v25 = vrot.slane %v3721_v30, %v11724_v7  ;;  %10993 = vmatmul.mubr.msk.bf16.gmra.mxu0 %vm4815_vm12, %v5976_v26  ;;  %v11119_v47 = vld [vmem:[%s14668_s3 + $0xb0] sm:$0xff]  }
 0x23e   : > { %v4493_v17 = vrot.slane %v4478_v49, %v11724_v7  ;;  %4698 = vrot.lane.b32.xlu0 %v12624_v31, %s11403_s26  ;;  %v3951_v21 = vrot.slane %v3944_v6, %v11724_v7  ;;  %10996 = vmatprep.mubr.msk.bf16.mxu0 %vm11401_vm2, %v14701_v39  ;;  %v11120_v49 = vld [vmem:[%s14668_s3 + $0xe8] sm:$0xff]   ;;  %v10291_v26 = vcombine.high %v12708_v3, %v12728_v56 }
 0x23f   : > { %v2671_v4 = vpack.c.bf16 %v2657_v55, %v2656_v13  ;;  %v10273_v41 = vpack.c.bf16 %v2657_v55, %v2657_v55  ;;  %6447 = vmatprep.mubr.bf16.mxu1 %v5692_v11  ;;  %v12765_v48 = vcombine.low %v3728_v25, %v3735_v61  ;;  %v12776_v55 = vcombine.low %v12691_v28, %v3695_v36 }
 0x240   : > { %6448 = vmatmul.mubr.bf16.vlgmr.msra.gmra.mxu1 %v5691_v33  ;;  %v4501_v5 = vcombine.low %v4486_v42, %v4493_v17  ;;  %v5020_v11 = vcombine.high %v12717_v0, %v12712_v50  ;;  %v3176_v28 = vcombine.high %v12728_v56, %v12728_v56  ;;  %v14739_v36 = vcombine.high %v12708_v3, %v12708_v3  ;;  %v4058_v50 = vpop.permute.xlu0 %4057 }
 0x241   : > { %v3184_v60 = vrot.slane %v2671_v4, %v11724_v7  ;;  %v3191_v27 = vrot.slane %v10273_v41, %v11724_v7  ;;  %14738 = vst [vmem:[#allocation15_spill] sm:$0xff] %v12765_v48  ;;  %10658 = vmatpush3.bf16.msra.mxu1 %v11117_v34  ;;  %4615 = vrot.lane.b32.xlu1 %v12765_v48, %s11403_s26 }
 0x242   : > { %v4602_v22 = vpop.permute.xlu1 %4601  ;;  %v4508_v33 = vrot.slane %v4501_v5, %v11724_v7  ;;  %v12789_v34 = vrot.slane %v4500_v53, %v11724_v7  ;;  %10659 = vmatprep.subr.bf16.mxu1 %v11118_v37  ;;  %v3737_v4 = vcombine.low %v12728_v56, %v14739_v36  ;;  %4613 = vrot.lane.b32.xlu0 %v12776_v55, %s11403_s26 }
 0x243   : > { %v3192_v54 = vcombine.high %v3184_v60, %v3184_v60  ;;  %v3193_v30 = vcombine.high %v3191_v27, %v3191_v27  ;;  %v3200_v13 = vrot.slane %v3184_v60, %v11724_v7  ;;  %v12798_v41 = vrot.slane %v3191_v27, %v11724_v7 }
 0x244   : > { %v12808_v6 = vsel %vm4815_vm12, %v12354_v23, %v4602_v22  ;;  %v12811_v3 = vcombine.low %v4508_v33, %v12789_v34  ;;  %v3952_v56 = vcombine.low %v3728_v25, %v3951_v21  ;;  %v4526_v27 = vrot.slane %v10291_v26, %v11724_v7  ;;  %v11123_v26 = vld [vmem:[%s14668_s3 + $0xa0] sm:$0xff]  }
 0x245   : > { %v3214_v61 = vrot.slane %v3192_v54, %v11724_v7  ;;  %v12804_v0 = vrot.slane %v3193_v30, %v11724_v7  ;;  %10660 = vmatpush3.bf16.msra.mxu1 %v11119_v47  ;;  %v3222_v42 = vcombine.high %v3200_v13, %v3200_v13  ;;  %v3738_v17 = vcombine.low %v3176_v28, %v3200_v13 }
 0x246   : > { %10661 = vmatprep.subr.bf16.mxu1 %v11120_v49  ;;  %v12818_v53 = vrot.slane %v5020_v11, %v12361_v14  ;;  %v4893_v23 = vsel %vm4815_vm12, %v12363_v43, %v4687_v35  ;;  %4702 = vrot.lane.b32.xlu1 %v12811_v3, %s11403_s26  ;;  %v12826_v21 = vsel %vm4815_vm12, %v12336_v62, %v4058_v50  ;;  %v4042_v35 = vshll.u32 %v3952_v56, 16  ;;  %v11122_v62 = vld [vmem:[%s14668_s3 + $0xe0] sm:$0xff]  }
 0x247   : > { %v4518_v37 = vcombine.low %v3200_v13, %v3214_v61  ;;  %v10292_v60 = vcombine.high %v3200_v13, %v3214_v61  ;;  %v3224_v5 = vcombine.high %v3214_v61, %v3214_v61  ;;  %v3223_v47 = vcombine.high %v12798_v41, %v12798_v41 }
 0x248   : > { %14740 = vst [vmem:[#allocation16_spill] sm:$0xff] %v12818_v53  ;;  %v2622_v25 = vpop.f32.mrf.mxu0  ;;  %v3746_v30 = vrot.slane %v3737_v4, %v11724_v7  ;;  %v5070_v43 = vcombine.low %v12826_v21, %v12808_v6  ;;  %v3739_v28 = vcombine.low %v3214_v61, %v3222_v42  ;;  %v3753_v36 = vrot.slane %v3738_v17, %v11724_v7 }
 0x249   : > { %v4533_v54 = vrot.slane %v4518_v37, %v11724_v7  ;;  %v2623_v22 = vadd.f32 %v12604_v46, %v2622_v25  ;;  %10662 = vmatpush3.bf16.msra.mxu1 %v11121_v51  ;;  %v4540_v11 = vrot.slane %v10292_v60, %v11724_v7  ;;  %v4040_v4 = vshrl.u32 %v3952_v56, 16 }
 0x24a   : > { %v10958_v49 = vpop.f32.mrf.mxu0  ;;  %v4044_v50 = vrot.slane %v4042_v35, 1  ;;  %v4060_v25 = vpop.permute.xlu0 %4059  ;;  %v3959_v51 = vrot.slane %v3224_v5, %v11724_v7  ;;  %10663 = vmatprep.subr.bf16.mxu1 %v11122_v62  ;;  %v3760_v60 = vrot.slane %v3739_v28, %v11724_v7 }
 0x24b   : > { %v4541_v33 = vcombine.low %v4526_v27, %v4533_v54  ;;  %v2658_v37 = vmax.f32 %v2623_v22, 0.0  ;;  %v12848_v39 = vsel %vm4815_vm12, %v12391_v15, %v4060_v25  ;;  %v3761_v27 = vcombine.low %v3746_v30, %v3753_v36 }
 0x24c   : > { %v2625_v49 = vpop.f32.mrf.mxu0  ;;  %v12852_v61 = vor.u32 %v4044_v50, %v4040_v4  ;;  %v5021_v56 = vcombine.low %v4893_v23, %v12848_v39  ;;  %v5022_v42 = vcombine.high %v4893_v23, %v12848_v39  ;;  %v3775_v15 = vrot.slane %v3760_v60, %v11724_v7 }
 0x24d   : > { %v2626_v13 = vadd.f32 %v12604_v46, %v2625_v49  ;;  %v4548_v54 = vrot.slane %v4541_v33, %v11724_v7  ;;  %10664 = vmatpush3.bf16.msra.mxu1 %v11123_v26  ;;  %v3768_v35 = vrot.slane %v3761_v27, %v11724_v7  ;;  %v3960_v22 = vcombine.low %v3760_v60, %v3959_v51 }
 0x24e   : > { %v10959_v17 = vpop.f32.mrf.mxu0  ;;  %v12860_v62 = vrot.slane %v4540_v11, %v11724_v7  ;;  %v5418_v30 = vrot.slane %v12811_v3, %v12361_v14  ;;  %4073 = vrot.lane.b32.xlu0 %v12852_v61, %s11403_s26  ;;  %v12867_v23 = vrot.slane %v5021_v56, %v12361_v14  ;;  %v12870_v26 = vrot.slane %v5022_v42, %v12361_v14 }
 0x24f   : > { %v2659_v5 = vmax.f32 %v2626_v13, 0.0  ;;  %v12872_v36 = vcombine.low %v3768_v35, %v3775_v15  ;;  %v5080_v4 = vrot.slane %v5070_v43, %v12361_v14  ;;  %v10303_v50 = vcombine.low %v12789_v34, %v12789_v34 }
 0x250   : > { %14741 = vst [vmem:[#allocation17_spill] sm:$0xff] %v12867_v23  ;;  %14742 = vst [vmem:[#allocation18_spill] sm:$0xff] %v12870_v26  ;;  %v2630_v13 = vpop.f32.mrf.mxu0  ;;  %v3967_v51 = vrot.slane %v3960_v22, %v11724_v7  ;;  %v12889_v43 = vcombine.low %v12804_v0, %v3223_v47  ;;  %v5052_v42 = vcombine.high %v12733_v20, %v12867_v23 }
 0x251   : > { %v2672_v33 = vpack.c.bf16 %v2659_v5, %v2658_v37  ;;  %v10274_v28 = vpack.c.bf16 %v2659_v5, %v2659_v5  ;;  %14743 = vst [vmem:[#allocation19_spill] sm:$0xff] %v12872_v36  ;;  %v2631_v11 = vadd.f32 %v12604_v46, %v2630_v13  ;;  %4617 = vrot.lane.b32.xlu1 %v12872_v36, %s11403_s26 }
 0x252   : > { %v10962_v49 = vpop.f32.mrf.mxu0  ;;  %v12886_v46 = vcombine.low %v4548_v54, %v12860_v62  ;;  %v3968_v56 = vcombine.low %v3768_v35, %v3967_v51  ;;  %v5426_v17 = vcombine.high %v5418_v30, %v5418_v30  ;;  %v10293_v54 = vcombine.high %v12798_v41, %v12804_v0 }
 0x253   : > { %v3233_v60 = vrot.slane %v2672_v33, %v11724_v7  ;;  %v3240_v37 = vrot.slane %v10274_v28, %v11724_v7  ;;  %v2660_v27 = vmax.f32 %v2631_v11, 0.0  ;;  %v3225_v47 = vcombine.high %v12804_v0, %v12804_v0 }
 0x254   : > { %v2633_v34 = vpop.f32.mrf.mxu0  ;;  %v5736_v35 = vrot.slane %v5080_v4, %v12361_v14  ;;  %v5425_v49 = vrot.slane %v10303_v50, %v12361_v14  ;;  %v12907_v51 = vrot.slane %v12886_v46, %v12361_v14  ;;  %v10310_v25 = vcombine.low %v5052_v42, %v12818_v53  ;;  %v11124_v4 = vld [vmem:[%s14668_s3 + $0xd8] sm:$0xff]  }
 0x255   : > { %v3241_v5 = vcombine.high %v3233_v60, %v3233_v60  ;;  %v3242_v15 = vcombine.high %v3240_v37, %v3240_v37  ;;  %v12894_v22 = vrot.slane %v3233_v60, %v11724_v7  ;;  %v3256_v13 = vrot.slane %v3240_v37, %v11724_v7  ;;  %v4604_v37 = vpop.permute.xlu1 %4603  ;;  %10665 = vmatprep.subr.bf16.mxu1 %v11124_v4 }
 0x256   : > { %v2673_v33 = vpack.c.bf16 %v2660_v27, %v2660_v27  ;;  %v10963_v28 = vpop.f32.mrf.mxu0  ;;  %v4049_v34 = vshll.u32 %v3968_v56, 16  ;;  %v6013_v27 = vcombine.low %v5418_v30, %v5426_v17  ;;  %v12926_v53 = vsel %vm4815_vm12, %v12389_v8, %v4604_v37 }
 0x257   : > { %v3263_v20 = vrot.slane %v3241_v5, %v11724_v7  ;;  %v3270_v11 = vrot.slane %v3242_v15, %v11724_v7  ;;  %v11125_v5 = vld [vmem:[%s14668_s3 + $0x98] sm:$0xff]   ;;  %v3271_v50 = vcombine.high %v12894_v22, %v12894_v22  ;;  %v3272_v15 = vcombine.high %v3256_v13, %v3256_v13 }
 0x258   : > { %v3281_v60 = vrot.slane %v2673_v33, %v11724_v7  ;;  %v4653_v33 = vrot.slane %v12889_v43, %v11724_v7  ;;  %v4047_v40 = vshrl.u32 %v3968_v56, 16  ;;  %10666 = vmatpush3.bf16.msra.mxu1 %v11125_v5  ;;  %v4051_v63 = vrot.slane %v4049_v34, 1 }
 0x259   : > { %v3273_v28 = vcombine.high %v3263_v20, %v3263_v20  ;;  %v4775_v38 = vcombine.low %v3256_v13, %v3270_v11  ;;  %v10294_v1 = vcombine.high %v3256_v13, %v3270_v11  ;;  %v3274_v42 = vcombine.high %v3270_v11, %v3270_v11 }
 0x25a   : > { %v3282_v30 = vcombine.high %v3281_v60, %v3281_v60  ;;  %v3289_v26 = vrot.slane %v3281_v60, %v11724_v7  ;;  %v4559_v12 = vcombine.low %v12894_v22, %v3263_v20  ;;  %v5722_v60 = vrot.slane %v10310_v25, %v12361_v14 }
 0x25b   : > { %v12921_v17 = vcombine.low %v3273_v28, %v3256_v13  ;;  %v4784_v58 = vrot.slane %v4775_v38, %v11724_v7  ;;  %v4791_v23 = vrot.slane %v10294_v1, %v11724_v7  ;;  %v4645_v13 = vcombine.low %v3225_v47, %v12894_v22 }
 0x25c   : > { %v3296_v43 = vrot.slane %v3282_v30, %v11724_v7  ;;  %v4710_v4 = vcombine.low %v3274_v42, %v3289_v26  ;;  %v4627_v28 = vrot.slane %v3271_v50, %v11724_v7  ;;  %v4709_v37 = vcombine.low %v3270_v11, %v3272_v15 }
 0x25d   : > { %v12935_v56 = vor.u32 %v4051_v63, %v4047_v40  ;;  %v4799_v5 = vcombine.low %v4784_v58, %v4791_v23  ;;  %v5745_v38 = vcombine.high %v5722_v60, %v5736_v35  ;;  %v5744_v48 = vcombine.low %v5722_v60, %v5736_v35 }
 0x25e   : > { %v4777_v36 = vcombine.low %v3289_v26, %v3296_v43  ;;  %v6014_v1 = vcombine.low %v5425_v49, %v12907_v51  ;;  %v4717_v34 = vrot.slane %v12921_v17, %v11724_v7  ;;  %v12941_v30 = vrot.slane %v4710_v4, %v11724_v7 }
 0x25f   : > { %v4754_v22 = vrot.slane %v3296_v43, %v11724_v7  ;;  %4075 = vrot.lane.b32.xlu0 %v12935_v56, %s11403_s26  ;;  %6455 = vmatprep.mubr.bf16.mxu1 %v5745_v38  ;;  %v6021_v58 = vrot.slane %v6013_v27, %v12361_v14  ;;  %v4646_v63 = vcombine.low %v3263_v20, %v3271_v50  ;;  %v11127_v43 = vld [vmem:[%s14668_s3 + $0x90] sm:$0xff]   ;;  %v14745_v60 = vmov 0.0  }
 0x260   : > { %v4798_v25 = vrot.slane %v4777_v36, %v11724_v7  ;;  %v6028_v40 = vrot.slane %v6014_v1, %v12361_v14  ;;  %v4660_v23 = vrot.slane %v4645_v13, %v11724_v7  ;;  %6456 = vmatmul.mubr.bf16.gmra.mxu1 %v5744_v48  ;;  %v14744_v47 = vcombine.low %v12798_v41, %v12804_v0 }
 0x261   : > { %v4573_v36 = vrot.slane %v10293_v54, %v11724_v7  ;;  %v4580_v11 = vrot.slane %v4559_v12, %v11724_v7  ;;  %v4806_v49 = vrot.slane %v4799_v5, %v11724_v7  ;;  %v4667_v15 = vrot.slane %v4646_v63, %v11724_v7 }
 0x262   : > { %v4813_v26 = vrot.slane %v4798_v25, %v11724_v7  ;;  %v4566_v35 = vrot.slane %v14744_v47, %v11724_v7  ;;  %v6029_v27 = vcombine.low %v6021_v58, %v6028_v40  ;;  %v4668_v20 = vcombine.low %v4653_v33, %v4660_v23  ;;  %v11126_v33 = vld [vmem:[%s14668_s3 + $0xd0] sm:$0xff]  }
 0x263   : > { %v4755_v50 = vcombine.low %v12941_v30, %v4754_v22  ;;  %v4595_v48 = vrot.slane %v4580_v11, %v11724_v7  ;;  %v10304_v17 = vcombine.low %v12860_v62, %v12860_v62  ;;  %v4682_v12 = vrot.slane %v4667_v15, %v11724_v7  ;;  %v12974_v62 = vpop.permute.xlu1 %4061  ;;  %10667 = vmatprep.subr.bf16.mxu1 %v11126_v33 }
 0x264   : > { %v4581_v42 = vcombine.low %v4566_v35, %v4573_v36  ;;  %v4814_v41 = vcombine.low %v4806_v49, %v4813_v26  ;;  %10997 = vmatmul.mubr.msk.bf16.gmra.mxu0 %vm4815_vm12, %v6029_v27  ;;  %v4675_v0 = vrot.slane %v4668_v20, %v11724_v7  ;;  %v4628_v54 = vcombine.low %v4580_v11, %v4627_v28 }
 0x265   : > { %v5071_v13 = vcombine.high %v12826_v21, %v12808_v6  ;;  %11000 = vmatprep.mubr.msk.bf16.mxu0 %vm11401_vm2, %v14745_v60  ;;  %v5477_v28 = vcombine.high %v12907_v51, %v12907_v51  ;;  %v4724_v5 = vrot.slane %v4709_v37, %v11724_v7  ;;  %v5121_v38 = vcombine.low %v12848_v39, %v12926_v53 }
 0x266   : > { %v4588_v4 = vrot.slane %v4581_v42, %v11724_v7  ;;  %v5122_v1 = vcombine.high %v12848_v39, %v12926_v53  ;;  %v4683_v22 = vcombine.low %v4675_v0, %v4682_v12  ;;  %v4635_v6 = vrot.slane %v4628_v54, %v11724_v7  ;;  %10668 = vmatpush3.bf16.msra.mxu1 %v11127_v43 }
 0x267   : > { %v5476_v58 = vrot.slane %v10304_v17, %v12361_v14  ;;  %v4732_v40 = vcombine.low %v4717_v34, %v4724_v5  ;;  %v4762_v63 = vrot.slane %v4755_v50, %v11724_v7  ;;  %v12994_v37 = vrot.slane %v4814_v41, %v12361_v14  ;;  %v4608_v53 = vpop.permute.xlu1 %4607 }
 0x268   : > { %v12987_v25 = vcombine.low %v4588_v4, %v4595_v48  ;;  %4706 = vrot.lane.b32.xlu1 %v4683_v22, %s11403_s26  ;;  %v5520_v51 = vrot.slane %v4683_v22, %v12361_v14  ;;  %v10306_v39 = vcombine.low %v4813_v26, %v4813_v26  ;;  %v4636_v36 = vcombine.low %v4588_v4, %v4635_v6  ;;  %v11128_v48 = vld [vmem:[%s14668_s3 + $0xc8] sm:$0xff]  }
 0x269   : > { %v6066_v47 = vcombine.low %v5477_v28, %v5476_v58  ;;  %v4739_v35 = vrot.slane %v4732_v40, %v11724_v7  ;;  %v5087_v11 = vrot.slane %v5071_v13, %v12361_v14  ;;  %v5131_v49 = vrot.slane %v5121_v38, %v12361_v14  ;;  %10669 = vmatprep.subr.bf16.mxu1 %v11128_v48  ;;  %v11129_v38 = vld [vmem:[%s14668_s3 + $0x88] sm:$0xff]  }
 0x26a   : > { %4619 = vrot.lane.b32.xlu0 %v12987_v25, %s11403_s26  ;;  %v4064_v23 = vpop.permute.xlu0 %4063  ;;  %v5528_v34 = vcombine.high %v5520_v51, %v5520_v51  ;;  %v13002_v27 = vrot.slane %v5122_v1, %v12361_v14  ;;  %v10305_v20 = vcombine.low %v4682_v12, %v4682_v12  ;;  %v13006_v26 = vsel %vm4815_vm12, %v12494_v44, %v4608_v53 }
 0x26b   : > { %v4763_v15 = vcombine.low %v4739_v35, %v4762_v63  ;;  %v5579_v42 = vcombine.high %v12994_v37, %v12994_v37  ;;  %v13017_v17 = vsel %vm4815_vm12, %v12541_v18, %v4064_v23  ;;  %v6074_v41 = vrot.slane %v6066_v47, %v12361_v14  ;;  %10670 = vmatpush3.bf16.msra.mxu1 %v11129_v38 }
 0x26c   : > { %4684 = vrot.lane.b32.xlu1 %v12283_v9, %s11403_s26  ;;  %v6067_v50 = vcombine.low %v5520_v51, %v5528_v34  ;;  %v5578_v54 = vrot.slane %v10306_v39, %v12361_v14  ;;  %v4640_v43 = vshll.u32 %v4636_v36, 16  ;;  %v4746_v13 = vrot.slane %v12941_v30, %v11724_v7 }
 0x26d   : > { %v4767_v0 = vshll.u32 %v4763_v15, 16  ;;  %v4765_v4 = vshrl.u32 %v4763_v15, 16  ;;  %v5223_v30 = vcombine.low %v13017_v17, %v13006_v26  ;;  %v10312_v47 = vcombine.low %v5087_v11, %v5131_v49 }
 0x26e   : > { %v4691_v12 = vpop.permute.xlu0 %4690  ;;  %v6081_v9 = vrot.slane %v6067_v50, %v12361_v14  ;;  %v6120_v22 = vcombine.low %v5579_v42, %v5578_v54  ;;  %v13034_v6 = vcombine.low %v4739_v35, %v4746_v13  ;;  %v4642_v39 = vrot.slane %v4640_v43, 1 }
 0x26f   : > { %v4899_v33 = vsel %vm4815_vm12, %v12460_v57, %v4691_v12  ;;  %v4769_v28 = vrot.slane %v4767_v0, 1  ;;  %v5527_v57 = vrot.slane %v10305_v20, %v12361_v14  ;;  %v5775_v48 = vrot.slane %v10312_v47, %v12361_v14  ;;  %v11130_v0 = vld [vmem:[%s14668_s3 + $0xc0] sm:$0xff]  }
 0x270   : > { %v5123_v18 = vcombine.low %v4899_v33, %v13017_v17  ;;  %v5124_v5 = vcombine.high %v4899_v33, %v13017_v17  ;;  %4692 = vrot.lane.b32.xlu1 %v12494_v44, %s11403_s26  ;;  %v6082_v1 = vcombine.low %v6074_v41, %v6081_v9  ;;  %v13047_v44 = vsel %vm4815_vm12, %v12437_v32, %v12974_v62  ;;  %v11131_v12 = vld [vmem:[%s14668_s3 + $0x80] sm:$0xff]  }
 0x271   : > { %v4770_v58 = vor.u32 %v4769_v28, %v4765_v4  ;;  %v6119_v23 = vcombine.low %v5527_v57, %v12994_v37  ;;  %v4638_v32 = vshrl.u32 %v4636_v36, 16  ;;  %v5233_v37 = vrot.slane %v5223_v30, %v12361_v14  ;;  %10671 = vmatprep.subr.bf16.mxu1 %v11130_v0 }
 0x272   : > { %v13039_v40 = vrot.slane %v5123_v18, %v12361_v14  ;;  %v13042_v63 = vrot.slane %v5124_v5, %v12361_v14  ;;  %v4606_v51 = vpop.permute.xlu0 %4605  ;;  %11001 = vmatmul.mubr.msk.bf16.gmra.mxu0 %vm4815_vm12, %v6082_v1  ;;  %10672 = vmatpush3.bf16.msra.mxu1 %v11131_v12  ;;  %v5224_v1 = vcombine.high %v13017_v17, %v13006_v26 }
 0x273   : > { %v4866_v53 = vsel %vm4815_vm12, %v12441_v2, %v4606_v51  ;;  %4773 = vrot.lane.b32.xlu0 %v4770_v58, %s11403_s26  ;;  %11004 = vmatprep.mubr.msk.bf16.mxu0 %vm11401_vm2, %v14745_v60  ;;  %v6134_v2 = vrot.slane %v6120_v22, %v12361_v14  ;;  %v4695_v11 = vpop.permute.xlu1 %4694  ;;  %v13066_v20 = vor.u32 %v4642_v39, %v4638_v32 }
 0x274   : > { %v5154_v35 = vcombine.high %v5131_v49, %v13039_v40  ;;  %v5155_v34 = vcombine.low %v13002_v27, %v13042_v63  ;;  %v5172_v15 = vcombine.low %v13047_v44, %v4866_v53  ;;  %4700 = vrot.lane.b32.xlu1 %v12687_v29, %s11403_s26  ;;  %v5173_v62 = vcombine.high %v13047_v44, %v4866_v53 }
 0x275   : > { %v6127_v36 = vrot.slane %v6119_v23, %v12361_v14  ;;  %v4905_v22 = vsel %vm4815_vm12, %v12565_v59, %v4695_v11  ;;  %v13104_v51 = vrot.slane %v5224_v1, %v12361_v14 }
 0x276   : > { %v10314_v49 = vcombine.low %v5154_v35, %v13002_v27  ;;  %v5182_v50 = vrot.slane %v5172_v15, %v12361_v14  ;;  %v5189_v42 = vrot.slane %v5173_v62, %v12361_v14 }
 0x277   : > { %4688 = vrot.lane.b32.xlu0 %v12389_v8, %s11403_s26  ;;  %v6135_v9 = vcombine.low %v6127_v36, %v6134_v2  ;;  %v4610_v33 = vpop.permute.xlu1 %4609 }
 0x278   : > { %v5789_v41 = vrot.slane %v10314_v49, %v12361_v14  ;;  %4771 = vrot.lane.b32.xlu1 %v13066_v20, %s11403_s26  ;;  %v10316_v54 = vcombine.low %v5189_v42, %v5233_v37  ;;  %v4066_v43 = vpop.permute.xlu0 %4065  ;;  %v5828_v4 = vrot.slane %v5182_v50, %v12361_v14  ;;  %v4872_v18 = vsel %vm4815_vm12, %v12548_v10, %v4610_v33 }
 0x279   : > { %v13092_v5 = vsel %vm4815_vm12, %v12499_v52, %v4066_v43 }
 0x27a   : > { %v5798_v8 = vcombine.high %v5775_v48, %v5789_v41  ;;  %v5797_v13 = vcombine.low %v5775_v48, %v5789_v41  ;;  %11005 = vmatmul.mubr.msk.bf16.gmra.mxu0 %vm4815_vm12, %v6135_v9  ;;  %v5842_v28 = vrot.slane %v10316_v54, %v12361_v14  ;;  %v5274_v10 = vcombine.low %v13092_v5, %v4872_v18 }
 0x27b   : > { %4696 = vrot.lane.b32.xlu0 %v12561_v24, %s11403_s26  ;;  %v5275_v54 = vcombine.high %v13092_v5, %v4872_v18 }
 0x27c   : > { %6463 = vmatprep.mubr.bf16.mxu1 %v5798_v8  ;;  %v5851_v38 = vcombine.high %v5828_v4, %v5842_v28  ;;  %v5850_v59 = vcombine.low %v5828_v4, %v5842_v28  ;;  %v5284_v39 = vrot.slane %v5274_v10, %v12361_v14 }
 0x27d   : > { %6464 = vmatmul.mubr.bf16.gmra.mxu1 %v5797_v13  ;;  %v5291_v1 = vrot.slane %v5275_v54, %v12361_v14 }
 0x27e   : > { %v4068_v57 = vpop.permute.xlu0 %4067  ;;  %6471 = vmatprep.mubr.bf16.mxu1 %v5851_v38  ;;  %v5895_v35 = vrot.slane %v5284_v39, %v12361_v14 }
 0x27f   : > { %v4839_v30 = vsel %vm4815_vm12, %v12563_v19, %v4068_v57  ;;  %4704 = vrot.lane.b32.xlu0 %v12886_v46, %s11403_s26 }
 0x280   : > { %v5225_v52 = vcombine.low %v4905_v22, %v4839_v30  ;;  %v5226_v58 = vcombine.high %v4905_v22, %v4839_v30 }
 0x282   : > { %v13107_v26 = vrot.slane %v5225_v52, %v12361_v14  ;;  %v13110_v17 = vrot.slane %v5226_v58, %v12361_v14 }
 0x284   : > { %v5257_v19 = vcombine.low %v13104_v51, %v13110_v17  ;;  %v5256_v53 = vcombine.high %v5233_v37, %v13107_v26 }
 0x285   : > { %6472 = vmatmul.mubr.bf16.gmra.mxu1 %v5850_v59 }
 0x286   : > { %v10318_v23 = vcombine.low %v5256_v53, %v13104_v51 }
 0x288   : > { %v5881_v47 = vrot.slane %v10318_v23, %v12361_v14 }
 0x28a   : > { %v5904_v15 = vcombine.high %v5881_v47, %v5895_v35  ;;  %v5903_v32 = vcombine.low %v5881_v47, %v5895_v35 }
 0x28c   : > { %6479 = vmatprep.mubr.bf16.mxu1 %v5904_v15 }
 0x28d   : > { %6480 = vmatmul.mubr.bf16.gmra.mxu1 %v5903_v32 }
 0x291   : > { %v4612_v50 = vpop.permute.xlu1 %4611 }
 0x292   : > { %v4875_v37 = vsel %vm4815_vm12, %v12561_v24, %v4612_v50 }
 0x293   : > { %v5325_v0 = vcombine.low %v4839_v30, %v4875_v37  ;;  %v5326_v33 = vcombine.high %v4839_v30, %v4875_v37 }
 0x295   : > { %v5335_v4 = vrot.slane %v5325_v0, %v12361_v14  ;;  %v5342_v18 = vrot.slane %v5326_v33, %v12361_v14 }
 0x297   : > { %v10320_v52 = vcombine.low %v5291_v1, %v5335_v4 }
 0x298   : > { %v4070_v12 = vpop.permute.xlu1 %4069 }
 0x299   : > { %v13119_v62 = vpop.f32.mrf.mxu0  ;;  %v13147_v58 = vsel %vm4815_vm12, %v12618_v45, %v4070_v12  ;;  %v5934_v45 = vrot.slane %v10320_v52, %v12361_v14 }
 0x29b   : > { %v10974_v2 = vpop.f32.mrf.mxu0 }
 0x29d   : > { %v13121_v11 = vpop.f32.mrf.mxu0 }
 0x29f   : > { %v10975_v49 = vpop.f32.mrf.mxu0 }
 0x2ac   : > { %v13123_v42 = vpop.f32.mrf.mxu0  ;;  %v4072_v48 = vpop.permute.xlu0 %4071 }
 0x2ad   : > { %v4845_v8 = vsel %vm4815_vm12, %v12776_v55, %v4072_v48 }
 0x2ae   : > { %v10978_v36 = vpop.f32.mrf.mxu0 }
 0x2b0   : > { %v13127_v41 = vpop.f32.mrf.mxu0  ;;  %v4699_v43 = vpop.permute.xlu0 %4698 }
 0x2b1   : > { %v4911_v13 = vsel %vm4815_vm12, %v12652_v16, %v4699_v43 }
 0x2b2   : > { %v10979_v9 = vpop.f32.mrf.mxu0  ;;  %v5327_v24 = vcombine.low %v4911_v13, %v4845_v8  ;;  %v5328_v28 = vcombine.high %v4911_v13, %v4845_v8 }
 0x2b3   : > { %v4616_v38 = vpop.permute.xlu1 %4615 }
 0x2b4   : > { %v4881_v57 = vsel %vm4815_vm12, %v12687_v29, %v4616_v38  ;;  %v13140_v22 = vrot.slane %v5327_v24, %v12361_v14  ;;  %v5356_v55 = vrot.slane %v5328_v28, %v12361_v14  ;;  %v4614_v10 = vpop.permute.xlu0 %4613 }
 0x2b5   : > { %v5427_v30 = vcombine.low %v4845_v8, %v4881_v57  ;;  %v4878_v16 = vsel %vm4815_vm12, %v12624_v31, %v4614_v10 }
 0x2b6   : > { %v5358_v59 = vcombine.high %v5335_v4, %v13140_v22  ;;  %v5359_v29 = vcombine.low %v5342_v18, %v5356_v55  ;;  %v5376_v53 = vcombine.low %v13147_v58, %v4878_v16  ;;  %v5377_v23 = vcombine.high %v13147_v58, %v4878_v16  ;;  %v14746_v16 = vld [vmem:[#allocation15_spill] sm:$0xff] }
 0x2b7   : > { %v5437_v39 = vrot.slane %v5427_v30, %v12361_v14 }
 0x2b8   : > { %v10322_v47 = vcombine.low %v5358_v59, %v5342_v18  ;;  %v13154_v35 = vcombine.high %v13140_v22, %v5359_v29  ;;  %v5386_v31 = vrot.slane %v5376_v53, %v12361_v14  ;;  %v5393_v15 = vrot.slane %v5377_v23, %v12361_v14  ;;  %v4703_v43 = vpop.permute.xlu1 %4702  ;;  %v14747_v59 = vld [vmem:[#allocation19_spill] sm:$0xff] }
 0x2b9   : > { %v5428_v18 = vcombine.high %v4845_v8, %v4881_v57  ;;  %v4917_v10 = vsel %vm4815_vm12, %v12852_v61, %v4703_v43 }
 0x2ba   : > { %v5948_v2 = vrot.slane %v10322_v47, %v12361_v14  ;;  %v10324_v49 = vcombine.low %v5393_v15, %v5437_v39  ;;  %v5987_v48 = vrot.slane %v5386_v31, %v12361_v14 }
 0x2bb   : > { %v5444_v31 = vrot.slane %v5428_v18, %v12361_v14 }
 0x2bc   : > { %v13158_v32 = vpop.f32.mrf.mxu0  ;;  %v5957_v37 = vcombine.high %v5934_v45, %v5948_v2  ;;  %v5956_v36 = vcombine.low %v5934_v45, %v5948_v2  ;;  %v6001_v0 = vrot.slane %v10324_v49, %v12361_v14 }
 0x2be   : > { %v10982_v50 = vpop.f32.mrf.mxu0  ;;  %6487 = vmatprep.mubr.bf16.mxu1 %v5957_v37  ;;  %v6010_v54 = vcombine.high %v5987_v48, %v6001_v0  ;;  %v6009_v33 = vcombine.low %v5987_v48, %v6001_v0 }
 0x2bf   : > { %6488 = vmatmul.mubr.bf16.gmra.mxu1 %v5956_v36 }
 0x2c0   : > { %v13164_v12 = vpop.f32.mrf.mxu0  ;;  %6495 = vmatprep.mubr.bf16.mxu1 %v6010_v54  ;;  %v4074_v4 = vpop.permute.xlu0 %4073 }
 0x2c1   : > { %v4848_v52 = vsel %vm4815_vm12, %v14746_v16, %v4074_v4 }
 0x2c2   : > { %v10983_v9 = vpop.f32.mrf.mxu0 }
 0x2c3   : > { %v4618_v24 = vpop.permute.xlu1 %4617 }
 0x2c4   : > { %v4884_v1 = vsel %vm4815_vm12, %v12811_v3, %v4618_v24 }
 0x2c5   : > { %v5478_v53 = vcombine.low %v4848_v52, %v4884_v1 }
 0x2c7   : > { %6496 = vmatmul.mubr.bf16.gmra.mxu1 %v6009_v33  ;;  %v5488_v8 = vrot.slane %v5478_v53, %v12361_v14  ;;  %v14748_v33 = vld [vmem:[#allocation10_spill] sm:$0xff] }
 0x2c9   : > { %v6054_v36 = vrot.slane %v5488_v8, %v12361_v14 }
 0x2cc   : > { %v13166_v13 = vpop.f32.mrf.mxu0 }
 0x2ce   : > { %v10986_v28 = vpop.f32.mrf.mxu0 }
 0x2cf   : > { %v5479_v28 = vcombine.high %v4848_v52, %v4884_v1 }
 0x2d0   : > { %v13168_v38 = vpop.f32.mrf.mxu0 }
 0x2d1   : > { %v4076_v55 = vpop.permute.xlu0 %4075  ;;  %v5495_v53 = vrot.slane %v5479_v28, %v12361_v14 }
 0x2d2   : > { %v10987_v30 = vpop.f32.mrf.mxu0  ;;  %v4851_v29 = vsel %vm4815_vm12, %v14747_v59, %v4076_v55 }
 0x2d3   : > { %v5429_v23 = vcombine.low %v4917_v10, %v4851_v29  ;;  %v5430_v47 = vcombine.high %v4917_v10, %v4851_v29 }
 0x2d5   : > { %v5451_v15 = vrot.slane %v5429_v23, %v12361_v14  ;;  %v5458_v3 = vrot.slane %v5430_v47, %v12361_v14 }
 0x2d7   : > { %v5461_v57 = vcombine.low %v5444_v31, %v5458_v3  ;;  %v5460_v45 = vcombine.high %v5437_v39, %v5451_v15 }
 0x2d9   : > { %v10326_v61 = vcombine.low %v5460_v45, %v5444_v31  ;;  %v13182_v2 = vcombine.high %v5451_v15, %v5461_v57  ;;  %v14749_v31 = vld [vmem:[#allocation14_spill] sm:$0xff] }
 0x2da   : > { %v4707_v49 = vpop.permute.xlu1 %4706 }
 0x2db   : > { %v6040_v37 = vrot.slane %v10326_v61, %v12361_v14  ;;  %v14750_v61 = vld [vmem:[#allocation17_spill] sm:$0xff] }
 0x2dc   : > { %v4620_v50 = vpop.permute.xlu0 %4619 }
 0x2dd   : > { %v6063_v48 = vcombine.high %v6040_v37, %v6054_v36  ;;  %v6062_v0 = vcombine.low %v6040_v37, %v6054_v36  ;;  %v4887_v54 = vsel %vm4815_vm12, %v12886_v46, %v4620_v50  ;;  %v4923_v46 = vsel %vm4815_vm12, %v13066_v20, %v4707_v49 }
 0x2de   : > { %v4685_v9 = vpop.permute.xlu1 %4684  ;;  %v5529_v39 = vcombine.low %v4851_v29, %v4887_v54  ;;  %v5530_v18 = vcombine.high %v4851_v29, %v4887_v54 }
 0x2df   : > { %v4890_v43 = vsel %vm4815_vm12, %v14748_v33, %v4685_v9  ;;  %6503 = vmatprep.mubr.bf16.mxu1 %v6063_v48  ;;  %v10319_v33 = vcombine.high %v13107_v26, %v5257_v19 }
 0x2e0   : > { %6504 = vmatmul.mubr.bf16.gmra.mxu1 %v6062_v0  ;;  %v4971_v4 = vcombine.high %v4890_v43, %v12826_v21  ;;  %v5539_v55 = vrot.slane %v5529_v39, %v12361_v14  ;;  %v5546_v29 = vrot.slane %v5530_v18, %v12361_v14  ;;  %v4970_v3 = vcombine.low %v4890_v43, %v12826_v21  ;;  %v14751_v21 = vld [vmem:[#allocation11_spill] sm:$0xff]  ;;  %v14752_v18 = vld [vmem:[#allocation13_spill] sm:$0xff] }
 0x2e2   : > { %v13191_v24 = vpop.permute.xlu1 %4692  ;;  %v4999_v30 = vrot.slane %v4971_v4, %v12361_v14  ;;  %v10328_v45 = vcombine.low %v5495_v53, %v5539_v55  ;;  %v4992_v54 = vrot.slane %v4970_v3, %v12361_v14 }
 0x2e4   : > { %v10309_v20 = vcombine.low %v4999_v30, %v14750_v61  ;;  %v6093_v4 = vrot.slane %v10328_v45, %v12361_v14  ;;  %v5676_v53 = vrot.slane %v4992_v54, %v12361_v14 }
 0x2e5   : > { %v4774_v10 = vpop.permute.xlu0 %4773 }
 0x2e6   : > { %v4929_v16 = vsel %vm4815_vm12, %v13034_v6, %v4774_v10  ;;  %v4701_v59 = vpop.permute.xlu1 %4700  ;;  %v5690_v28 = vrot.slane %v10309_v20, %v12361_v14 }
 0x2e7   : > { %v5531_v23 = vcombine.low %v4923_v46, %v4929_v16  ;;  %v5532_v47 = vcombine.high %v4923_v46, %v4929_v16  ;;  %v4914_v1 = vsel %vm4815_vm12, %v14749_v31, %v4701_v59 }
 0x2e8   : > { %v5378_v8 = vcombine.low %v4914_v1, %v4848_v52  ;;  %v5379_v57 = vcombine.high %v4914_v1, %v4848_v52 }
 0x2e9   : > { %v5553_v49 = vrot.slane %v5531_v23, %v12361_v14  ;;  %v5560_v6 = vrot.slane %v5532_v47, %v12361_v14  ;;  %v4689_v50 = vpop.permute.xlu0 %4688  ;;  %v13234_v23 = vrot.slane %v10319_v33, %v12361_v14 }
 0x2ea   : > { %v5400_v37 = vrot.slane %v5378_v8, %v12361_v14  ;;  %v5407_v36 = vrot.slane %v5379_v57, %v12361_v14  ;;  %v4896_v52 = vsel %vm4815_vm12, %v14751_v21, %v4689_v50  ;;  %v4772_v17 = vpop.permute.xlu1 %4771  ;;  %v5694_v50 = vcombine.high %v5676_v53, %v5690_v28 }
 0x2eb   : > { %v5562_v48 = vcombine.high %v5539_v55, %v5553_v49  ;;  %v5563_v0 = vcombine.low %v5546_v29, %v5560_v6  ;;  %v5072_v51 = vcombine.low %v4896_v52, %v13047_v44  ;;  %v5073_v45 = vcombine.high %v4896_v52, %v13047_v44 }
 0x2ec   : > { %v10325_v9 = vcombine.low %v5407_v36, %v5451_v15  ;;  %v13221_v30 = vrot.slane %v5400_v37, %v12361_v14  ;;  %v13245_v20 = vsel %vm4815_vm12, %v12987_v25, %v4772_v17 }
 0x2ed   : > { %v4697_v43 = vpop.permute.xlu0 %4696  ;;  %v10330_v39 = vcombine.low %v5562_v48, %v5546_v29  ;;  %v10331_v10 = vcombine.high %v5553_v49, %v5563_v0  ;;  %v5094_v37 = vrot.slane %v5072_v51, %v12361_v14 }
 0x2ee   : > { %v4908_v55 = vsel %vm4815_vm12, %v14752_v18, %v4697_v43  ;;  %v13224_v15 = vrot.slane %v10325_v9, %v12361_v14  ;;  %v13230_v59 = vpop.f32.mrf.mxu0  ;;  %v14754_v9 = vld [vmem:[#allocation18_spill] sm:$0xff] }
 0x2ef   : > { %v5276_v19 = vcombine.low %v4908_v55, %v13147_v58  ;;  %v5277_v46 = vcombine.high %v4908_v55, %v13147_v58  ;;  %v6107_v16 = vrot.slane %v10330_v39, %v12361_v14  ;;  %v5955_v39 = vrot.slane %v13154_v35, %v12361_v14 }
 0x2f0   : > { %v6012_v47 = vcombine.high %v13221_v30, %v13224_v15  ;;  %v6011_v31 = vcombine.low %v13221_v30, %v13224_v15  ;;  %v10990_v57 = vpop.f32.mrf.mxu0  ;;  %v5101_v55 = vrot.slane %v5073_v45, %v12361_v14  ;;  %v5743_v17 = vrot.slane %v5094_v37, %v12361_v14 }
 0x2f1   : > { %v5298_v1 = vrot.slane %v5276_v19, %v12361_v14  ;;  %v5305_v29 = vrot.slane %v5277_v46, %v12361_v14  ;;  %v4705_v58 = vpop.permute.xlu0 %4704  ;;  %v6116_v3 = vcombine.high %v6093_v4, %v6107_v16  ;;  %v6115_v8 = vcombine.low %v6093_v4, %v6107_v16  ;;  %v14756_v4 = vld [vmem:[#allocation12_spill] sm:$0xff] }
 0x2f2   : > { %v13249_v6 = vsel %vm4815_vm12, %v12935_v56, %v4705_v58  ;;  %v13255_v0 = vpop.f32.mrf.mxu0  ;;  %v14753_v56 = vld [vmem:[#allocation16_spill] sm:$0xff]  ;;  %v4902_v18 = vsel %vm4815_vm12, %v14756_v4, %v13191_v24  ;;  %v10313_v24 = vcombine.low %v5101_v55, %v13039_v40 }
 0x2f3   : > { %v10321_v36 = vcombine.low %v5305_v29, %v13140_v22  ;;  %v5481_v48 = vcombine.high %v13249_v6, %v13245_v20  ;;  %6511 = vmatprep.mubr.bf16.mxu1 %v6116_v3  ;;  %v5902_v44 = vrot.slane %v5298_v1, %v12361_v14  ;;  %v14755_v21 = vcombine.low %v14753_v56, %v14754_v9 }
 0x2f4   : > { %6512 = vmatmul.mubr.bf16.gmra.mxu1 %v6115_v8  ;;  %v10991_v54 = vpop.f32.mrf.mxu0  ;;  %v5175_v35 = vcombine.high %v4902_v18, %v13092_v5  ;;  %v5693_v1 = vcombine.low %v5676_v53, %v5690_v28  ;;  %v5782_v28 = vrot.slane %v10313_v24, %v12361_v14  ;;  %v5174_v57 = vcombine.low %v4902_v18, %v13092_v5 }
 0x2f5   : > { %v5509_v25 = vrot.slane %v5481_v48, %v12361_v14  ;;  %6552 = vmatprep.mubr.bf16.mxu1 %v5694_v50  ;;  %v10311_v52 = vcombine.high %v14750_v61, %v14755_v21  ;;  %v5906_v22 = vcombine.high %v13234_v23, %v5902_v44  ;;  %v5905_v33 = vcombine.low %v13234_v23, %v5902_v44 }
 0x2f6   : > { %v5941_v43 = vrot.slane %v10321_v36, %v12361_v14  ;;  %v13278_v23 = vrot.slane %v10331_v10, %v12361_v14  ;;  %v10315_v10 = vcombine.high %v13039_v40, %v5155_v34  ;;  %v5203_v3 = vrot.slane %v5175_v35, %v12361_v14 }
 0x2f7   : > { %v10329_v51 = vcombine.low %v5509_v25, %v5553_v49  ;;  %v5729_v46 = vrot.slane %v10311_v52, %v12361_v14  ;;  %v5196_v34 = vrot.slane %v5174_v57, %v12361_v14 }
 0x2f8   : > { %v5959_v19 = vcombine.high %v5941_v43, %v5955_v39  ;;  %v5958_v61 = vcombine.low %v5941_v43, %v5955_v39  ;;  %v5796_v45 = vrot.slane %v10315_v10, %v12361_v14  ;;  %v10317_v48 = vcombine.low %v5203_v3, %v13107_v26 }
 0x2f9   : > { %v13275_v16 = vrot.slane %v10329_v51, %v12361_v14  ;;  %v5747_v29 = vcombine.high %v5729_v46, %v5743_v17  ;;  %v5746_v37 = vcombine.low %v5729_v46, %v5743_v17  ;;  %v5835_v9 = vrot.slane %v5196_v34, %v12361_v14 }
 0x2fa   : > { %v5800_v44 = vcombine.high %v5782_v28, %v5796_v45  ;;  %v5849_v5 = vrot.slane %v10317_v48, %v12361_v14  ;;  %v5799_v21 = vcombine.low %v5782_v28, %v5796_v45  ;;  %v5480_v43 = vcombine.low %v13249_v6, %v13245_v20 }
 0x2fb   : > { %v6118_v49 = vcombine.high %v13275_v16, %v13278_v23  ;;  %v6117_v58 = vcombine.low %v13275_v16, %v13278_v23  ;;  %v6047_v6 = vrot.slane %v13182_v2, %v12361_v14 }
 0x2fc   : > { %6553 = vmatmul.mubr.bf16.vlgmr.msra.gmra.mxu1 %v5693_v1  ;;  %v5853_v26 = vcombine.high %v5835_v9, %v5849_v5  ;;  %v5852_v52 = vcombine.low %v5835_v9, %v5849_v5  ;;  %v5502_v4 = vrot.slane %v5480_v43, %v12361_v14 }
 0x2fd   : > { %6560 = vmatprep.mubr.bf16.mxu1 %v5747_v29  ;;  %v13291_v8 = vpop.f32.mrf.mxu0 }
 0x2ff   : > { %v10994_v50 = vpop.f32.mrf.mxu0 }
 0x300   : > { %v10603_v53 = vpop.f32.mrf.mxu1 }
 0x301   : > { %v13297_v27 = vpop.f32.mrf.mxu0 }
 0x302   : > { %v10604_v36 = vpop.f32.mrf.mxu1 }
 0x303   : > { %v13299_v40 = vadd.f32 %v10604_v36, %v10603_v53  ;;  %v10995_v25 = vpop.f32.mrf.mxu0 }
 0x304   : > { %6561 = vmatmul.mubr.bf16.gmra.mxu1 %v5746_v37  ;;  %v10606_v63 = vpop.f32.mrf.mxu1 }
 0x305   : > { %6568 = vmatprep.mubr.bf16.mxu1 %v5800_v44 }
 0x306   : > { %v10607_v54 = vpop.f32.mrf.mxu1 }
 0x307   : > { %v13303_v56 = vadd.f32 %v10607_v54, %v10606_v63 }
 0x30c   : > { %6569 = vmatmul.mubr.bf16.gmra.mxu1 %v5799_v21 }
 0x30d   : > { %6576 = vmatprep.mubr.bf16.mxu1 %v5853_v26 }
 0x314   : > { %6577 = vmatmul.mubr.bf16.gmra.mxu1 %v5852_v52 }
 0x315   : > { %6584 = vmatprep.mubr.bf16.mxu1 %v5906_v22 }
 0x31c   : > { %6585 = vmatmul.mubr.bf16.gmra.mxu1 %v5905_v33 }
 0x31d   : > { %6592 = vmatprep.mubr.bf16.mxu1 %v5959_v19  ;;  %v6061_v19 = vrot.slane %v5502_v4, %v12361_v14 }
 0x31f   : > { %v6065_v23 = vcombine.high %v6047_v6, %v6061_v19 }
 0x320   : > { %v10609_v39 = vpop.f32.mrf.mxu1 }
 0x322   : > { %v10610_v18 = vpop.f32.mrf.mxu1 }
 0x323   : > { %v13311_v51 = vadd.f32 %v10610_v18, %v10609_v39 }
 0x324   : > { %v13309_v55 = vpop.f32.mrf.mxu0  ;;  %6593 = vmatmul.mubr.bf16.gmra.mxu1 %v5958_v61  ;;  %v10612_v17 = vpop.f32.mrf.mxu1 }
 0x325   : > { %6600 = vmatprep.mubr.bf16.mxu1 %v6012_v47  ;;  %v6064_v47 = vcombine.low %v6047_v6, %v6061_v19 }
 0x326   : > { %v10998_v22 = vpop.f32.mrf.mxu0  ;;  %v10613_v33 = vpop.f32.mrf.mxu1 }
 0x327   : > { %v13319_v20 = vadd.f32 %v10613_v33, %v10612_v17 }
 0x328   : > { %v13317_v46 = vpop.f32.mrf.mxu0 }
 0x32a   : > { %v10999_v16 = vpop.f32.mrf.mxu0 }
 0x32c   : > { %6601 = vmatmul.mubr.bf16.gmra.mxu1 %v6011_v31 }
 0x32d   : > { %6608 = vmatprep.mubr.bf16.mxu1 %v6065_v23 }
 0x332   : > { %v13326_v61 = vpop.f32.mrf.mxu0 }
 0x334   : > { %6609 = vmatmul.mubr.bf16.gmra.mxu1 %v6064_v47  ;;  %v11002_v35 = vpop.f32.mrf.mxu0 }
 0x335   : > { %6616 = vmatprep.mubr.bf16.mxu1 %v6118_v49 }
 0x336   : > { %v13328_v1 = vpop.f32.mrf.mxu0 }
 0x338   : > { %v11003_v24 = vpop.f32.mrf.mxu0 }
 0x33a   : > { %v13330_v29 = vpop.f32.mrf.mxu0 }
 0x33c   : > { %6617 = vmatmul.mubr.bf16.gmra.mxu1 %v6117_v58  ;;  %v11006_v2 = vpop.f32.mrf.mxu0 }
 0x33d   : > { %v10615_v10 = vpop.f32.mrf.mxu1 }
 0x33e   : > { %v13332_v3 = vpop.f32.mrf.mxu0 }
 0x33f   : > { %v10616_v28 = vpop.f32.mrf.mxu1 }
 0x340   : > { %v13334_v30 = vadd.f32 %v10616_v28, %v10615_v10  ;;  %v11007_v15 = vpop.f32.mrf.mxu0 }
 0x341   : > { %v10618_v31 = vpop.f32.mrf.mxu1 }
 0x343   : > { %v10619_v53 = vpop.f32.mrf.mxu1 }
 0x344   : > { %v13336_v57 = vadd.f32 %v10619_v53, %v10618_v31  ;;  %v13365_v53 = vld [vmem:[%s14669_s4] ss:$0 sm:$0xff] }
 0x345   : > { %v10621_v45 = vpop.f32.mrf.mxu1 }
 0x347   : > { %v10622_v49 = vpop.f32.mrf.mxu1 }
 0x348   : > { %v13338_v50 = vadd.f32 %v10622_v49, %v10621_v45 }
 0x349   : > { %v10624_v37 = vpop.f32.mrf.mxu1 }
 0x34b   : > { %v10625_v36 = vpop.f32.mrf.mxu1 }
 0x34c   : > { %v13340_v48 = vadd.f32 %v10625_v36, %v10624_v37  ;;  %v6450_v37 = vadd.f32 %v13299_v40, %v13365_v53 }
 0x34d   : > { %v10627_v58 = vpop.f32.mrf.mxu1 }
 0x34f   : > { %v10628_v44 = vpop.f32.mrf.mxu1 }
 0x350   : > { %v13342_v63 = vadd.f32 %v10628_v44, %v10627_v58 }
 0x351   : > { %v10630_v34 = vpop.f32.mrf.mxu1 }
 0x353   : > { %v10631_v25 = vpop.f32.mrf.mxu1 }
 0x354   : > { %v13344_v54 = vadd.f32 %v10631_v25, %v10630_v34  ;;  %v6453_v25 = vadd.f32 %v13303_v56, %v13365_v53  ;;  %v6461_v56 = vadd.f32 %v13319_v20, %v13365_v53 }
 0x37f   : > { %v10633_v5 = vpop.f32.mrf.mxu1 }
 0x381   : > { %v10634_v9 = vpop.f32.mrf.mxu1 }
 0x382   : > { %v13346_v21 = vadd.f32 %v10634_v9, %v10633_v5 }
 0x383   : > { %v10636_v26 = vpop.f32.mrf.mxu1 }
 0x385   : > { %v10637_v52 = vpop.f32.mrf.mxu1 }
 0x386   : > { %v13348_v43 = vadd.f32 %v10637_v52, %v10636_v26 }
 0x387   : > { %v10639_v39 = vpop.f32.mrf.mxu1 }
 0x389   : > { %v10640_v4 = vpop.f32.mrf.mxu1 }
 0x38a   : > { %v13350_v18 = vadd.f32 %v10640_v4, %v10639_v39 }
 0x38b   : > { %v10642_v17 = vpop.f32.mrf.mxu1 }
 0x38d   : > { %v10643_v22 = vpop.f32.mrf.mxu1 }
 0x38e   : > { %v13352_v33 = vadd.f32 %v10643_v22, %v10642_v17  ;;  %v6458_v22 = vadd.f32 %v13311_v51, %v13365_v53 }
 0x3a0   : > { %v10645_v19 = vpop.f32.mrf.mxu1 }
 0x3a2   : > { %v10646_v6 = vpop.f32.mrf.mxu1 }
 0x3a3   : > { %v13354_v16 = vadd.f32 %v10646_v6, %v10645_v19 }
 0x3a4   : > { %v10648_v23 = vpop.f32.mrf.mxu1 }
 0x3a6   : > { %v10649_v47 = vpop.f32.mrf.mxu1 }
 0x3a7   : > { %v13356_v35 = vadd.f32 %v10649_v47, %v10648_v23 }
 0x3b4   : > { %v10651_v24 = vpop.f32.mrf.mxu1 }
 0x3b6   : > { %v10652_v2 = vpop.f32.mrf.mxu1 }
 0x3b7   : > { %v13358_v10 = vadd.f32 %v10652_v2, %v10651_v24 }
 0x3b8   : > { %v10654_v28 = vpop.f32.mrf.mxu1 }
 0x3ba   : > { %v10655_v15 = vpop.f32.mrf.mxu1 }
 0x3bb   : > { %v13360_v31 = vadd.f32 %v10655_v15, %v10654_v28 }
 0x3bc   : > { %v10673_v45 = vpop.f32.mrf.mxu1 }
 0x3be   : > { %v10674_v49 = vpop.f32.mrf.mxu1 }
 0x3bf   : > { %v10675_v36 = vadd.f32 %v10674_v49, %v10673_v45 }
 0x3c0   : > { %v10676_v58 = vpop.f32.mrf.mxu1 }
 0x3c1   : > { %v6555_v44 = vadd.f32 %v10675_v36, %v6450_v37  ;;  %v6466_v36 = vadd.f32 %v13334_v30, %v13365_v53  ;;  %v13395_v30 = vadd.f32 %v13342_v63, %v13365_v53  ;;  %v13410_v63 = vadd.f32 %v13348_v43, %v13365_v53 }
 0x3c2   : > { %v10677_v34 = vpop.f32.mrf.mxu1  ;;  %v13426_v43 = vadd.f32 %v13354_v16, %v13365_v53 }
 0x3c3   : > { %v10678_v5 = vadd.f32 %v10677_v34, %v10676_v58  ;;  %v6660_v26 = vadd.f32 %v13119_v62, %v6555_v44  ;;  %v6469_v34 = vadd.f32 %v13336_v57, %v13365_v53 }
 0x3c4   : > { %v10679_v9 = vpop.f32.mrf.mxu1 }
 0x3c5   : > { %v6558_v52 = vadd.f32 %v10678_v5, %v6453_v25  ;;  %v6730_v19 = vmax.f32 %v6660_v26, 0.0  ;;  %v6474_v25 = vadd.f32 %v13338_v50, %v13365_v53  ;;  %v13399_v50 = vadd.f32 %v13344_v54, %v13365_v53 }
 0x3c6   : > { %v10680_v39 = vpop.f32.mrf.mxu1  ;;  %v13414_v54 = vadd.f32 %v13350_v18, %v13365_v53 }
 0x3c7   : > { %v6663_v4 = vadd.f32 %v13121_v11, %v6558_v52  ;;  %v10681_v17 = vadd.f32 %v10680_v39, %v10679_v9 }
 0x3c8   : > { %v10682_v40 = vpop.f32.mrf.mxu1 }
 0x3c9   : > { %v6731_v6 = vmax.f32 %v6663_v4, 0.0  ;;  %v6563_v23 = vadd.f32 %v10681_v17, %v6458_v22 }
 0x3ca   : > { %v10683_v47 = vpop.f32.mrf.mxu1 }
 0x3cb   : > { %v6748_v24 = vpack.c.bf16 %v6731_v6, %v6730_v19  ;;  %v10377_v2 = vpack.c.bf16 %v6731_v6, %v6731_v6  ;;  %v10684_v28 = vadd.f32 %v10683_v47, %v10682_v40  ;;  %v6668_v51 = vadd.f32 %v13123_v42, %v6563_v23 }
 0x3cc   : > { %v10685_v62 = vpop.f32.mrf.mxu1 }
 0x3cd   : > { %v6773_v15 = vrot.slane %v6748_v24, %v12361_v14  ;;  %v6780_v11 = vrot.slane %v10377_v2, %v12361_v14  ;;  %v6566_v45 = vadd.f32 %v10684_v28, %v6461_v56  ;;  %v6732_v26 = vmax.f32 %v6668_v51, 0.0 }
 0x3ce   : > { %v10686_v49 = vpop.f32.mrf.mxu1 }
 0x3cf   : > { %v6782_v37 = vcombine.high %v6780_v11, %v6780_v11  ;;  %v6671_v58 = vadd.f32 %v13127_v41, %v6566_v45  ;;  %v10687_v20 = vadd.f32 %v10686_v49, %v10685_v62  ;;  %v6922_v5 = vsel %vm6919_vm13, %v6773_v15, 4286644096 }
 0x3d0   : > { %v10688_v44 = vpop.f32.mrf.mxu1  ;;  %v13391_v41 = vadd.f32 %v13340_v48, %v13365_v53  ;;  %v6781_v57 = vcombine.high %v6773_v15, %v6773_v15  ;;  %v13406_v48 = vadd.f32 %v13346_v21, %v13365_v53  ;;  %v13422_v21 = vadd.f32 %v13352_v33, %v13365_v53 }
 0x3d1   : > { %v6925_v9 = vsel %vm6919_vm13, %v6782_v37, 4286644096  ;;  %v6733_v52 = vmax.f32 %v6671_v58, 0.0  ;;  %v6571_v39 = vadd.f32 %v10687_v20, %v6466_v36  ;;  %v6936_v49 = vsel %vm6919_vm13, %v6780_v11, 4286644096 }
 0x3d2   : > { %v6927_v42 = vmax.bf16 %v6925_v9, %v6922_v5  ;;  %v10689_v4 = vpop.f32.mrf.mxu1  ;;  %v6929_v28 = vsel %vm6919_vm13, %v6781_v57, 4286644096  ;;  %v13441_v5 = vadd.f32 %v13358_v10, %v13365_v53 }
 0x3d3   : > { %v10690_v17 = vadd.f32 %v10689_v4, %v10688_v44  ;;  %v6749_v40 = vpack.c.bf16 %v6733_v52, %v6732_v26  ;;  %v10378_v19 = vpack.c.bf16 %v6733_v52, %v6733_v52  ;;  %v6676_v24 = vadd.f32 %v13158_v32, %v6571_v39 }
 0x3d4   : > { %v13402_v22 = vrot.slane %v6927_v42, %v11724_v7  ;;  %v10691_v6 = vpop.f32.mrf.mxu1 }
 0x3d5   : > { %v6574_v23 = vadd.f32 %v10690_v17, %v6469_v34  ;;  %v6790_v56 = vrot.slane %v6749_v40, %v12361_v14  ;;  %v6797_v15 = vrot.slane %v10378_v19, %v12361_v14  ;;  %v6734_v58 = vmax.f32 %v6676_v24, 0.0 }
 0x3d6   : > { %v7072_v47 = vcombine.high %v13402_v22, %v13402_v22  ;;  %v10692_v2 = vpop.f32.mrf.mxu1 }
 0x3d7   : > { %v6679_v18 = vadd.f32 %v13164_v12, %v6574_v23  ;;  %v6798_v45 = vcombine.high %v6790_v56, %v6790_v56  ;;  %v6932_v32 = vsel %vm6919_vm13, %v6790_v56, 4286644096  ;;  %v10693_v44 = vadd.f32 %v10692_v2, %v10691_v6 }
 0x3d8   : > { %v7224_v62 = vsel %vm7209_vm14, %v7072_v47, 4286644096  ;;  %v10694_v51 = vpop.f32.mrf.mxu1  ;;  %v6934_v36 = vmax.bf16 %v6932_v32, %v6929_v28  ;;  %v13437_v12 = vadd.f32 %v13356_v35, %v13365_v53  ;;  %v6799_v26 = vcombine.high %v6797_v15, %v6797_v15 }
 0x3d9   : > { %v7226_v33 = vunpack.i.l.bf16 %v7224_v62  ;;  %v7227_v37 = vunpack.i.h.bf16 %v7224_v62  ;;  %v6939_v16 = vsel %vm6919_vm13, %v6798_v45, 4286644096  ;;  %v6735_v20 = vmax.f32 %v6679_v18, 0.0 }
 0x3da   : > { %v10695_v34 = vpop.f32.mrf.mxu1  ;;  %v6941_v9 = vmax.bf16 %v6939_v16, %v6936_v49  ;;  %v7079_v11 = vrot.slane %v6934_v36, %v11724_v7  ;;  %v6579_v40 = vadd.f32 %v10693_v44, %v6474_v25  ;;  %v13454_v56 = vadd.f32 %v13360_v31, %v13365_v53 }
 0x3db   : > { %v13444_v42 = vmax.f32 %v7226_v33, %v7227_v37  ;;  %v6750_v52 = vpack.c.bf16 %v6735_v20, %v6734_v58  ;;  %v10379_v39 = vpack.c.bf16 %v6735_v20, %v6735_v20  ;;  %v6943_v24 = vsel %vm6919_vm13, %v6797_v15, 4286644096 }
 0x3dc   : > { %v10697_v4 = vpop.f32.mrf.mxu1  ;;  %v7080_v57 = vcombine.high %v7079_v11, %v7079_v11  ;;  %v13447_v17 = vrot.slane %v6941_v9, %v11724_v7  ;;  %v7237_v35 = vsel %vm7209_vm14, %v7079_v11, 4286644096  ;;  %v6950_v45 = vsel %vm6919_vm13, %v6799_v26, 4286644096 }
 0x3dd   : > { %v7239_v19 = vunpack.i.l.bf16 %v7237_v35  ;;  %v7240_v6 = vunpack.i.h.bf16 %v7237_v35  ;;  %v6807_v10 = vrot.slane %v6750_v52, %v12361_v14  ;;  %v6814_v23 = vrot.slane %v10379_v39, %v12361_v14 }
 0x3de   : > { %v10698_v47 = vpop.f32.mrf.mxu1  ;;  %v7250_v2 = vsel %vm7209_vm14, %v7080_v57, 4286644096  ;;  %v13460_v28 = vsel %vm7209_vm14, %v13447_v17, 4286644096  ;;  %v7229_v49 = vrot.slane %v13444_v42, 4  ;;  %v13465_v31 = vadd.f32 %v13166_v13, %v6579_v40 }
 0x3df   : > { %v7241_v25 = vmax.f32 %v7239_v19, %v7240_v6  ;;  %v7252_v18 = vunpack.i.l.bf16 %v7250_v2  ;;  %v7253_v62 = vunpack.i.h.bf16 %v7250_v2  ;;  %v6815_v33 = vcombine.high %v6807_v10, %v6807_v10 }
 0x3e0   : > { %v10700_v32 = vpop.f32.mrf.mxu1  ;;  %v6816_v37 = vcombine.high %v6814_v23, %v6814_v23  ;;  %v7265_v15 = vunpack.i.l.bf16 %v13460_v28  ;;  %v7266_v36 = vunpack.i.h.bf16 %v13460_v28  ;;  %v6953_v16 = vsel %vm6919_vm13, %v6814_v23, 4286644096 }
 0x3e1   : > { %v7242_v53 = vrot.slane %v7241_v25, 4  ;;  %v6946_v20 = vsel %vm6919_vm13, %v6815_v33, 4286644096  ;;  %v6955_v44 = vmax.bf16 %v6953_v16, %v6950_v45  ;;  %v6957_v9 = vsel %vm6919_vm13, %v6807_v10, 4286644096 }
 0x3e2   : > { %v10701_v58 = vpop.f32.mrf.mxu1  ;;  %v6960_v11 = vsel %vm6919_vm13, %v6816_v37, 4286644096  ;;  %v13473_v26 = vmax.f32 %v7252_v18, %v7253_v62  ;;  %v6948_v52 = vmax.bf16 %v6946_v20, %v6943_v24  ;;  %v10696_v39 = vadd.f32 %v10695_v34, %v10694_v51 }
 0x3e3   : > { %v6962_v13 = vmax.bf16 %v6960_v11, %v6957_v9  ;;  %v7103_v35 = vrot.slane %v6955_v44, %v11724_v7  ;;  %v6736_v40 = vmax.f32 %v13465_v31, 0.0  ;;  %v10699_v19 = vadd.f32 %v10698_v47, %v10697_v4 }
 0x3e4   : > { %v10703_v57 = vpop.f32.mrf.mxu1  ;;  %v10702_v6 = vadd.f32 %v10701_v58, %v10700_v32  ;;  %v13477_v23 = vmax.f32 %v7241_v25, %v7242_v53  ;;  %v7095_v2 = vrot.slane %v6948_v52, %v11724_v7  ;;  %v6582_v45 = vadd.f32 %v10696_v39, %v13391_v41 }
 0x3e5   : > { %v7111_v10 = vrot.slane %v6962_v13, %v11724_v7  ;;  %v7104_v62 = vcombine.high %v7103_v35, %v7103_v35  ;;  %v7315_v24 = vsel %vm7209_vm14, %v7103_v35, 4286644096  ;;  %v6587_v51 = vadd.f32 %v10699_v19, %v13395_v30 }
 0x3e6   : > { %v10704_v18 = vpop.f32.mrf.mxu1  ;;  %v6590_v34 = vadd.f32 %v10702_v6, %v13399_v50  ;;  %v7096_v33 = vcombine.high %v7095_v2, %v7095_v2  ;;  %v7289_v4 = vsel %vm7209_vm14, %v7095_v2, 4286644096  ;;  %v7317_v47 = vunpack.i.l.bf16 %v7315_v24 }
 0x3e7   : > { %v7112_v37 = vcombine.high %v7111_v10, %v7111_v10  ;;  %v7291_v32 = vunpack.i.l.bf16 %v7289_v4  ;;  %v7292_v31 = vunpack.i.h.bf16 %v7289_v4  ;;  %v7318_v53 = vunpack.i.h.bf16 %v7315_v24 }
 0x3e8   : > { %v10706_v25 = vpop.f32.mrf.mxu1  ;;  %v7328_v16 = vsel %vm7209_vm14, %v7104_v62, 4286644096  ;;  %v7302_v41 = vsel %vm7209_vm14, %v7096_v33, 4286644096  ;;  %v7341_v44 = vsel %vm7209_vm14, %v7111_v10, 4286644096  ;;  %v7230_v6 = vmax.f32 %v13444_v42, %v7229_v49 }
 0x3e9   : > { %v7330_v58 = vunpack.i.l.bf16 %v7328_v16  ;;  %v7331_v20 = vunpack.i.h.bf16 %v7328_v16  ;;  %v13489_v9 = vmax.f32 %v7291_v32, %v7292_v31  ;;  %v7304_v50 = vunpack.i.l.bf16 %v7302_v41 }
 0x3ea   : > { %v10707_v30 = vpop.f32.mrf.mxu1  ;;  %v7305_v11 = vunpack.i.h.bf16 %v7302_v41  ;;  %v7319_v52 = vmax.f32 %v7317_v47, %v7318_v53  ;;  %v7343_v13 = vunpack.i.l.bf16 %v7341_v44  ;;  %v7344_v39 = vunpack.i.h.bf16 %v7341_v44 }
 0x3eb   : > { %v13492_v35 = vsel %vm7209_vm14, %v7112_v37, 4286644096  ;;  %v7294_v2 = vrot.slane %v13489_v9, 4  ;;  %v13498_v24 = vmax.f32 %v7330_v58, %v7331_v20  ;;  %v7244_v10 = vrot.slane %v13477_v23, 2 }
 0x3ec   : > { %v10709_v19 = vpop.f32.mrf.mxu1  ;;  %v13496_v62 = vmax.f32 %v7304_v50, %v7305_v11  ;;  %v7320_v33 = vrot.slane %v7319_v52, 4  ;;  %v6687_v47 = vadd.f32 %v13168_v38, %v6582_v45  ;;  %v6692_v32 = vadd.f32 %v13230_v59, %v6587_v51 }
 0x3ed   : > { %v13504_v31 = vmax.f32 %v7343_v13, %v7344_v39  ;;  %v6695_v42 = vadd.f32 %v13255_v0, %v6590_v34  ;;  %v10705_v49 = vadd.f32 %v10704_v18, %v10703_v57  ;;  %v10708_v53 = vadd.f32 %v10707_v30, %v10706_v25 }
 0x3ee   : > { %v10710_v37 = vpop.f32.mrf.mxu1  ;;  %v6737_v41 = vmax.f32 %v6687_v47, 0.0  ;;  %v7231_v44 = vrot.slane %v7230_v6, 2  ;;  %v6738_v50 = vmax.f32 %v6692_v32, 0.0  ;;  %v13510_v59 = vmax.f32 %v7319_v52, %v7320_v33 }
 0x3ef   : > { %v10711_v58 = vadd.f32 %v10710_v37, %v10709_v19  ;;  %v6739_v11 = vmax.f32 %v6695_v42, 0.0  ;;  %v6595_v4 = vadd.f32 %v10705_v49, %v13406_v48  ;;  %v6598_v38 = vadd.f32 %v10708_v53, %v13410_v63 }
 0x3f0   : > { %v10712_v20 = vpop.f32.mrf.mxu1  ;;  %v6751_v45 = vpack.c.bf16 %v6737_v41, %v6736_v40  ;;  %v10380_v51 = vpack.c.bf16 %v6737_v41, %v6737_v41  ;;  %v13517_v48 = vmax.f32 %v7230_v6, %v7231_v44  ;;  %v13520_v63 = vmax.f32 %v13477_v23, %v7244_v10 }
 0x3f1   : > { %v6603_v0 = vadd.f32 %v10711_v58, %v13414_v54  ;;  %v6752_v18 = vpack.c.bf16 %v6739_v11, %v6738_v50  ;;  %v10381_v34 = vpack.c.bf16 %v6739_v11, %v6739_v11  ;;  %v6700_v25 = vadd.f32 %v13291_v8, %v6595_v4 }
 0x3f2   : > { %v10713_v57 = vpop.f32.mrf.mxu1  ;;  %v6703_v30 = vadd.f32 %v13297_v27, %v6598_v38  ;;  %v6824_v13 = vrot.slane %v6751_v45, %v12361_v14  ;;  %v6831_v39 = vrot.slane %v10380_v51, %v12361_v14 }
 0x3f3   : > { %v6841_v40 = vrot.slane %v6752_v18, %v12361_v14  ;;  %v6848_v54 = vrot.slane %v10381_v34, %v12361_v14  ;;  %v13525_v19 = vadd.f32 %v13309_v55, %v6603_v0  ;;  %v6740_v4 = vmax.f32 %v6700_v25, 0.0 }
 0x3f4   : > { %v6741_v52 = vmax.f32 %v6703_v30, 0.0  ;;  %v10715_v8 = vpop.f32.mrf.mxu1  ;;  %v6832_v33 = vcombine.high %v6824_v13, %v6824_v13  ;;  %v6833_v27 = vcombine.high %v6831_v39, %v6831_v39  ;;  %v10714_v47 = vadd.f32 %v10713_v57, %v10712_v20 }
 0x3f5   : > { %v6964_v32 = vsel %vm6919_vm13, %v6824_v13, 4286644096  ;;  %v6849_v6 = vcombine.high %v6841_v40, %v6841_v40  ;;  %v6850_v37 = vcombine.high %v6848_v54, %v6848_v54  ;;  %v6974_v23 = vsel %vm6919_vm13, %v6841_v40, 4286644096 }
 0x3f6   : > { %v6967_v10 = vsel %vm6919_vm13, %v6833_v27, 4286644096  ;;  %v6971_v42 = vsel %vm6919_vm13, %v6832_v33, 4286644096  ;;  %v6753_v49 = vpack.c.bf16 %v6741_v52, %v6740_v4  ;;  %v10382_v53 = vpack.c.bf16 %v6741_v52, %v6741_v52  ;;  %v10716_v50 = vpop.f32.mrf.mxu1 }
 0x3f7   : > { %v6969_v41 = vmax.bf16 %v6967_v10, %v6964_v32  ;;  %v6978_v55 = vsel %vm6919_vm13, %v6831_v39, 4286644096  ;;  %v6976_v58 = vmax.bf16 %v6974_v23, %v6971_v42  ;;  %v6981_v44 = vsel %vm6919_vm13, %v6849_v6, 4286644096 }
 0x3f8   : > { %v6983_v20 = vmax.bf16 %v6981_v44, %v6978_v55  ;;  %v6985_v11 = vsel %vm6919_vm13, %v6848_v54, 4286644096  ;;  %v6858_v38 = vrot.slane %v6753_v49, %v12361_v14  ;;  %v6992_v45 = vsel %vm6919_vm13, %v6850_v37, 4286644096  ;;  %v11133_v44 = vld [vmem:[%s14670_s5 + $0x38] sm:$0xff]  }
 0x3f9   : > { %v7119_v51 = vrot.slane %v6969_v41, %v11724_v7  ;;  %v7127_v0 = vrot.slane %v6976_v58, %v11724_v7  ;;  %v6865_v57 = vrot.slane %v10382_v53, %v12361_v14  ;;  %v6742_v18 = vmax.f32 %v13525_v19, 0.0  ;;  %v11132_v58 = vld [vmem:[%s14670_s5 + $0x78] sm:$0xff]  }
 0x3fa   : > { %v7135_v34 = vrot.slane %v6983_v20, %v11724_v7  ;;  %v6866_v25 = vcombine.high %v6858_v38, %v6858_v38  ;;  %v6606_v30 = vadd.f32 %v10714_v47, %v13422_v21  ;;  %v10717_v13 = vadd.f32 %v10716_v50, %v10715_v8  ;;  %v11134_v50 = vld [vmem:[%s14670_s5 + $0x70] sm:$0xff]   ;;  %10740 = vmatprep.subr.bf16.mxu1 %v11132_v58 }
 0x3fb   : > { %v7120_v39 = vcombine.high %v7119_v51, %v7119_v51  ;;  %v7367_v40 = vsel %vm7209_vm14, %v7119_v51, 4286644096  ;;  %v7128_v54 = vcombine.high %v7127_v0, %v7127_v0  ;;  %v7393_v52 = vsel %vm7209_vm14, %v7127_v0, 4286644096  ;;  %10741 = vmatpush3.bf16.msra.mxu1 %v11133_v44 }
 0x3fc   : > { %v7369_v33 = vunpack.i.l.bf16 %v7367_v40  ;;  %v7370_v27 = vunpack.i.h.bf16 %v7367_v40  ;;  %v7136_v4 = vcombine.high %v7135_v34, %v7135_v34  ;;  %v7395_v32 = vunpack.i.l.bf16 %v7393_v52  ;;  %10742 = vmatprep.subr.bf16.mxu1 %v11134_v50 }
 0x3fd   : > { %v7380_v6 = vsel %vm7209_vm14, %v7120_v39, 4286644096  ;;  %v7396_v37 = vunpack.i.h.bf16 %v7393_v52  ;;  %v13546_v23 = vsel %vm7209_vm14, %v7128_v54, 4286644096  ;;  %v6867_v10 = vcombine.high %v6865_v57, %v6865_v57 }
 0x3fe   : > { %v7371_v42 = vmax.f32 %v7369_v33, %v7370_v27  ;;  %v7382_v21 = vunpack.i.l.bf16 %v7380_v6  ;;  %v7383_v8 = vunpack.i.h.bf16 %v7380_v6  ;;  %v13549_v47 = vsel %vm7209_vm14, %v7135_v34, 4286644096  ;;  %v11135_v34 = vld [vmem:[%s14670_s5 + $0xf8] sm:$0xff]   ;;  %v13584_v6 = vpop.f32.mrf.mxu1 }
 0x3ff   : > { %v13551_v49 = vmax.f32 %v7395_v32, %v7396_v37  ;;  %v7408_v53 = vunpack.i.l.bf16 %v13546_v23  ;;  %v7409_v41 = vunpack.i.h.bf16 %v13546_v23  ;;  %v6995_v55 = vsel %vm6919_vm13, %v6865_v57, 4286644096  ;;  %v11137_v33 = vld [vmem:[%s14670_s5 + $0xb8] sm:$0xff]   ;;  %10762 = vmatprep.subr.bf16.mxu0 %v11135_v34  ;;  %v11142_v23 = vld [vmem:[%s14670_s5 + $0x60] sm:$0xff]  }
 0x400   : > { %v7372_v20 = vrot.slane %v7371_v42, 4  ;;  %v13565_v51 = vmax.f32 %v7382_v21, %v7383_v8  ;;  %v13568_v0 = vsel %vm7209_vm14, %v7136_v4, 4286644096  ;;  %v6988_v57 = vsel %vm6919_vm13, %v6866_v25, 4286644096  ;;  %10763 = vmatpush3.bf16.msra.mxu0 %v11137_v33 }
 0x401   : > { %v7398_v39 = vrot.slane %v13551_v49, 4  ;;  %v6990_v52 = vmax.bf16 %v6988_v57, %v6985_v11  ;;  %v6997_v32 = vmax.bf16 %v6995_v55, %v6992_v45  ;;  %v11136_v11 = vld [vmem:[%s14670_s5 + $0x30] sm:$0xff]   ;;  %v6999_v37 = vsel %vm6919_vm13, %v6858_v38, 4286644096 }
 0x402   : > { %v13580_v27 = vmax.f32 %v7371_v42, %v7372_v20  ;;  %v7002_v21 = vsel %vm6919_vm13, %v6867_v10, 4286644096  ;;  %v6711_v8 = vadd.f32 %v13317_v46, %v6606_v30  ;;  %v7385_v45 = vrot.slane %v13565_v51, 4  ;;  %v10719_v30 = vpop.f32.mrf.mxu1  ;;  %10743 = vmatpush3.bf16.msra.mxu1 %v11136_v11 }
 0x403   : > { %v7143_v42 = vrot.slane %v6990_v52, %v11724_v7  ;;  %v7004_v55 = vmax.bf16 %v7002_v21, %v6999_v37  ;;  %v7151_v58 = vrot.slane %v6997_v32, %v11724_v7  ;;  %v6611_v44 = vadd.f32 %v10717_v13, %v13426_v43 }
 0x404   : > { %v6743_v34 = vmax.f32 %v6711_v8, 0.0  ;;  %v7233_v38 = vrot.slane %v13517_v48, 1  ;;  %v7246_v19 = vrot.slane %v13520_v63, 1 }
 0x405   : > { %v7144_v20 = vcombine.high %v7143_v42, %v7143_v42  ;;  %v7445_v57 = vsel %vm7209_vm14, %v7143_v42, 4286644096  ;;  %v7152_v10 = vcombine.high %v7151_v58, %v7151_v58  ;;  %v7159_v52 = vrot.slane %v7004_v55, %v11724_v7 }
 0x406   : > { %v7447_v25 = vunpack.i.l.bf16 %v7445_v57  ;;  %v7448_v46 = vunpack.i.h.bf16 %v7445_v57  ;;  %v7471_v33 = vsel %vm7209_vm14, %v7151_v58, 4286644096  ;;  %v6754_v43 = vpack.c.bf16 %v6743_v34, %v6742_v18  ;;  %v10721_v18 = vpop.f32.mrf.mxu1 }
 0x407   : > { %v7458_v50 = vsel %vm7209_vm14, %v7144_v20, 4286644096  ;;  %v10383_v13 = vpack.c.bf16 %v6743_v34, %v6743_v34  ;;  %v7160_v32 = vcombine.high %v7159_v52, %v7159_v52  ;;  %v7473_v8 = vunpack.i.l.bf16 %v7471_v33 }
 0x408   : > { %v13603_v37 = vmax.f32 %v7447_v25, %v7448_v46  ;;  %v7460_v21 = vunpack.i.l.bf16 %v7458_v50  ;;  %v7461_v42 = vunpack.i.h.bf16 %v7458_v50  ;;  %v7474_v4 = vunpack.i.h.bf16 %v7471_v33 }
 0x409   : > { %v7484_v55 = vsel %vm7209_vm14, %v7152_v10, 4286644096  ;;  %v7497_v57 = vsel %vm7209_vm14, %v7159_v52, 4286644096  ;;  %v13608_v20 = vadd.f32 %v13326_v61, %v6611_v44  ;;  %v13612_v46 = vsel %vm7209_vm14, %v7160_v32, 4286644096 }
 0x40a   : > { %v7486_v11 = vunpack.i.l.bf16 %v7484_v55  ;;  %v7487_v16 = vunpack.i.h.bf16 %v7484_v55  ;;  %v7475_v58 = vmax.f32 %v7473_v8, %v7474_v4  ;;  %v7499_v34 = vunpack.i.l.bf16 %v7497_v57 }
 0x40b   : > { %v7500_v25 = vunpack.i.h.bf16 %v7497_v57  ;;  %v13615_v33 = vmax.f32 %v7460_v21, %v7461_v42  ;;  %v13620_v52 = vrot.slane %v6754_v43, %v12361_v14  ;;  %v6882_v8 = vrot.slane %v10383_v13, %v12361_v14  ;;  %v10722_v42 = vpop.f32.mrf.mxu1 }
 0x40c   : > { %v13617_v10 = vmax.f32 %v7486_v11, %v7487_v16  ;;  %v7476_v61 = vrot.slane %v7475_v58, 4  ;;  %v6744_v32 = vmax.f32 %v13608_v20, 0.0  ;;  %v7234_v21 = vmax.f32 %v13517_v48, %v7233_v38 }
 0x40d   : > { %v13625_v55 = vmax.f32 %v7499_v34, %v7500_v25  ;;  %v7247_v16 = vmax.f32 %v13520_v63, %v7246_v19  ;;  %v6883_v43 = vcombine.high %v13620_v52, %v13620_v52  ;;  %v6884_v57 = vcombine.high %v6882_v8, %v6882_v8 }
 0x40e   : > { %v7006_v11 = vsel %vm6919_vm13, %v13620_v52, 4286644096  ;;  %v7255_v44 = vrot.slane %v13473_v26, 4  ;;  %v7235_v4 = vpack.i.bf16 %v7234_v21, %v7234_v21  ;;  %v7267_v20 = vmax.f32 %v7265_v15, %v7266_v36 }
 0x40f   : > { %v7248_v13 = vpack.i.bf16 %v7247_v16, %v7247_v16  ;;  %v10720_v48 = vadd.f32 %v10719_v30, %v13584_v6  ;;  %v13640_v63 = vmax.f32 %v7475_v58, %v7476_v61  ;;  %v7009_v38 = vsel %vm6919_vm13, %v6884_v57, 4286644096 }
 0x410   : > { %v7256_v19 = vmax.f32 %v13473_v26, %v7255_v44  ;;  %v10723_v34 = vadd.f32 %v10722_v42, %v10721_v18  ;;  %v7011_v25 = vmax.bf16 %v7009_v38, %v7006_v11  ;;  %v13645_v50 = vsel %vm6919_vm13, %v6882_v8, 4286644096 }
 0x411   : > { %v7268_v21 = vrot.slane %v7267_v20, 4  ;;  %v13647_v16 = vunpack.c.l.b16 %v7248_v13  ;;  %v13649_v54 = vunpack.c.l.b16 %v7235_v4  ;;  %v6614_v28 = vadd.f32 %v10720_v48, %v13437_v12 }
 0x412   : > { %v7257_v40 = vrot.slane %v7256_v19, 2  ;;  %v7307_v15 = vrot.slane %v13496_v62, 4  ;;  %v7167_v36 = vrot.slane %v7011_v25, %v11724_v7  ;;  %v6619_v26 = vadd.f32 %v10723_v34, %v13441_v5 }
 0x413   : > { %v7269_v6 = vmax.f32 %v7267_v20, %v7268_v21  ;;  %v7322_v30 = vrot.slane %v13510_v59, 2  ;;  %v7737_v58 = vsel %vm7710_vm15, %v13647_v16, %v13649_v54  ;;  %v6719_v61 = vadd.f32 %v13328_v1, %v6614_v28  ;;  %v11140_v21 = vld [vmem:[%s14670_s5 + $0x28] sm:$0xff]  }
 0x414   : > { %v7258_v18 = vmax.f32 %v7256_v19, %v7257_v40  ;;  %v7308_v44 = vmax.f32 %v13496_v62, %v7307_v15  ;;  %v7168_v4 = vcombine.high %v7167_v36, %v7167_v36  ;;  %v7523_v12 = vsel %vm7209_vm14, %v7167_v36, 4286644096  ;;  %v11138_v62 = vld [vmem:[%s14670_s5 + $0x68] sm:$0xff]  }
 0x415   : > { %v7270_v8 = vrot.slane %v7269_v6, 2  ;;  %v7323_v42 = vmax.f32 %v13510_v59, %v7322_v30  ;;  %v7525_v57 = vunpack.i.l.bf16 %v7523_v12  ;;  %v7526_v5 = vunpack.i.h.bf16 %v7523_v12  ;;  %v11139_v59 = vld [vmem:[%s14670_s5 + $0xf0] sm:$0xff]   ;;  %10744 = vmatprep.subr.bf16.mxu1 %v11138_v62 }
 0x416   : > { %v7259_v11 = vrot.slane %v7258_v18, 1  ;;  %v6745_v40 = vmax.f32 %v6719_v61, 0.0  ;;  %v7536_v13 = vsel %vm7209_vm14, %v7168_v4, 4286644096  ;;  %v13665_v48 = vadd.f32 %v13330_v29, %v6619_v26  ;;  %v11141_v29 = vld [vmem:[%s14670_s5 + $0xb0] sm:$0xff]   ;;  %10764 = vmatprep.subr.bf16.mxu0 %v11139_v59  ;;  %10745 = vmatpush3.bf16.msra.mxu1 %v11140_v21 }
 0x417   : > { %v7271_v20 = vmax.f32 %v7269_v6, %v7270_v8  ;;  %v7309_v1 = vrot.slane %v7308_v44, 2  ;;  %v7527_v38 = vmax.f32 %v7525_v57, %v7526_v5  ;;  %v7538_v19 = vunpack.i.l.bf16 %v7536_v13  ;;  %10765 = vmatpush3.bf16.msra.mxu0 %v11141_v29  ;;  %10746 = vmatprep.subr.bf16.mxu1 %v11142_v23 }
 0x418   : > { %v7539_v34 = vunpack.i.h.bf16 %v7536_v13  ;;  %v7260_v25 = vmax.f32 %v7258_v18, %v7259_v11  ;;  %v6755_v15 = vpack.c.bf16 %v6745_v40, %v6744_v32  ;;  %v10384_v36 = vpack.c.bf16 %v6745_v40, %v6745_v40 }
 0x419   : > { %v7272_v28 = vrot.slane %v7271_v20, 1  ;;  %v7310_v6 = vmax.f32 %v7308_v44, %v7309_v1  ;;  %v7528_v26 = vrot.slane %v7527_v38, 4  ;;  %v7324_v4 = vrot.slane %v7323_v42, 1 }
 0x41a   : > { %v13679_v30 = vmax.f32 %v7538_v19, %v7539_v34  ;;  %v7261_v61 = vpack.i.bf16 %v7260_v25, %v7260_v25  ;;  %v6892_v12 = vrot.slane %v6755_v15, %v12361_v14  ;;  %v6899_v8 = vrot.slane %v10384_v36, %v12361_v14 }
 0x41b   : > { %v7273_v18 = vmax.f32 %v7271_v20, %v7272_v28  ;;  %v7311_v57 = vrot.slane %v7310_v6, 1  ;;  %v13683_v5 = vmax.f32 %v7527_v38, %v7528_v26  ;;  %v7013_v44 = vsel %vm6919_vm13, %v6883_v43, 4286644096 }
 0x41c   : > { %v13685_v32 = vunpack.c.l.b16 %v7261_v61  ;;  %v6746_v11 = vmax.f32 %v13665_v48, 0.0  ;;  %v6900_v13 = vcombine.high %v6892_v12, %v6892_v12  ;;  %v7016_v20 = vsel %vm6919_vm13, %v6892_v12, 4286644096 }
 0x41d   : > { %v7274_v40 = vpack.i.bf16 %v7273_v18, %v7273_v18  ;;  %v7325_v1 = vmax.f32 %v7323_v42, %v7324_v4  ;;  %v7541_v62 = vrot.slane %v13679_v30, 4  ;;  %v7018_v38 = vmax.bf16 %v7016_v20, %v7013_v44 }
 0x41e   : > { %v7738_v59 = vsel %vm7712_vm0, %v13685_v32, %v7737_v58  ;;  %v7312_v19 = vmax.f32 %v7310_v6, %v7311_v57  ;;  %v6901_v25 = vcombine.high %v6899_v8, %v6899_v8  ;;  %v7023_v52 = vsel %vm6919_vm13, %v6900_v13, 4286644096  ;;  %v10724_v58 = vpop.f32.mrf.mxu1 }
 0x41f   : > { %v13696_v34 = vunpack.c.l.b16 %v7274_v40  ;;  %v7333_v43 = vrot.slane %v13498_v24, 4  ;;  %v7025_v21 = vmax.bf16 %v7023_v52, %v13645_v50  ;;  %v7175_v29 = vrot.slane %v7018_v38, %v11724_v7 }
 0x420   : > { %v7313_v28 = vpack.i.bf16 %v7312_v19, %v7312_v19  ;;  %v7346_v42 = vrot.slane %v13504_v31, 4  ;;  %v7326_v36 = vpack.i.bf16 %v7325_v1, %v7325_v1  ;;  %v7295_v26 = vmax.f32 %v13489_v9, %v7294_v2 }
 0x421   : > { %v7739_v15 = vsel %vm7714_vm1, %v13696_v34, %v7738_v59  ;;  %v7334_v6 = vmax.f32 %v13498_v24, %v7333_v43  ;;  %v7176_v4 = vcombine.high %v7175_v29, %v7175_v29  ;;  %v7183_v50 = vrot.slane %v7025_v21, %v11724_v7 }
 0x422   : > { %v7749_v61 = vpack.c.b16 %v7739_v15, %v7739_v15  ;;  %v7549_v18 = vsel %vm7209_vm14, %v7175_v29, 4286644096  ;;  %v7347_v40 = vmax.f32 %v13504_v31, %v7346_v42  ;;  %v13719_v9 = vunpack.c.l.b16 %v7313_v28  ;;  %v10725_v31 = vpop.f32.mrf.mxu1 }
 0x423   : > { %v7551_v12 = vunpack.i.l.bf16 %v7549_v18  ;;  %v7552_v57 = vunpack.i.h.bf16 %v7549_v18  ;;  %v7335_v44 = vrot.slane %v7334_v6, 2  ;;  %v7184_v13 = vcombine.high %v7183_v50, %v7183_v50 }
 0x424   : > { %7753 = vrot.lane.b32.xlu0 %v7749_v61, %s11403_s26  ;;  %v13714_v24 = vsel %vm7209_vm14, %v7176_v4, 4286644096  ;;  %v13717_v20 = vsel %vm7209_vm14, %v7183_v50, 4286644096  ;;  %v13722_v2 = vsel %vm6919_vm13, %v6899_v8, 4286644096  ;;  %v13727_v38 = vunpack.c.l.b16 %v7326_v36 }
 0x425   : > { %v13724_v1 = vmax.f32 %v7551_v12, %v7552_v57  ;;  %v7336_v43 = vmax.f32 %v7334_v6, %v7335_v44  ;;  %v7348_v21 = vrot.slane %v7347_v40, 2  ;;  %v13734_v8 = vsel %vm7209_vm14, %v7184_v13, 4286644096 }
 0x426   : > { %v7740_v42 = vsel %vm7710_vm15, %v13727_v38, %v13719_v9  ;;  %v7296_v61 = vrot.slane %v7295_v26, 2  ;;  %v10726_v4 = vadd.f32 %v10725_v31, %v10724_v58  ;;  %v13740_v50 = vsel %vm6919_vm13, %v6901_v25, 4286644096 }
 0x427   : > { %v7554_v29 = vrot.slane %v13724_v1, 4  ;;  %v7337_v15 = vrot.slane %v7336_v43, 1  ;;  %v7349_v36 = vmax.f32 %v7347_v40, %v7348_v21  ;;  %v7374_v6 = vrot.slane %v13580_v27, 2 }
 0x428   : > { %v7386_v18 = vmax.f32 %v13565_v51, %v7385_v45  ;;  %v7399_v12 = vmax.f32 %v13551_v49, %v7398_v39  ;;  %v7297_v13 = vmax.f32 %v7295_v26, %v7296_v61  ;;  %v6622_v40 = vadd.f32 %v10726_v4, %v13454_v56 }
 0x429   : > { %v7338_v57 = vmax.f32 %v7336_v43, %v7337_v15  ;;  %v7350_v44 = vrot.slane %v7349_v36, 1  ;;  %v7375_v58 = vmax.f32 %v13580_v27, %v7374_v6  ;;  %v7410_v21 = vmax.f32 %v7408_v53, %v7409_v41  ;;  %v11144_v53 = vld [vmem:[%s14670_s5 + $0x20] sm:$0xff]  }
 0x42a   : > { %v7387_v31 = vrot.slane %v7386_v18, 2  ;;  %v7400_v25 = vrot.slane %v7399_v12, 2  ;;  %v7298_v45 = vrot.slane %v7297_v13, 1  ;;  %v6727_v28 = vadd.f32 %v13332_v3, %v6622_v40  ;;  %v11143_v3 = vld [vmem:[%s14670_s5 + $0xe8] sm:$0xff]   ;;  %10747 = vmatpush3.bf16.msra.mxu1 %v11144_v53 }
 0x42b   : > { %v7339_v52 = vpack.i.bf16 %v7338_v57, %v7338_v57  ;;  %v7351_v51 = vmax.f32 %v7349_v36, %v7350_v44  ;;  %v7376_v49 = vrot.slane %v7375_v58, 1  ;;  %v7411_v26 = vrot.slane %v7410_v21, 4  ;;  %10766 = vmatprep.subr.bf16.mxu0 %v11143_v3 }
 0x42c   : > { %v7388_v39 = vmax.f32 %v7386_v18, %v7387_v31  ;;  %v7401_v43 = vmax.f32 %v7399_v12, %v7400_v25  ;;  %v7299_v27 = vmax.f32 %v7297_v13, %v7298_v45  ;;  %v6747_v61 = vmax.f32 %v6727_v28, 0.0  ;;  %v11145_v18 = vld [vmem:[%s14670_s5 + $0xa8] sm:$0xff]  }
 0x42d   : > { %v7352_v15 = vpack.i.bf16 %v7351_v51, %v7351_v51  ;;  %v13756_v56 = vunpack.c.l.b16 %v7339_v52  ;;  %v7377_v4 = vmax.f32 %v7375_v58, %v7376_v49  ;;  %v7412_v19 = vmax.f32 %v7410_v21, %v7411_v26  ;;  %10767 = vmatpush3.bf16.msra.mxu0 %v11145_v18 }
 0x42e   : > { %v7389_v6 = vrot.slane %v7388_v39, 1  ;;  %v7402_v59 = vrot.slane %v7401_v43, 1  ;;  %v7300_v28 = vpack.i.bf16 %v7299_v27, %v7299_v27  ;;  %v6756_v36 = vpack.c.bf16 %v6747_v61, %v6746_v11 }
 0x42f   : > { %v13767_v41 = vunpack.c.l.b16 %v7352_v15  ;;  %v7741_v52 = vsel %vm7712_vm0, %v13756_v56, %v7740_v42  ;;  %v10385_v12 = vpack.c.bf16 %v6747_v61, %v6747_v61  ;;  %v7378_v57 = vpack.i.bf16 %v7377_v4, %v7377_v4 }
 0x430   : > { %v7390_v44 = vmax.f32 %v7388_v39, %v7389_v6  ;;  %v7403_v13 = vmax.f32 %v7401_v43, %v7402_v59  ;;  %v7698_v58 = vunpack.c.l.b16 %v7300_v28  ;;  %v6909_v31 = vrot.slane %v6756_v36, %v12361_v14 }
 0x431   : > { %v7742_v40 = vsel %vm7714_vm1, %v13767_v41, %v7741_v52  ;;  %v7413_v42 = vrot.slane %v7412_v19, 2  ;;  %v6916_v11 = vrot.slane %v10385_v12, %v12361_v14  ;;  %v7702_v15 = vunpack.c.l.b16 %v7378_v57 }
 0x432   : > { %v13779_v48 = vpack.c.b16 %v7742_v40, %v7742_v40  ;;  %v7391_v25 = vpack.i.bf16 %v7390_v44, %v7390_v44  ;;  %v7404_v21 = vpack.i.bf16 %v7403_v13, %v7403_v13  ;;  %v7716_v59 = vsel %vm7710_vm15, %v13719_v9, %v7698_v58 }
 0x433   : > { %v6917_v51 = vcombine.high %v6909_v31, %v6909_v31  ;;  %v7041_v45 = vsel %vm6919_vm13, %v6909_v31, 4286644096  ;;  %v7414_v49 = vmax.f32 %v7412_v19, %v7413_v42  ;;  %v7717_v39 = vsel %vm7712_vm0, %v13727_v38, %v7716_v59 }
 0x434   : > { %7755 = vrot.lane.b32.xlu1 %v13779_v48, %s11403_s26  ;;  %v6918_v43 = vcombine.high %v6916_v11, %v6916_v11  ;;  %v7037_v26 = vsel %vm6919_vm13, %v6916_v11, 4286644096  ;;  %v7718_v27 = vsel %vm7714_vm1, %v13756_v56, %v7717_v39  ;;  %v7703_v3 = vunpack.c.l.b16 %v7391_v25 }
 0x435   : > { %v7030_v61 = vsel %vm6919_vm13, %v6917_v51, 4286644096  ;;  %v7039_v9 = vmax.bf16 %v7037_v26, %v13740_v50  ;;  %v7415_v4 = vrot.slane %v7414_v49, 1  ;;  %v13794_v6 = vpack.c.b16 %v7718_v27, %v7718_v27 }
 0x436   : > { %v7032_v19 = vmax.bf16 %v7030_v61, %v13722_v2  ;;  %v7044_v23 = vsel %vm6919_vm13, %v6918_v43, 4286644096  ;;  %v7590_v53 = vunpack.i.l.bf16 %v13734_v8  ;;  %v7591_v18 = vunpack.i.h.bf16 %v13734_v8 }
 0x437   : > { %v7046_v52 = vmax.bf16 %v7044_v23, %v7041_v45  ;;  %v7199_v28 = vrot.slane %v7039_v9, %v11724_v7  ;;  %v7416_v36 = vmax.f32 %v7414_v49, %v7415_v4  ;;  %7797 = vrot.lane.b32.xlu0 %v13794_v6, %s11403_s26  ;;  %v13804_v12 = vunpack.c.l.b16 %v7404_v21 }
 0x438   : > { %v7191_v50 = vrot.slane %v7032_v19, %v11724_v7  ;;  %v7719_v2 = vsel %vm7710_vm15, %v7703_v3, %v7702_v15  ;;  %v14757_v40 = vunpack.i.h.bf16 %v13549_v47  ;;  %v14758_v58 = vunpack.i.l.bf16 %v13549_v47 }
 0x439   : > { %v7200_v57 = vcombine.high %v7199_v28, %v7199_v28  ;;  %v7207_v44 = vrot.slane %v7046_v52, %v11724_v7  ;;  %v7627_v13 = vsel %vm7209_vm14, %v7199_v28, 4286644096  ;;  %v7417_v45 = vpack.i.bf16 %v7416_v36, %v7416_v36 }
 0x43a   : > { %v7423_v31 = vmax.f32 %v14758_v58, %v14757_v40  ;;  %v7192_v42 = vcombine.high %v7191_v50, %v7191_v50  ;;  %v13814_v11 = vsel %vm7209_vm14, %v7191_v50, 4286644096  ;;  %v7629_v25 = vunpack.i.l.bf16 %v7627_v13 }
 0x43b   : > { %v7630_v59 = vunpack.i.h.bf16 %v7627_v13  ;;  %v7208_v21 = vcombine.high %v7207_v44, %v7207_v44  ;;  %v7640_v51 = vsel %vm7209_vm14, %v7200_v57, 4286644096  ;;  %v7463_v49 = vrot.slane %v13615_v33, 4 }
 0x43c   : > { %v7614_v39 = vsel %vm7209_vm14, %v7192_v42, 4286644096  ;;  %v7642_v26 = vunpack.i.l.bf16 %v7640_v51  ;;  %v7643_v15 = vunpack.i.h.bf16 %v7640_v51  ;;  %v7653_v9 = vsel %vm7209_vm14, %v7207_v44, 4286644096 }
 0x43d   : > { %v7631_v43 = vmax.f32 %v7629_v25, %v7630_v59  ;;  %v7616_v61 = vunpack.i.l.bf16 %v7614_v39  ;;  %v7655_v23 = vunpack.i.l.bf16 %v7653_v9  ;;  %v7656_v52 = vunpack.i.h.bf16 %v7653_v9 }
 0x43e   : > { %v7644_v19 = vmax.f32 %v7642_v26, %v7643_v15  ;;  %v7617_v28 = vunpack.i.h.bf16 %v7614_v39  ;;  %v7666_v36 = vsel %vm7209_vm14, %v7208_v21, 4286644096  ;;  %v13823_v50 = vunpack.c.l.b16 %v7417_v45 }
 0x43f   : > { %v7632_v4 = vrot.slane %v7631_v43, 4  ;;  %v7720_v57 = vsel %vm7712_vm0, %v13804_v12, %v7719_v2  ;;  %v7657_v58 = vmax.f32 %v7655_v23, %v7656_v52  ;;  %v7668_v42 = vunpack.i.l.bf16 %v7666_v36 }
 0x440   : > { %v7645_v40 = vrot.slane %v7644_v19, 4  ;;  %v7669_v25 = vunpack.i.h.bf16 %v7666_v36  ;;  %v7721_v44 = vsel %vm7714_vm1, %v13823_v50, %v7720_v57  ;;  %v7424_v59 = vrot.slane %v7423_v31, 4 }
 0x441   : > { %v7633_v13 = vmax.f32 %v7631_v43, %v7632_v4  ;;  %v7743_v51 = vsel %vm7710_vm15, %v13804_v12, %v7703_v3  ;;  %v7658_v21 = vrot.slane %v7657_v58, 4  ;;  %v13831_v45 = vpack.c.b16 %v7721_v44, %v7721_v44 }
 0x442   : > { %v7646_v26 = vmax.f32 %v7644_v19, %v7645_v40  ;;  %v7670_v15 = vmax.f32 %v7668_v42, %v7669_v25  ;;  %v7425_v9 = vmax.f32 %v7423_v31, %v7424_v59  ;;  %v13835_v2 = vsel %vm7712_vm0, %v13823_v50, %v7743_v51  ;;  %v11146_v59 = vld [vmem:[%s14670_s5 + $0x58] sm:$0xff]   ;;  %v11147_v51 = vld [vmem:[%s14670_s5 + $0xe0] sm:$0xff]  }
 0x443   : > { %v7634_v39 = vrot.slane %v7633_v13, 2  ;;  %v7464_v43 = vmax.f32 %v13615_v33, %v7463_v49  ;;  %v7659_v52 = vmax.f32 %v7657_v58, %v7658_v21  ;;  %7799 = vrot.lane.b32.xlu1 %v13831_v45, %s11403_s26  ;;  %v7478_v3 = vrot.slane %v13640_v63, 2  ;;  %10748 = vmatprep.subr.bf16.mxu1 %v11146_v59 }
 0x444   : > { %v7647_v23 = vrot.slane %v7646_v26, 2  ;;  %v7671_v19 = vrot.slane %v7670_v15, 4  ;;  %v7426_v36 = vrot.slane %v7425_v9, 2  ;;  %v7489_v40 = vrot.slane %v13617_v10, 4  ;;  %10768 = vmatprep.subr.bf16.mxu0 %v11147_v51 }
 0x445   : > { %v7635_v4 = vmax.f32 %v7633_v13, %v7634_v39  ;;  %v7465_v57 = vrot.slane %v7464_v43, 2  ;;  %v7660_v25 = vrot.slane %v7659_v52, 2  ;;  %v7479_v44 = vmax.f32 %v13640_v63, %v7478_v3  ;;  %v11148_v39 = vld [vmem:[%s14670_s5 + $0x18] sm:$0xff]  }
 0x446   : > { %v13842_v42 = vmax.f32 %v7646_v26, %v7647_v23  ;;  %v13845_v33 = vmax.f32 %v7670_v15, %v7671_v19  ;;  %v7427_v49 = vmax.f32 %v7425_v9, %v7426_v36  ;;  %v7490_v58 = vmax.f32 %v13617_v10, %v7489_v40  ;;  %v11149_v10 = vld [vmem:[%s14670_s5 + $0xa0] sm:$0xff]   ;;  %v11150_v9 = vld [vmem:[%s14670_s5 + $0x50] sm:$0xff]   ;;  %10749 = vmatpush3.bf16.msra.mxu1 %v11148_v39 }
 0x447   : > { %v7636_v31 = vrot.slane %v7635_v4, 1  ;;  %v7466_v13 = vmax.f32 %v7464_v43, %v7465_v57  ;;  %v13857_v26 = vmax.f32 %v7616_v61, %v7617_v28  ;;  %v7480_v15 = vrot.slane %v7479_v44, 1  ;;  %v11151_v43 = vld [vmem:[%s14670_s5 + $0xd8] sm:$0xff]   ;;  %10769 = vmatpush3.bf16.msra.mxu0 %v11149_v10  ;;  %10750 = vmatprep.subr.bf16.mxu1 %v11150_v9 }
 0x448   : > { %v7649_v21 = vrot.slane %v13842_v42, 1  ;;  %v13871_v23 = vmax.f32 %v7659_v52, %v7660_v25  ;;  %v7428_v61 = vrot.slane %v7427_v49, 1  ;;  %v7502_v36 = vrot.slane %v13625_v55, 4  ;;  %10770 = vmatprep.subr.bf16.mxu0 %v11151_v43 }
 0x449   : > { %v13859_v63 = vmax.f32 %v7635_v4, %v7636_v31  ;;  %v7467_v28 = vrot.slane %v7466_v13, 1  ;;  %v7491_v4 = vrot.slane %v7490_v58, 2  ;;  %v7481_v19 = vmax.f32 %v7479_v44, %v7480_v15 }
 0x44a   : > { %v14759_v57 = vrot.slane %v13603_v37, 4  ;;  %v7429_v31 = vmax.f32 %v7427_v49, %v7428_v61  ;;  %v14760_v25 = vunpack.i.h.bf16 %v13492_v35  ;;  %v14761_v27 = vunpack.i.l.bf16 %v13492_v35 }
 0x44b   : > { %v7468_v47 = vmax.f32 %v7466_v13, %v7467_v28  ;;  %v7492_v52 = vmax.f32 %v7490_v58, %v7491_v4  ;;  %v7482_v51 = vpack.i.bf16 %v7481_v19, %v7481_v19  ;;  %v7503_v44 = vmax.f32 %v13625_v55, %v7502_v36 }
 0x44c   : > { %v7451_v40 = vmax.f32 %v13603_v37, %v14759_v57  ;;  %v7358_v59 = vmax.f32 %v14761_v27, %v14760_v25  ;;  %v7772_v3 = vsel %vm7710_vm15, %v13756_v56, %v13727_v38  ;;  %v7430_v37 = vpack.i.bf16 %v7429_v31, %v7429_v31 }
 0x44d   : > { %v7469_v39 = vpack.i.bf16 %v7468_v47, %v7468_v47  ;;  %v7493_v49 = vrot.slane %v7492_v52, 1  ;;  %v7504_v58 = vrot.slane %v7503_v44, 2  ;;  %v7708_v10 = vunpack.c.l.b16 %v7482_v51 }
 0x44e   : > { %v7452_v15 = vrot.slane %v7451_v40, 2  ;;  %v7359_v13 = vrot.slane %v7358_v59, 4  ;;  %v13888_v35 = vsel %vm7712_vm0, %v13767_v41, %v7772_v3  ;;  %v13890_v27 = vunpack.c.l.b16 %v7430_v37 }
 0x44f   : > { %v7494_v55 = vmax.f32 %v7492_v52, %v7493_v49  ;;  %v7707_v9 = vunpack.c.l.b16 %v7469_v39  ;;  %v7505_v4 = vmax.f32 %v7503_v44, %v7504_v58  ;;  %v14762_v38 = vunpack.i.h.bf16 %v13612_v46 }
 0x450   : > { %v7453_v61 = vmax.f32 %v7451_v40, %v7452_v15  ;;  %v7360_v28 = vmax.f32 %v7358_v59, %v7359_v13  ;;  %v14763_v56 = vunpack.i.l.bf16 %v13612_v46  ;;  %v7530_v43 = vrot.slane %v13683_v5, 2  ;;  %v11153_v15 = vld [vmem:[%s14670_s5 + $0x98] sm:$0xff]  }
 0x451   : > { %v7745_v36 = vsel %vm7714_vm1, %v13890_v27, %v13835_v2  ;;  %v7495_v41 = vpack.i.bf16 %v7494_v55, %v7494_v55  ;;  %v7746_v3 = vsel %vm7710_vm15, %v7708_v10, %v7707_v9  ;;  %v7506_v31 = vrot.slane %v7505_v4, 1  ;;  %v11152_v2 = vld [vmem:[%s14670_s5 + $0x10] sm:$0xff]   ;;  %10771 = vmatpush3.bf16.msra.mxu0 %v11153_v15 }
 0x452   : > { %v7454_v19 = vrot.slane %v7453_v61, 1  ;;  %v7514_v47 = vmax.f32 %v14763_v56, %v14762_v38  ;;  %v7361_v57 = vrot.slane %v7360_v28, 2  ;;  %v13901_v40 = vpack.c.b16 %v7745_v36, %v7745_v36  ;;  %10751 = vmatpush3.bf16.msra.mxu1 %v11152_v2 }
 0x453   : > { %v7709_v59 = vunpack.c.l.b16 %v7495_v41  ;;  %v7531_v46 = vmax.f32 %v13683_v5, %v7530_v43  ;;  %v7542_v44 = vmax.f32 %v13679_v30, %v7541_v62  ;;  %v7507_v37 = vmax.f32 %v7505_v4, %v7506_v31  ;;  %v11155_v31 = vld [vmem:[%s14670_s5 + $0xd0] sm:$0xff]  }
 0x454   : > { %v7455_v52 = vmax.f32 %v7453_v61, %v7454_v19  ;;  %v7515_v25 = vrot.slane %v7514_v47, 4  ;;  %v7362_v51 = vmax.f32 %v7360_v28, %v7361_v57  ;;  %7757 = vrot.lane.b32.xlu0 %v13901_v40, %s11403_s26  ;;  %v7555_v5 = vmax.f32 %v13724_v1, %v7554_v29  ;;  %v11154_v57 = vld [vmem:[%s14670_s5 + $0x48] sm:$0xff]   ;;  %10772 = vmatprep.subr.bf16.mxu0 %v11155_v31 }
 0x455   : > { %v7747_v30 = vsel %vm7712_vm0, %v7709_v59, %v7746_v3  ;;  %v7778_v13 = vsel %vm7710_vm15, %v7709_v59, %v7708_v10  ;;  %v7532_v58 = vrot.slane %v7531_v46, 1  ;;  %v7508_v61 = vpack.i.bf16 %v7507_v37, %v7507_v37  ;;  %10752 = vmatprep.subr.bf16.mxu1 %v11154_v57 }
 0x456   : > { %v7456_v39 = vpack.i.bf16 %v7455_v52, %v7455_v52  ;;  %v7516_v49 = vmax.f32 %v7514_v47, %v7515_v25  ;;  %v7363_v62 = vrot.slane %v7362_v51, 1  ;;  %v7543_v19 = vrot.slane %v7542_v44, 2  ;;  %v11156_v52 = vld [vmem:[%s14670_s5 + $0x8] sm:$0xff]  }
 0x457   : > { %v7533_v4 = vmax.f32 %v7531_v46, %v7532_v58  ;;  %v7556_v56 = vrot.slane %v7555_v5, 2  ;;  %v14764_v47 = vunpack.i.h.bf16 %v13714_v24  ;;  %v14765_v43 = vunpack.i.l.bf16 %v13714_v24  ;;  %10753 = vmatpush3.bf16.msra.mxu1 %v11156_v52 }
 0x458   : > { %v7706_v55 = vunpack.c.l.b16 %v7456_v39  ;;  %v7517_v28 = vrot.slane %v7516_v49, 2  ;;  %v7364_v38 = vmax.f32 %v7362_v51, %v7363_v62  ;;  %v7736_v29 = vunpack.c.l.b16 %v7508_v61 }
 0x459   : > { %v7566_v1 = vmax.f32 %v14765_v43, %v14764_v47  ;;  %v7544_v3 = vmax.f32 %v7542_v44, %v7543_v19  ;;  %v7534_v51 = vpack.i.bf16 %v7533_v4, %v7533_v4  ;;  %v7557_v46 = vmax.f32 %v7555_v5, %v7556_v56 }
 0x45a   : > { %v7722_v36 = vsel %vm7710_vm15, %v7707_v9, %v7706_v55  ;;  %v7518_v41 = vmax.f32 %v7516_v49, %v7517_v28  ;;  %v7365_v25 = vpack.i.bf16 %v7364_v38, %v7364_v38  ;;  %v11157_v9 = vld [vmem:[%s14670_s5 + $0x90] sm:$0xff]   ;;  %v7748_v44 = vsel %vm7714_vm1, %v7736_v29, %v7747_v30 }
 0x45b   : > { %v7723_v24 = vsel %vm7712_vm0, %v7708_v10, %v7722_v36  ;;  %v7779_v37 = vsel %vm7712_vm0, %v7736_v29, %v7778_v13  ;;  %v13941_v39 = vpack.c.b16 %v7748_v44, %v7748_v44  ;;  %v7545_v62 = vrot.slane %v7544_v3, 1  ;;  %10773 = vmatpush3.bf16.msra.mxu0 %v11157_v9 }
 0x45c   : > { %v7724_v2 = vsel %vm7714_vm1, %v7709_v59, %v7723_v24  ;;  %v7519_v15 = vrot.slane %v7518_v41, 1  ;;  %v7766_v10 = vunpack.c.l.b16 %v7365_v25  ;;  %v7662_v5 = vrot.slane %v13871_v23, 1 }
 0x45d   : > { %v13943_v49 = vpack.c.b16 %v7724_v2, %v7724_v2  ;;  %v7558_v61 = vrot.slane %v7557_v46, 1  ;;  %v7567_v30 = vrot.slane %v7566_v1, 4  ;;  %7759 = vrot.lane.b32.xlu1 %v13941_v39, %s11403_s26  ;;  %v7546_v13 = vmax.f32 %v7544_v3, %v7545_v62 }
 0x45e   : > { %v7520_v58 = vmax.f32 %v7518_v41, %v7519_v15  ;;  %v7774_v59 = vsel %vm7714_vm1, %v7766_v10, %v13888_v35  ;;  %v7789_v55 = vunpack.c.l.b16 %v7534_v51  ;;  %v14766_v28 = vunpack.i.h.bf16 %v13717_v20 }
 0x45f   : > { %7801 = vrot.lane.b32.xlu0 %v13943_v49, %s11403_s26  ;;  %v14767_v19 = vunpack.i.l.bf16 %v13717_v20  ;;  %v13956_v4 = vpack.c.b16 %v7774_v59, %v7774_v59  ;;  %v7559_v47 = vmax.f32 %v7557_v46, %v7558_v61  ;;  %v7568_v43 = vmax.f32 %v7566_v1, %v7567_v30 }
 0x460   : > { %v7521_v56 = vpack.i.bf16 %v7520_v58, %v7520_v58  ;;  %v7547_v29 = vpack.i.bf16 %v7546_v13, %v7546_v13  ;;  %v14768_v41 = vunpack.i.h.bf16 %v13568_v0  ;;  %v14769_v57 = vunpack.i.l.bf16 %v13568_v0 }
 0x461   : > { %v7579_v38 = vmax.f32 %v14767_v19, %v14766_v28  ;;  %v7775_v35 = vsel %vm7710_vm15, %v13823_v50, %v13804_v12  ;;  %v7560_v52 = vpack.i.bf16 %v7559_v47, %v7559_v47  ;;  %v7569_v20 = vrot.slane %v7568_v43, 2 }
 0x462   : > { %v7436_v31 = vmax.f32 %v14769_v57, %v14768_v41  ;;  %v7768_v3 = vunpack.c.l.b16 %v7521_v56  ;;  %v13967_v24 = vsel %vm7712_vm0, %v13890_v27, %v7775_v35  ;;  %v7790_v1 = vunpack.c.l.b16 %v7547_v29 }
 0x463   : > { %v7580_v36 = vrot.slane %v7579_v38, 4  ;;  %7817 = vrot.lane.b32.xlu0 %v13956_v4, %s11403_s26  ;;  %v7592_v0 = vmax.f32 %v7590_v53, %v7591_v18  ;;  %v7570_v50 = vmax.f32 %v7568_v43, %v7569_v20  ;;  %v7791_v46 = vunpack.c.l.b16 %v7560_v52 }
 0x464   : > { %v7437_v51 = vrot.slane %v7436_v31, 4  ;;  %v7780_v12 = vsel %vm7714_vm1, %v7768_v3, %v7779_v37  ;;  %v7638_v9 = vpack.i.bf16 %v13859_v63, %v13859_v63  ;;  %v7793_v44 = vsel %vm7710_vm15, %v7790_v1, %v7789_v55 }
 0x465   : > { %v7581_v25 = vmax.f32 %v7579_v38, %v7580_v36  ;;  %v13978_v27 = vpack.c.b16 %v7780_v12, %v7780_v12  ;;  %v7571_v10 = vrot.slane %v7570_v50, 1  ;;  %v7794_v62 = vsel %vm7712_vm0, %v7791_v46, %v7793_v44  ;;  %v11159_v12 = vld [vmem:[%s14670_s5 + $0xc8] sm:$0xff]  }
 0x466   : > { %v7438_v15 = vmax.f32 %v7436_v31, %v7437_v51  ;;  %v7807_v58 = vsel %vm7710_vm15, %v7791_v46, %v7790_v1  ;;  %v7593_v8 = vrot.slane %v7592_v0, 4  ;;  %v7650_v63 = vmax.f32 %v13842_v42, %v7649_v21  ;;  %10774 = vmatprep.subr.bf16.mxu0 %v11159_v12 }
 0x467   : > { %v7582_v2 = vrot.slane %v7581_v25, 2  ;;  %7821 = vrot.lane.b32.xlu0 %v13978_v27, %s11403_s26  ;;  %v7619_v37 = vrot.slane %v13857_v26, 4  ;;  %v7572_v61 = vmax.f32 %v7570_v50, %v7571_v10  ;;  %v7663_v59 = vmax.f32 %v13871_v23, %v7662_v5  ;;  %v11160_v50 = vld [vmem:[%s14670_s5] sm:$0xff]   ;;  %v11161_v10 = vld [vmem:[%s14670_s5 + $0x88] sm:$0xff]  }
 0x468   : > { %v7439_v18 = vrot.slane %v7438_v15, 2  ;;  %v7594_v30 = vmax.f32 %v7592_v0, %v7593_v8  ;;  %v14770_v13 = vrot.slane %v13845_v33, 2  ;;  %v7651_v38 = vpack.i.bf16 %v7650_v63, %v7650_v63  ;;  %10775 = vmatpush3.bf16.msra.mxu0 %v11161_v10 }
 0x469   : > { %v7583_v53 = vmax.f32 %v7581_v25, %v7582_v2  ;;  %v13993_v56 = vunpack.c.l.b16 %v7638_v9  ;;  %v7573_v47 = vpack.i.bf16 %v7572_v61, %v7572_v61  ;;  %v7664_v29 = vpack.i.bf16 %v7663_v59, %v7663_v59 }
 0x46a   : > { %v7674_v55 = vmax.f32 %v13845_v33, %v14770_v13  ;;  %v7440_v19 = vmax.f32 %v7438_v15, %v7439_v18  ;;  %v7595_v43 = vrot.slane %v7594_v30, 2  ;;  %v13995_v41 = vunpack.c.l.b16 %v7651_v38 }
 0x46b   : > { %v7584_v28 = vrot.slane %v7583_v53, 1  ;;  %v7620_v57 = vmax.f32 %v13857_v26, %v7619_v37  ;;  %v7792_v23 = vunpack.c.l.b16 %v7573_v47  ;;  %v13998_v35 = vunpack.c.l.b16 %v7664_v29  ;;  %v11158_v26 = vld [vmem:[%s14670_s5 + $0x40] sm:$0xff]  }
 0x46c   : > { %v7675_v36 = vrot.slane %v7674_v55, 1  ;;  %v7441_v21 = vrot.slane %v7440_v19, 1  ;;  %v7596_v5 = vmax.f32 %v7594_v30, %v7595_v43  ;;  %v7849_v52 = vsel %vm7710_vm15, %v13995_v41, %v13993_v56  ;;  %10754 = vmatprep.subr.bf16.mxu1 %v11158_v26 }
 0x46d   : > { %v7585_v42 = vmax.f32 %v7583_v53, %v7584_v28  ;;  %v7621_v20 = vrot.slane %v7620_v57, 2  ;;  %v7795_v1 = vsel %vm7714_vm1, %v7792_v23, %v7794_v62  ;;  %v7808_v25 = vsel %vm7712_vm0, %v7792_v23, %v7807_v58  ;;  %10755 = vmatpush3.bf16.msra.mxu1 %v11160_v50 }
 0x46e   : > { %v7676_v31 = vmax.f32 %v7674_v55, %v7675_v36  ;;  %v7442_v3 = vmax.f32 %v7440_v19, %v7441_v21  ;;  %v7597_v51 = vrot.slane %v7596_v5, 1  ;;  %v14014_v9 = vpack.c.b16 %v7795_v1, %v7795_v1  ;;  %11008 = vmatprep.subr.bf16.mxu1 %v14745_v60 }
 0x46f   : > { %v7586_v33 = vpack.i.bf16 %v7585_v42, %v7585_v42  ;;  %v7813_v15 = vsel %vm7710_vm15, %v7792_v23, %v7791_v46  ;;  %v7850_v8 = vsel %vm7712_vm0, %v13998_v35, %v7849_v52  ;;  %v7622_v53 = vmax.f32 %v7620_v57, %v7621_v20 }
 0x470   : > { %v7677_v0 = vpack.i.bf16 %v7676_v31, %v7676_v31  ;;  %v7443_v2 = vpack.i.bf16 %v7442_v3, %v7442_v3  ;;  %v7598_v62 = vmax.f32 %v7596_v5, %v7597_v51  ;;  %v14771_v18 = vunpack.i.h.bf16 %v13814_v11  ;;  %7803 = vrot.lane.b32.xlu1 %v14014_v9, %s11403_s26  ;;  %v11164_v5 = vld [vmem:[%s14670_s5 + $0x80] sm:$0xff]  }
 0x471   : > { %v7806_v44 = vunpack.c.l.b16 %v7586_v33  ;;  %v14772_v63 = vunpack.i.l.bf16 %v13814_v11  ;;  %v7623_v28 = vrot.slane %v7622_v53, 1  ;;  %v7088_v33 = vcombine.high %v13447_v17, %v13447_v17 }
 0x472   : > { %v7848_v58 = vunpack.c.l.b16 %v7677_v0  ;;  %v7767_v61 = vunpack.c.l.b16 %v7443_v2  ;;  %v7599_v13 = vpack.i.bf16 %v7598_v62, %v7598_v62  ;;  %v7211_v1 = vsel %vm7209_vm14, %v13402_v22, 4286644096 }
 0x473   : > { %v7605_v37 = vmax.f32 %v14772_v63, %v14771_v18  ;;  %v7809_v46 = vsel %vm7714_vm1, %v7806_v44, %v7808_v25  ;;  %v7814_v30 = vsel %vm7712_vm0, %v7806_v44, %v7813_v15  ;;  %v7624_v43 = vmax.f32 %v7622_v53, %v7623_v28 }
 0x474   : > { %v14030_v59 = vpack.c.b16 %v7809_v46, %v7809_v46  ;;  %v7851_v55 = vsel %vm7714_vm1, %v7848_v58, %v7850_v8  ;;  %v7777_v11 = vsel %vm7714_vm1, %v7767_v61, %v13967_v24  ;;  %v7812_v47 = vunpack.c.l.b16 %v7599_v13  ;;  %v11163_v24 = vld [vmem:[%s14670_s5 + $0xc0] sm:$0xff]  }
 0x475   : > { %v7852_v19 = vpack.c.b16 %v7851_v55, %v7851_v55  ;;  %v14038_v38 = vpack.c.b16 %v7777_v11, %v7777_v11  ;;  %v7606_v29 = vrot.slane %v7605_v37, 4  ;;  %v7625_v42 = vpack.i.bf16 %v7624_v43, %v7624_v43  ;;  %10776 = vmatprep.subr.bf16.mxu0 %v11163_v24 }
 0x476   : > { %7843 = vrot.lane.b32.xlu0 %v14030_v59, %s11403_s26  ;;  %v7815_v36 = vsel %vm7714_vm1, %v7812_v47, %v7814_v30  ;;  %10777 = vmatpush3.bf16.msra.mxu0 %v11164_v5  ;;  %v7276_v26 = vsel %vm7209_vm14, %v7088_v33, 4286644096  ;;  %v7213_v44 = vunpack.i.l.bf16 %v7211_v1  ;;  %v7214_v2 = vunpack.i.h.bf16 %v7211_v1 }
 0x477   : > { %7819 = vrot.lane.b32.xlu1 %v14038_v38, %s11403_s26  ;;  %v7816_v21 = vpack.c.b16 %v7815_v36, %v7815_v36  ;;  %v8004_v57 = vrot.slane %v7852_v19, %v12361_v14  ;;  %v7607_v23 = vmax.f32 %v7605_v37, %v7606_v29  ;;  %v7830_v31 = vunpack.c.l.b16 %v7625_v42 }
 0x478   : > { %v7278_v10 = vunpack.i.l.bf16 %v7276_v26  ;;  %v7279_v22 = vunpack.i.h.bf16 %v7276_v26  ;;  %v7215_v58 = vmax.f32 %v7213_v44, %v7214_v2 }
 0x479   : > { %v7980_v3 = vrot.slane %v7816_v21, %v12361_v14  ;;  %v7608_v52 = vrot.slane %v7607_v23, 2  ;;  %v7839_v20 = vsel %vm7710_vm15, %v13993_v56, %v7830_v31 }
 0x47a   : > { %v7840_v51 = vsel %vm7712_vm0, %v13995_v41, %v7839_v20  ;;  %v7280_v53 = vmax.f32 %v7278_v10, %v7279_v22  ;;  %v7216_v63 = vrot.slane %v7215_v58, 4 }
 0x47b   : > { %7823 = vrot.lane.b32.xlu1 %v7816_v21, %s11403_s26  ;;  %v14058_v25 = vcombine.low %v7980_v3, %v8004_v57  ;;  %v7609_v0 = vmax.f32 %v7607_v23, %v7608_v52  ;;  %v7841_v17 = vsel %vm7714_vm1, %v13998_v35, %v7840_v51 }
 0x47c   : > { %v7842_v12 = vpack.c.b16 %v7841_v17, %v7841_v17  ;;  %v7281_v46 = vrot.slane %v7280_v53, 4  ;;  %v7217_v61 = vmax.f32 %v7215_v58, %v7216_v63 }
 0x47d   : > { %v7610_v50 = vrot.slane %v7609_v0, 1 }
 0x47e   : > { %v7282_v30 = vmax.f32 %v7280_v53, %v7281_v46  ;;  %v7218_v13 = vrot.slane %v7217_v61, 2 }
 0x47f   : > { %7845 = vrot.lane.b32.xlu1 %v7842_v12, %s11403_s26  ;;  %v7611_v15 = vmax.f32 %v7609_v0, %v7610_v50  ;;  %s10167_s26 = scalar_lea.sflag [#allocation3], %s485_s27 }
 0x480   : > { %v7283_v55 = vrot.slane %v7282_v30, 2  ;;  %v7219_v28 = vmax.f32 %v7217_v61, %v7218_v13 }
 0x481   : > { %v7612_v62 = vpack.i.bf16 %v7611_v15, %v7611_v15 }
 0x482   : > { %v7284_v11 = vmax.f32 %v7282_v30, %v7283_v55  ;;  %v7220_v19 = vrot.slane %v7219_v28, 1 }
 0x483   : > { %v7829_v8 = vunpack.c.l.b16 %v7612_v62 }
 0x484   : > { %v7285_v47 = vrot.slane %v7284_v11, 1  ;;  %v7221_v43 = vmax.f32 %v7219_v28, %v7220_v19 }
 0x485   : > { %v7833_v18 = vsel %vm7710_vm15, %v7830_v31, %v7829_v8 }
 0x486   : > { %v7834_v35 = vsel %vm7712_vm0, %v13993_v56, %v7833_v18  ;;  %v7286_v29 = vmax.f32 %v7284_v11, %v7285_v47  ;;  %v7222_v36 = vpack.i.bf16 %v7221_v43, %v7221_v43  ;;  %v7769_v56 = vsel %vm7710_vm15, %v13685_v32, %v13647_v16  ;;  %v11162_v43 = vld [vmem:[%s14670_s5 + $0x118] sm:$0xff]  }
 0x487   : > { %v14071_v37 = vsel %vm7714_vm1, %v13995_v41, %v7834_v35  ;;  %v7770_v24 = vsel %vm7712_vm0, %v13696_v34, %v7769_v56 }
 0x488   : > { %v7287_v42 = vpack.i.bf16 %v7286_v29, %v7286_v29  ;;  %v7694_v21 = vunpack.c.l.b16 %v7222_v36 }
 0x48a   : > { %v7711_v41 = vsel %vm7710_vm15, %v13649_v54, %v7694_v21  ;;  %v7765_v57 = vunpack.c.l.b16 %v7287_v42  ;;  %v7836_v42 = vpack.c.b16 %v14071_v37, %v14071_v37 }
 0x48b   : > { %v7713_v23 = vsel %vm7712_vm0, %v13647_v16, %v7711_v41  ;;  %v11165_v41 = vld [vmem:[%s14670_s5 + $0x110] sm:$0xff]  }
 0x48c   : > { %v7715_v5 = vsel %vm7714_vm1, %v13685_v32, %v7713_v23  ;;  %v7771_v33 = vsel %vm7714_vm1, %v7765_v57, %v7770_v24  ;;  %v7956_v23 = vrot.slane %v13978_v27, %v12361_v14 }
 0x48d   : > { %v7725_v3 = vpack.c.b16 %v7715_v5, %v7715_v5  ;;  %v7781_v52 = vpack.c.b16 %v7771_v33, %v7771_v33  ;;  %v7932_v33 = vrot.slane %v14038_v38, %v12361_v14 }
 0x496   : > { %v7754_v31 = vpop.permute.xlu0 %7753 }
 0x497   : > { %v7855_v1 = vsel %vm4815_vm12, %v7725_v3, %v7754_v31 }
 0x4a6   : > { %v7756_v0 = vpop.permute.xlu1 %7755 }
 0x4a7   : > { %v7858_v32 = vsel %vm4815_vm12, %v13794_v6, %v7756_v0 }
 0x4a9   : > { %v7798_v20 = vpop.permute.xlu0 %7797 }
 0x4aa   : > { %v7867_v54 = vsel %vm4815_vm12, %v7781_v52, %v7798_v20  ;;  %v8120_v52 = vcombine.low %v7932_v33, %v7956_v23 }
 0x4ab   : > { %v7909_v51 = vcombine.low %v7855_v1, %v7867_v54  ;;  %v11167_v1 = vld [vmem:[%s14670_s5 + $0x100] sm:$0xff]   ;;  %v8135_v54 = vrot.slane %v14058_v25, %v12361_v14  ;;  %v11169_v25 = vld [vmem:[%s14672_s7 + $0x38] sm:$0xff]  }
 0x4ac   : > { %v8128_v0 = vrot.slane %v8120_v52, %v12361_v14 }
 0x4ad   : > { %v7917_v6 = vrot.slane %v7909_v51, %v12361_v14 }
 0x4b5   : > { %v7800_v16 = vpop.permute.xlu1 %7799 }
 0x4b6   : > { %v7870_v34 = vsel %vm4815_vm12, %v13956_v4, %v7800_v16  ;;  %v11168_v16 = vld [vmem:[%s14672_s7 + $0x78] sm:$0xff]  }
 0x4b7   : > { %v7933_v12 = vcombine.low %v7858_v32, %v7870_v34  ;;  %v11171_v34 = vld [vmem:[%s14672_s7 + $0xb8] sm:$0xff]   ;;  %v11172_v32 = vld [vmem:[%s14672_s7 + $0x70] sm:$0xff]   ;;  %10789 = vmatprep.subr.bf16.mxu0 %v11168_v16 }
 0x4b9   : > { %v7941_v10 = vrot.slane %v7933_v12, %v12361_v14  ;;  %v11174_v12 = vld [vmem:[%s14672_s7 + $0xf0] sm:$0xff]  }
 0x4bb   : > { %v10387_v18 = vcombine.low %v7917_v6, %v7941_v10  ;;  %v11177_v10 = vld [vmem:[%s14672_s7 + $0x28] sm:$0xff]   ;;  %v11183_v6 = vld [vmem:[%s14672_s7 + $0xa0] sm:$0xff]  }
 0x4c6   : > { %v7758_v17 = vpop.permute.xlu0 %7757 }
 0x4c7   : > { %v7861_v15 = vsel %vm4815_vm12, %v13831_v45, %v7758_v17  ;;  %v8136_v17 = vcombine.low %v8128_v0, %v8135_v54 }
 0x4cf   : > { %v7760_v50 = vpop.permute.xlu1 %7759 }
 0x4d0   : > { %v7864_v58 = vsel %vm4815_vm12, %v13943_v49, %v7760_v50  ;;  %v8094_v49 = vrot.slane %v10387_v18, %v12361_v14  ;;  %v11173_v50 = vld [vmem:[%s14672_s7 + $0x30] sm:$0xff]   ;;  %v11185_v18 = vld [vmem:[%s14672_s7 + $0x18] sm:$0xff]  }
 0x4d1   : > { %v7802_v26 = vpop.permute.xlu0 %7801 }
 0x4d2   : > { %v7873_v2 = vsel %vm4815_vm12, %v14038_v38, %v7802_v26  ;;  %v11170_v26 = vld [vmem:[%s14672_s7 + $0xf8] sm:$0xff]  }
 0x4d3   : > { %v7957_v22 = vcombine.low %v7861_v15, %v7873_v2  ;;  %v11176_v2 = vld [vmem:[%s14672_s7 + $0x68] sm:$0xff]  }
 0x4d5   : > { %v7818_v44 = vpop.permute.xlu0 %7817  ;;  %v7965_v63 = vrot.slane %v7957_v22, %v12361_v14  ;;  %v11179_v22 = vld [vmem:[%s14672_s7 + $0xa8] sm:$0xff]  }
 0x4d6   : > { %v7879_v55 = vsel %vm4815_vm12, %v13779_v48, %v7818_v44  ;;  %v11175_v44 = vld [vmem:[%s14672_s7 + $0xb0] sm:$0xff]  }
 0x4d9   : > { %v7822_v8 = vpop.permute.xlu0 %7821 }
 0x4da   : > { %v7885_v36 = vsel %vm4815_vm12, %v13941_v39, %v7822_v8  ;;  %v11184_v8 = vld [vmem:[%s14672_s7 + $0x58] sm:$0xff]  }
 0x4e2   : > { %v7804_v62 = vpop.permute.xlu1 %7803 }
 0x4e3   : > { %v7876_v4 = vsel %vm4815_vm12, %v13978_v27, %v7804_v62  ;;  %v11180_v62 = vld [vmem:[%s14672_s7 + $0x60] sm:$0xff]  }
 0x4e4   : > { %v7981_v53 = vcombine.low %v7864_v58, %v7876_v4  ;;  %v11181_v4 = vld [vmem:[%s14672_s7 + $0x20] sm:$0xff]  }
 0x4e6   : > { %v7989_v35 = vrot.slane %v7981_v53, %v12361_v14  ;;  %v11186_v53 = vld [vmem:[%s14672_s7 + $0xd8] sm:$0xff]  }
 0x4e8   : > { %v10389_v46 = vcombine.low %v7965_v63, %v7989_v35  ;;  %v7844_v30 = vpop.permute.xlu0 %7843  ;;  %v11187_v63 = vld [vmem:[%s14672_s7 + $0x98] sm:$0xff]   ;;  %v11188_v35 = vld [vmem:[%s14672_s7 + $0x50] sm:$0xff]  }
 0x4e9   : > { %v7820_v45 = vpop.permute.xlu1 %7819  ;;  %v7891_v29 = vsel %vm4815_vm12, %v14014_v9, %v7844_v30  ;;  %v11192_v30 = vld [vmem:[%s14672_s7 + $0x48] sm:$0xff]  }
 0x4ea   : > { %v7882_v61 = vsel %vm4815_vm12, %v13901_v40, %v7820_v45  ;;  %v8108_v13 = vrot.slane %v10389_v46, %v12361_v14  ;;  %v7910_v40 = vcombine.low %v7879_v55, %v7861_v15  ;;  %v7958_v48 = vcombine.low %v7885_v36, %v7891_v29  ;;  %v11178_v15 = vld [vmem:[%s14672_s7 + $0xe8] sm:$0xff]   ;;  %v11190_v45 = vld [vmem:[%s14672_s7 + $0xd0] sm:$0xff]   ;;  %v11202_v29 = vld [vmem:[%s14672_s7 + $0x1f8] sm:$0xff]  }
 0x4eb   : > { %v7934_v11 = vcombine.low %v7882_v61, %v7864_v58  ;;  %v11182_v58 = vld [vmem:[%s14672_s7 + $0xe0] sm:$0xff]   ;;  %v11189_v46 = vld [vmem:[%s14672_s7 + $0x10] sm:$0xff]   ;;  %v11195_v55 = vld [vmem:[%s14672_s7 + $0x88] sm:$0xff]  }
 0x4ec   : > { %v8116_v19 = vcombine.low %v8094_v49, %v8108_v13  ;;  %v8117_v47 = vcombine.high %v8094_v49, %v8108_v13  ;;  %v7924_v37 = vrot.slane %v7910_v40, %v12361_v14  ;;  %v7972_v24 = vrot.slane %v7958_v48, %v12361_v14  ;;  %v11191_v61 = vld [vmem:[%s14672_s7 + $0x90] sm:$0xff]   ;;  %v11194_v49 = vld [vmem:[%s14672_s7 + $0xc8] sm:$0xff]  }
 0x4ed   : > { %v7824_v28 = vpop.permute.xlu1 %7823  ;;  %v7948_v21 = vrot.slane %v7934_v11, %v12361_v14  ;;  %v11193_v13 = vld [vmem:[%s14672_s7 + $0x8] sm:$0xff]   ;;  %v11198_v11 = vld [vmem:[%s14672_s7 + $0xc0] sm:$0xff]  }
 0x4ee   : > { %8392 = vmatprep.mubr.bf16.mxu1 %v8117_v47  ;;  %v7888_v9 = vsel %vm4815_vm12, %v14030_v59, %v7824_v28  ;;  %v11166_v59 = vld [vmem:[%s14670_s5 + $0x108] sm:$0xff]   ;;  %v11196_v28 = vld [vmem:[%s14672_s7 + $0x40] sm:$0xff]  }
 0x4ef   : > { %8393 = vmatmul.mubr.bf16.vlgmr.msra.gmra.mxu1 %v8116_v19  ;;  %v10388_v5 = vcombine.low %v7924_v37, %v7948_v21  ;;  %v11197_v19 = vld [vmem:[%s14672_s7] sm:$0xff]  }
 0x4f0   : > { %11009 = vmatpush3.bf16.msra.mxu1 %v11162_v43  ;;  %11016 = vmatprep.mubr.msk.bf16.mxu1 %vm11401_vm2, %v14745_v60  ;;  %v11199_v47 = vld [vmem:[%s14672_s7 + $0x80] sm:$0xff]   ;;  %v11200_v43 = vld [vmem:[%s14672_s7 + $0x178] sm:$0xff]  }
 0x4f1   : > { %v7846_v56 = vpop.permute.xlu1 %7845  ;;  %11010 = vmatprep.subr.bf16.mxu1 %v14745_v60  ;;  %v8101_v27 = vrot.slane %v10388_v5, %v12361_v14  ;;  %v10386_v21 = vld [vmem:[%s14671_s6] ss:$0 sm:$0xff] }
 0x4f2   : > { %v7894_v39 = vsel %vm4815_vm12, %v7836_v42, %v7846_v56 }
 0x4f3   : > { %v7982_v57 = vcombine.low %v7888_v9, %v7894_v39 }
 0x4f4   : > { %11011 = vmatpush3.bf16.msra.mxu1 %v11165_v41 }
 0x4f5   : > { %v7996_v31 = vrot.slane %v7982_v57, %v12361_v14  ;;  %11012 = vmatprep.subr.bf16.mxu1 %v14745_v60 }
 0x4f7   : > { %v10390_v3 = vcombine.low %v7972_v24, %v7996_v31 }
 0x4f8   : > { %11013 = vmatpush3.bf16.msra.mxu1 %v11166_v59 }
 0x4f9   : > { %v8115_v20 = vrot.slane %v10390_v3, %v12361_v14  ;;  %11014 = vmatprep.subr.bf16.mxu1 %v14745_v60 }
 0x4fb   : > { %v8118_v51 = vcombine.low %v8101_v27, %v8115_v20  ;;  %v8119_v38 = vcombine.high %v8101_v27, %v8115_v20 }
 0x4fc   : > { %11015 = vmatpush3.bf16.msra.mxu1 %v11167_v1 }
 0x4fd   : > { %8433 = vmatprep.mubr.bf16.mxu0 %v8119_v38  ;;  %10811 = vmatprep.subr.bf16.mxu1 %v11170_v26 }
 0x4fe   : > { %8434 = vmatmul.mubr.bf16.vlgmr.msra.gmra.mxu0 %v8118_v51 }
 0x4ff   : > { %11017 = vmatmul.mubr.msk.bf16.vlgmr.msra.gmra.mxu1 %vm4815_vm12, %v8136_v17  ;;  %10790 = vmatpush3.bf16.msra.mxu0 %v11169_v25 }
 0x500   : > { %10812 = vmatpush3.bf16.msra.mxu1 %v11171_v34  ;;  %10791 = vmatprep.subr.bf16.mxu0 %v11172_v32 }
 0x501   : > { %10813 = vmatprep.subr.bf16.mxu1 %v11174_v12 }
 0x503   : > { %10792 = vmatpush3.bf16.msra.mxu0 %v11173_v50 }
 0x504   : > { %10814 = vmatpush3.bf16.msra.mxu1 %v11175_v44  ;;  %10793 = vmatprep.subr.bf16.mxu0 %v11176_v2 }
 0x505   : > { %10815 = vmatprep.subr.bf16.mxu1 %v11178_v15 }
 0x507   : > { %10794 = vmatpush3.bf16.msra.mxu0 %v11177_v10 }
 0x508   : > { %10816 = vmatpush3.bf16.msra.mxu1 %v11179_v22  ;;  %10795 = vmatprep.subr.bf16.mxu0 %v11180_v62 }
 0x509   : > { %10817 = vmatprep.subr.bf16.mxu1 %v11182_v58 }
 0x50b   : > { %10796 = vmatpush3.bf16.msra.mxu0 %v11181_v4 }
 0x50c   : > { %10818 = vmatpush3.bf16.msra.mxu1 %v11183_v6  ;;  %10797 = vmatprep.subr.bf16.mxu0 %v11184_v8 }
 0x50d   : > { %10819 = vmatprep.subr.bf16.mxu1 %v11186_v53 }
 0x50f   : > { %10798 = vmatpush3.bf16.msra.mxu0 %v11185_v18 }
 0x510   : > { %10820 = vmatpush3.bf16.msra.mxu1 %v11187_v63  ;;  %10799 = vmatprep.subr.bf16.mxu0 %v11188_v35 }
 0x511   : > { %10821 = vmatprep.subr.bf16.mxu1 %v11190_v45 }
 0x513   : > { %10800 = vmatpush3.bf16.msra.mxu0 %v11189_v46 }
 0x514   : > { %10822 = vmatpush3.bf16.msra.mxu1 %v11191_v61  ;;  %10801 = vmatprep.subr.bf16.mxu0 %v11192_v30 }
 0x515   : > { %10823 = vmatprep.subr.bf16.mxu1 %v11194_v49 }
 0x517   : > { %10802 = vmatpush3.bf16.msra.mxu0 %v11193_v13 }
 0x518   : > { %10824 = vmatpush3.bf16.msra.mxu1 %v11195_v55  ;;  %10803 = vmatprep.subr.bf16.mxu0 %v11196_v28 }
 0x519   : > { %10825 = vmatprep.subr.bf16.mxu1 %v11198_v11 }
 0x51b   : > { %10804 = vmatpush3.bf16.msra.mxu0 %v11197_v19 }
 0x51c   : > { %10826 = vmatpush3.bf16.msra.mxu1 %v11199_v47  ;;  %10833 = vmatprep.subr.bf16.mxu0 %v11200_v43 }
 0x51d   : > { %10855 = vmatprep.subr.bf16.mxu1 %v11202_v29 }
 0x5af   : > { %v10756_v40 = vpop.f32.mrf.mxu1 }
 0x5b1   : > { %v10757_v36 = vpop.f32.mrf.mxu1 }
 0x5b2   : > { %v10758_v48 = vadd.f32 %v10757_v36, %v10756_v40 }
 0x5b3   : > { %v10759_v42 = vpop.f32.mrf.mxu1 }
 0x5b4   : > { %v8395_v37 = vadd.f32 %v10758_v48, %v10386_v21 }
 0x5b5   : > { %v10760_v56 = vpop.f32.mrf.mxu1 }
 0x5b6   : > { %v10761_v57 = vadd.f32 %v10760_v56, %v10759_v42 }
 0x5b8   : > { %v8398_v3 = vadd.f32 %v10761_v57, %v10386_v21 }
 0x5be   : > { %v10778_v41 = vpop.f32.mrf.mxu0 }
 0x5bf   : > { %v8476_v39 = vpop.f32.mrf.mxu1 }
 0x5c0   : > { %v10779_v9 = vpop.f32.mrf.mxu0 }
 0x5c1   : > { %v10780_v23 = vadd.f32 %v10779_v9, %v10778_v41  ;;  %v11018_v5 = vpop.f32.mrf.mxu1 }
 0x5c2   : > { %v10781_v24 = vpop.f32.mrf.mxu0 }
 0x5c3   : > { %v8436_v31 = vadd.f32 %v10780_v23, %v8395_v37  ;;  %v8479_v33 = vpop.f32.mrf.mxu1 }
 0x5c4   : > { %v10782_v59 = vpop.f32.mrf.mxu0 }
 0x5c5   : > { %v10783_v52 = vadd.f32 %v10782_v59, %v10781_v24  ;;  %v11019_v27 = vpop.f32.mrf.mxu1  ;;  %v8477_v20 = vadd.f32 %v8476_v39, %v8436_v31 }
 0x5c7   : > { %v8439_v1 = vadd.f32 %v10783_v52, %v8398_v3  ;;  %v8483_v51 = vmax.f32 %v8477_v20, 0.0 }
 0x5c9   : > { %v8480_v54 = vadd.f32 %v8479_v33, %v8439_v1 }
 0x5cb   : > { %v8484_v38 = vmax.f32 %v8480_v54, 0.0 }
 0x5cd   : > { %v8485_v0 = vpack.c.bf16 %v8484_v38, %v8483_v51  ;;  %v10428_v17 = vpack.c.bf16 %v8484_v38, %v8484_v38 }
 0x5cf   : > { %v8494_v16 = vrot.slane %v8485_v0, %v12361_v14  ;;  %v8501_v25 = vrot.slane %v10428_v17, %v12361_v14 }
 0x5d1   : > { %v8502_v26 = vcombine.high %v8494_v16, %v8494_v16  ;;  %v8503_v34 = vcombine.high %v8501_v25, %v8501_v25  ;;  %v8510_v32 = vrot.slane %v8494_v16, %v12361_v14  ;;  %v8540_v12 = vrot.slane %v8501_v25, %v12361_v14 }
 0x5d3   : > { %v8517_v50 = vrot.slane %v8502_v26, %v12361_v14  ;;  %v8521_v44 = vshll.u32 %v8510_v32, 16  ;;  %v8532_v2 = vrot.slane %v8510_v32, 1  ;;  %v8519_v15 = vshrl.u32 %v8510_v32, 16 }
 0x5d4   : > { %v8544_v10 = vshll.u32 %v8540_v12, 16  ;;  %v8548_v22 = vrot.slane %v8540_v12, 1  ;;  %v8555_v62 = vrot.slane %v8503_v34, %v12361_v14  ;;  %v8542_v8 = vshrl.u32 %v8540_v12, 16 }
 0x5d5   : > { %v8523_v58 = vrot.slane %v8521_v44, 1  ;;  %v8528_v4 = vshll.u32 %v8517_v50, 16  ;;  %v8533_v6 = vrot.slane %v8517_v50, 1  ;;  %v8526_v53 = vshrl.u32 %v8517_v50, 16  ;;  %v11203_v50 = vld [vmem:[%s14672_s7 + $0x1b8] sm:$0xff]   ;;  %v11204_v44 = vld [vmem:[%s14672_s7 + $0x170] sm:$0xff]  }
 0x5d6   : > { %v8546_v18 = vrot.slane %v8544_v10, 1  ;;  %v8559_v63 = vshll.u32 %v8555_v62, 16  ;;  %v8565_v35 = vcombine.low %v8532_v2, %v8502_v26  ;;  %v8557_v61 = vshrl.u32 %v8555_v62, 16  ;;  %v11205_v10 = vld [vmem:[%s14672_s7 + $0x130] sm:$0xff]  }
 0x5d7   : > { %v8524_v45 = vor.u32 %v8523_v58, %v8519_v15  ;;  %v8530_v46 = vrot.slane %v8528_v4, 1  ;;  %v8563_v30 = vrot.slane %v8555_v62, 1  ;;  %v8628_v55 = vcombine.low %v8533_v6, %v8501_v25  ;;  %v11206_v15 = vld [vmem:[%s14672_s7 + $0x1f0] sm:$0xff]   ;;  %v11208_v62 = vld [vmem:[%s14672_s7 + $0x168] sm:$0xff]  }
 0x5d8   : > { %v8547_v49 = vor.u32 %v8546_v18, %v8542_v8  ;;  %v8561_v13 = vrot.slane %v8559_v63, 1  ;;  %v8619_v28 = vrot.slane %v8548_v22, %v11724_v7  ;;  %v8581_v14 = vrot.slane %v8565_v35, %v11724_v7  ;;  %v11207_v58 = vld [vmem:[%s14672_s7 + $0x1b0] sm:$0xff]   ;;  %v11210_v4 = vld [vmem:[%s14672_s7 + $0x1e8] sm:$0xff]   ;;  %v11212_v8 = vld [vmem:[%s14672_s7 + $0x160] sm:$0xff]  }
 0x5d9   : > { %v8531_v11 = vor.u32 %v8530_v46, %v8526_v53  ;;  %v8564_v19 = vcombine.low %v8494_v16, %v8524_v45  ;;  %v8682_v47 = vrot.slane %v8563_v30, %v11724_v7  ;;  %v8644_v39 = vrot.slane %v8628_v55, %v11724_v7  ;;  %v11211_v53 = vld [vmem:[%s14672_s7 + $0x1a8] sm:$0xff]   ;;  %v11214_v18 = vld [vmem:[%s14672_s7 + $0x1e0] sm:$0xff]   ;;  %v11216_v35 = vld [vmem:[%s14672_s7 + $0x158] sm:$0xff]  }
 0x5da   : > { %v8562_v43 = vor.u32 %v8561_v13, %v8557_v61  ;;  %v8567_v29 = vcombine.low %v8501_v25, %v8547_v49  ;;  %v8629_v40 = vcombine.low %v8547_v49, %v8548_v22  ;;  %v8626_v36 = vrot.slane %v8619_v28, %v11724_v7  ;;  %v11213_v63 = vld [vmem:[%s14672_s7 + $0x120] sm:$0xff]   ;;  %v11218_v46 = vld [vmem:[%s14672_s7 + $0x1d8] sm:$0xff]   ;;  %v11220_v30 = vld [vmem:[%s14672_s7 + $0x150] sm:$0xff]  }
 0x5db   : > { %v8566_v42 = vcombine.low %v8531_v11, %v8533_v6  ;;  %v8574_v48 = vrot.slane %v8564_v19, %v11724_v7  ;;  %v8627_v21 = vcombine.low %v8502_v26, %v8531_v11  ;;  %v8689_v56 = vrot.slane %v8682_v47, %v11724_v7  ;;  %v11209_v6 = vld [vmem:[%s14672_s7 + $0x128] sm:$0xff]   ;;  %v11215_v45 = vld [vmem:[%s14672_s7 + $0x1a0] sm:$0xff]   ;;  %v11217_v61 = vld [vmem:[%s14672_s7 + $0x118] sm:$0xff]  }
 0x5dc   : > { %v8595_v41 = vrot.slane %v8567_v29, %v11724_v7  ;;  %v8630_v9 = vcombine.low %v8503_v34, %v8562_v43  ;;  %v8651_v5 = vrot.slane %v8629_v40, %v11724_v7  ;;  %v11201_v34 = vld [vmem:[%s14672_s7 + $0x138] sm:$0xff]   ;;  %v11222_v13 = vld [vmem:[%s14672_s7 + $0x1d0] sm:$0xff]   ;;  %v11224_v28 = vld [vmem:[%s14672_s7 + $0x148] sm:$0xff]  }
 0x5dd   : > { %v8596_v37 = vcombine.low %v8574_v48, %v8581_v14  ;;  %v8637_v57 = vrot.slane %v8627_v21, %v11724_v7  ;;  %v8588_v23 = vrot.slane %v8566_v42, %v11724_v7  ;;  %v14270_v24 = vcombine.low %v8626_v36, %v8689_v56  ;;  %v11219_v49 = vld [vmem:[%s14672_s7 + $0x198] sm:$0xff]   ;;  %v11221_v55 = vld [vmem:[%s14672_s7 + $0x110] sm:$0xff]   ;;  %v11226_v19 = vld [vmem:[%s14672_s7 + $0x1c8] sm:$0xff]  }
 0x5de   : > { %v8658_v31 = vrot.slane %v8630_v9, %v11724_v7  ;;  %v11223_v11 = vld [vmem:[%s14672_s7 + $0x190] sm:$0xff]   ;;  %v11225_v14 = vld [vmem:[%s14672_s7 + $0x108] sm:$0xff]   ;;  %v11228_v47 = vld [vmem:[%s14672_s7 + $0x140] sm:$0xff]  }
 0x5df   : > { %v8659_v59 = vcombine.low %v8637_v57, %v8644_v39  ;;  %v8597_v33 = vcombine.low %v8588_v23, %v8595_v41  ;;  %v8604_v52 = vrot.slane %v8596_v37, %v11724_v7  ;;  %v11227_v43 = vld [vmem:[%s14672_s7 + $0x188] sm:$0xff]   ;;  %v11230_v29 = vld [vmem:[%s14672_s7 + $0x1c0] sm:$0xff]   ;;  %v11232_v48 = vld [vmem:[%s14672_s7 + $0x238] sm:$0xff]  }
 0x5e0   : > { %v8660_v3 = vcombine.low %v8651_v5, %v8658_v31  ;;  %v11229_v40 = vld [vmem:[%s14672_s7 + $0x100] sm:$0xff]   ;;  %v11233_v56 = vld [vmem:[%s14672_s7 + $0x230] sm:$0xff]   ;;  %v11234_v41 = vld [vmem:[%s14672_s7 + $0x228] sm:$0xff]   ;;  %v8898_v5 = vrot.slane %v14270_v24, %v11724_v7 }
 0x5e1   : > { %v8667_v27 = vrot.slane %v8659_v59, %v11724_v7  ;;  %v8611_v20 = vrot.slane %v8597_v33, %v11724_v7  ;;  %v11231_v36 = vld [vmem:[%s14672_s7 + $0x180] sm:$0xff]   ;;  %v11236_v39 = vld [vmem:[%s14672_s7 + $0x218] sm:$0xff]   ;;  %v11237_v37 = vld [vmem:[%s14672_s7 + $0x210] sm:$0xff]  }
 0x5e2   : > { %v8674_v1 = vrot.slane %v8660_v3, %v11724_v7  ;;  %v11235_v9 = vld [vmem:[%s14672_s7 + $0x220] sm:$0xff]   ;;  %v11238_v57 = vld [vmem:[%s14672_s7 + $0x208] sm:$0xff]   ;;  %v8905_v31 = vrot.slane %v8898_v5, %v11724_v7  ;;  %v11240_v59 = vld [vmem:[%s14674_s9 + $0x70] ss:$8 sps:$4 sm:$0xff]  }
 0x5e3   : > { %v10430_v54 = vcombine.low %v8604_v52, %v8667_v27  ;;  %v11239_v23 = vld [vmem:[%s14672_s7 + $0x200] sm:$0xff]   ;;  %v11242_v33 = vld [vmem:[%s14674_s9 + $0x74] ss:$8 sps:$4 sm:$0xff]   ;;  %v11405_v52 = vmov 0   ;;  %v11246_v27 = vld [vmem:[%s14674_s9 + $0x50] ss:$8 sps:$4 sm:$0xff]  }
 0x5e4   : > { %v10431_v51 = vcombine.low %v8611_v20, %v8674_v1  ;;  %v11245_v3 = vld [vmem:[%s14674_s9 + $0x64] ss:$8 sps:$4 sm:$0xff]   ;;  %v11248_v24 = vld [vmem:[%s14674_s9 + $0x54] ss:$8 sps:$4 sm:$0xff]   ;;  %v11249_v1 = vld [vmem:[%s14674_s9 + $0x40] ss:$8 sps:$4 sm:$0xff]  }
 0x5e5   : > { %v8849_v38 = vrot.slane %v10430_v54, %v11724_v7  ;;  %v11251_v20 = vld [vmem:[%s14674_s9 + $0x44] ss:$8 sps:$4 sm:$0xff]   ;;  %v11254_v54 = vld [vmem:[%s14674_s9 + $0x34] ss:$8 sps:$4 sm:$0xff]  }
 0x5e6   : > { %v14280_v0 = vrot.slane %v10431_v51, %v11724_v7  ;;  %v11252_v51 = vld [vmem:[%s14674_s9 + $0x30] ss:$8 sps:$4 sm:$0xff]  }
 0x5e7   : > { %v8857_v17 = vcombine.high %v8849_v38, %v8849_v38  ;;  %v8865_v16 = vrot.slane %v8849_v38, %v11724_v7  ;;  %v11257_v38 = vld [vmem:[%s14674_s9 + $0x24] ss:$8 sps:$4 sm:$0xff]  }
 0x5e8   : > { %v8858_v25 = vcombine.high %v14280_v0, %v14280_v0  ;;  %v8872_v42 = vrot.slane %v14280_v0, %v11724_v7  ;;  %v11264_v0 = vld [vmem:[%s14676_s11 + $0x70] ss:$8 sps:$4 sm:$0xff]  }
 0x5e9   : > { %v8879_v26 = vrot.slane %v8857_v17, %v11724_v7  ;;  %v8887_v2 = vcombine.high %v8865_v16, %v8865_v16  ;;  %v11266_v17 = vld [vmem:[%s14676_s11 + $0x74] ss:$8 sps:$4 sm:$0xff]  }
 0x5ea   : > { %v8886_v32 = vrot.slane %v8858_v25, %v11724_v7  ;;  %v8888_v21 = vcombine.high %v8872_v42, %v8872_v42  ;;  %v11255_v25 = vld [vmem:[%s14674_s9 + $0x20] ss:$8 sps:$4 sm:$0xff]  }
 0x5eb   : > { %9379 = vmatprep.mubr.bf16.mxu0 %v8879_v26  ;;  %v8889_v12 = vcombine.high %v8879_v26, %v8879_v26  ;;  %v11267_v26 = vld [vmem:[%s14676_s11 + $0x60] ss:$8 sps:$4 sm:$0xff]  }
 0x5ec   : > { %9380 = vmatmul.mubr.bf16.vlgmr.msra.gmra.mxu0 %v8865_v16  ;;  %v8890_v22 = vcombine.high %v8886_v32, %v8886_v32  ;;  %v11269_v16 = vld [vmem:[%s14676_s11 + $0x64] ss:$8 sps:$4 sm:$0xff]  }
 0x5ed   : > { %10834 = vmatpush3.bf16.msra.mxu0 %v11201_v34  ;;  %9419 = vmatprep.mubr.bf16.mxu1 %v8889_v12  ;;  %v11260_v34 = vld [vmem:[%s14674_s9 + $0x14] ss:$8 sps:$4 sm:$0xff]   ;;  %v11258_v12 = vld [vmem:[%s14674_s9 + $0x10] ss:$8 sps:$4 sm:$0xff]  }
 0x5ee   : > { %9459 = vmatprep.mubr.bf16.mxu0 %v8886_v32  ;;  %9420 = vmatmul.mubr.bf16.vlgmr.msra.gmra.mxu1 %v8887_v2  ;;  %v11272_v32 = vld [vmem:[%s14676_s11 + $0x54] ss:$8 sps:$4 sm:$0xff]   ;;  %v11275_v2 = vld [vmem:[%s14676_s11 + $0x44] ss:$8 sps:$4 sm:$0xff]  }
 0x5ef   : > { %10856 = vmatpush3.bf16.msra.mxu1 %v11203_v50  ;;  %10835 = vmatprep.subr.bf16.mxu0 %v11204_v44  ;;  %v11270_v50 = vld [vmem:[%s14676_s11 + $0x50] ss:$8 sps:$4 sm:$0xff]   ;;  %v11263_v44 = vld [vmem:[%s14674_s9 + $0x4] ss:$8 sps:$4 sm:$0xff]  }
 0x5f0   : > { %9499 = vmatprep.mubr.bf16.mxu1 %v8890_v22  ;;  %10857 = vmatprep.subr.bf16.mxu1 %v11206_v15  ;;  %v11261_v15 = vld [vmem:[%s14674_s9] ss:$8 sps:$4 sm:$0xff]   ;;  %v11278_v22 = vld [vmem:[%s14676_s11 + $0x34] ss:$8 sps:$4 sm:$0xff]  }
 0x5f1   : > { %10836 = vmatpush3.bf16.msra.mxu0 %v11205_v10  ;;  %v11273_v10 = vld [vmem:[%s14676_s11 + $0x40] ss:$8 sps:$4 sm:$0xff]  }
 0x5f2   : > { %10837 = vmatprep.subr.bf16.mxu0 %v11208_v62  ;;  %v11276_v62 = vld [vmem:[%s14676_s11 + $0x30] ss:$8 sps:$4 sm:$0xff]  }
 0x5f3   : > { %10858 = vmatpush3.bf16.msra.mxu1 %v11207_v58  ;;  %v11281_v58 = vld [vmem:[%s14676_s11 + $0x24] ss:$8 sps:$4 sm:$0xff]  }
 0x5f4   : > { %10859 = vmatprep.subr.bf16.mxu1 %v11210_v4  ;;  %v11279_v4 = vld [vmem:[%s14676_s11 + $0x20] ss:$8 sps:$4 sm:$0xff]  }
 0x5f5   : > { %10838 = vmatpush3.bf16.msra.mxu0 %v11209_v6  ;;  %v11284_v6 = vld [vmem:[%s14676_s11 + $0x14] ss:$8 sps:$4 sm:$0xff]  }
 0x5f6   : > { %10839 = vmatprep.subr.bf16.mxu0 %v11212_v8  ;;  %v11282_v8 = vld [vmem:[%s14676_s11 + $0x10] ss:$8 sps:$4 sm:$0xff]  }
 0x5f7   : > { %10860 = vmatpush3.bf16.msra.mxu1 %v11211_v53  ;;  %v11287_v53 = vld [vmem:[%s14676_s11 + $0x4] ss:$8 sps:$4 sm:$0xff]  }
 0x5f8   : > { %10861 = vmatprep.subr.bf16.mxu1 %v11214_v18  ;;  %v11285_v18 = vld [vmem:[%s14676_s11] ss:$8 sps:$4 sm:$0xff]  }
 0x5f9   : > { %10840 = vmatpush3.bf16.msra.mxu0 %v11213_v63  ;;  %v11290_v63 = vld [vmem:[%s14676_s11 + $0xf4] ss:$8 sps:$4 sm:$0xff]  }
 0x5fa   : > { %10841 = vmatprep.subr.bf16.mxu0 %v11216_v35 }
 0x5fb   : > { %10862 = vmatpush3.bf16.msra.mxu1 %v11215_v45 }
 0x5fc   : > { %10863 = vmatprep.subr.bf16.mxu1 %v11218_v46 }
 0x5fd   : > { %10842 = vmatpush3.bf16.msra.mxu0 %v11217_v61  ;;  %v11288_v61 = vld [vmem:[%s14676_s11 + $0xf0] ss:$8 sps:$4 sm:$0xff]  }
 0x5fe   : > { %10843 = vmatprep.subr.bf16.mxu0 %v11220_v30  ;;  %v11293_v30 = vld [vmem:[%s14676_s11 + $0xe4] ss:$8 sps:$4 sm:$0xff]  }
 0x5ff   : > { %10864 = vmatpush3.bf16.msra.mxu1 %v11219_v49 }
 0x600   : > { %10865 = vmatprep.subr.bf16.mxu1 %v11222_v13 }
 0x601   : > { %10844 = vmatpush3.bf16.msra.mxu0 %v11221_v55 }
 0x602   : > { %10845 = vmatprep.subr.bf16.mxu0 %v11224_v28 }
 0x603   : > { %10866 = vmatpush3.bf16.msra.mxu1 %v11223_v11  ;;  %v11291_v11 = vld [vmem:[%s14676_s11 + $0xe0] ss:$8 sps:$4 sm:$0xff]  }
 0x604   : > { %10867 = vmatprep.subr.bf16.mxu1 %v11226_v19  ;;  %v11296_v19 = vld [vmem:[%s14676_s11 + $0xd4] ss:$8 sps:$4 sm:$0xff]  }
 0x605   : > { %10846 = vmatpush3.bf16.msra.mxu0 %v11225_v14 }
 0x606   : > { %10847 = vmatprep.subr.bf16.mxu0 %v11228_v47  ;;  %v11294_v47 = vld [vmem:[%s14676_s11 + $0xd0] ss:$8 sps:$4 sm:$0xff]  }
 0x607   : > { %10868 = vmatpush3.bf16.msra.mxu1 %v11227_v43  ;;  %v11299_v43 = vld [vmem:[%s14676_s11 + $0xc4] ss:$8 sps:$4 sm:$0xff]  }
 0x608   : > { %10869 = vmatprep.subr.bf16.mxu1 %v11230_v29  ;;  %v11297_v29 = vld [vmem:[%s14676_s11 + $0xc0] ss:$8 sps:$4 sm:$0xff]  }
 0x609   : > { %10848 = vmatpush3.bf16.msra.mxu0 %v11229_v40  ;;  %v11302_v40 = vld [vmem:[%s14676_s11 + $0xb4] ss:$8 sps:$4 sm:$0xff]  }
 0x60a   : > { %11020 = vmatprep.subr.bf16.mxu0 %v14745_v60 }
 0x60b   : > { %10870 = vmatpush3.bf16.msra.mxu1 %v11231_v36  ;;  %v11300_v36 = vld [vmem:[%s14676_s11 + $0xb0] ss:$8 sps:$4 sm:$0xff]  }
 0x60c   : > { %9460 = vmatmul.mubr.bf16.vlgmr.msra.gmra.mxu0 %v8872_v42  ;;  %9701 = vmatprep.subr.bf16.mxu1 %v11242_v33  ;;  %v11305_v42 = vld [vmem:[%s14676_s11 + $0xa4] ss:$8 sps:$4 sm:$0xff]  }
 0x60d   : > { %11021 = vmatpush3.bf16.msra.mxu0 %v11232_v48  ;;  %11036 = vmatprep.mubr.msk.bf16.mxu0 %vm11401_vm2, %v14745_v60  ;;  %v11303_v48 = vld [vmem:[%s14676_s11 + $0xa0] ss:$8 sps:$4 sm:$0xff]   ;;  %vm9572_vm2 = vcmask 1040384  }
 0x60e   : > { %9500 = vmatmul.mubr.bf16.vlgmr.msra.gmra.mxu1 %v8888_v21  ;;  %11022 = vmatprep.subr.bf16.mxu0 %v14745_v60 }
 0x60f   : > { %9702 = vmatpush1.bf16.msra.mxu1 %v11240_v59  ;;  %9733 = vmatprep.mubr.bf16.mxu1 %v11405_v52 }
 0x610   : > { %9703 = vmatprep.subr.bf16.mxu1 %v11245_v3 }
 0x611   : > { %11023 = vmatpush3.bf16.msra.mxu0 %v11233_v56 }
 0x612   : > { %11024 = vmatprep.subr.bf16.mxu0 %v14745_v60 }
 0x615   : > { %11025 = vmatpush3.bf16.msra.mxu0 %v11234_v41 }
 0x616   : > { %11026 = vmatprep.subr.bf16.mxu0 %v14745_v60 }
 0x619   : > { %11027 = vmatpush3.bf16.msra.mxu0 %v11235_v9 }
 0x61a   : > { %11028 = vmatprep.subr.bf16.mxu0 %v14745_v60 }
 0x61d   : > { %11029 = vmatpush3.bf16.msra.mxu0 %v11236_v39 }
 0x61e   : > { %11030 = vmatprep.subr.bf16.mxu0 %v14745_v60 }
 0x621   : > { %11031 = vmatpush3.bf16.msra.mxu0 %v11237_v37 }
 0x622   : > { %11032 = vmatprep.subr.bf16.mxu0 %v14745_v60 }
 0x625   : > { %11033 = vmatpush3.bf16.msra.mxu0 %v11238_v57 }
 0x626   : > { %11034 = vmatprep.subr.bf16.mxu0 %v14745_v60  ;;  %v11243_v60 = vld [vmem:[%s14674_s9 + $0x60] ss:$8 sps:$4 sm:$0xff]  }
 0x627   : > { %9704 = vmatpush1.bf16.msra.mxu1 %v11243_v60 }
 0x628   : > { %9705 = vmatprep.subr.bf16.mxu1 %v11248_v24 }
 0x629   : > { %11035 = vmatpush3.bf16.msra.mxu0 %v11239_v23 }
 0x62a   : > { %9950 = vmatprep.subr.bf16.mxu0 %v11266_v17 }
 0x62b   : > { %9706 = vmatpush1.bf16.msra.mxu1 %v11246_v27 }
 0x62c   : > { %11037 = vmatmul.mubr.bf16.vlgmr.msra.gmra.mxu0 %v8905_v31  ;;  %9707 = vmatprep.subr.bf16.mxu1 %v11251_v20  ;;  %v10429_v31 = vld [vmem:[%s14673_s8] ss:$0 sm:$0xff] }
 0x62d   : > { %9951 = vmatpush1.bf16.msra.mxu0 %v11264_v0 }
 0x62e   : > { %9952 = vmatprep.subr.bf16.mxu0 %v11269_v16 }
 0x62f   : > { %9708 = vmatpush1.bf16.msra.mxu1 %v11249_v1 }
 0x630   : > { %9709 = vmatprep.subr.bf16.mxu1 %v11254_v54 }
 0x631   : > { %9953 = vmatpush1.bf16.msra.mxu0 %v11267_v26 }
 0x632   : > { %9954 = vmatprep.subr.bf16.mxu0 %v11272_v32 }
 0x633   : > { %9710 = vmatpush1.bf16.msra.mxu1 %v11252_v51 }
 0x634   : > { %9711 = vmatprep.subr.bf16.mxu1 %v11257_v38 }
 0x635   : > { %9955 = vmatpush1.bf16.msra.mxu0 %v11270_v50 }
 0x636   : > { %9956 = vmatprep.subr.bf16.mxu0 %v11275_v2 }
 0x637   : > { %9712 = vmatpush1.bf16.msra.mxu1 %v11255_v25 }
 0x638   : > { %9713 = vmatprep.subr.bf16.mxu1 %v11260_v34 }
 0x639   : > { %9957 = vmatpush1.bf16.msra.mxu0 %v11273_v10 }
 0x63a   : > { %9958 = vmatprep.subr.bf16.mxu0 %v11278_v22 }
 0x63b   : > { %9714 = vmatpush1.bf16.msra.mxu1 %v11258_v12 }
 0x63c   : > { %9715 = vmatprep.subr.bf16.mxu1 %v11263_v44 }
 0x63d   : > { %9959 = vmatpush1.bf16.msra.mxu0 %v11276_v62 }
 0x63e   : > { %9960 = vmatprep.subr.bf16.mxu0 %v11281_v58 }
 0x63f   : > { %9716 = vmatpush1.bf16.msra.mxu1 %v11261_v15 }
 0x641   : > { %9961 = vmatpush1.bf16.msra.mxu0 %v11279_v4 }
 0x642   : > { %9962 = vmatprep.subr.bf16.mxu0 %v11284_v6 }
 0x645   : > { %9963 = vmatpush1.bf16.msra.mxu0 %v11282_v8 }
 0x646   : > { %9964 = vmatprep.subr.bf16.mxu0 %v11287_v53 }
 0x649   : > { %9965 = vmatpush1.bf16.msra.mxu0 %v11285_v18  ;;  %v11306_v18 = vld [vmem:[%s14676_s11 + $0x90] ss:$8 sps:$4 sm:$0xff]  }
 0x64a   : > { %9966 = vmatprep.subr.bf16.mxu0 %v11290_v63  ;;  %v11311_v63 = vld [vmem:[%s14676_s11 + $0x84] ss:$8 sps:$4 sm:$0xff]  }
 0x64d   : > { %9967 = vmatpush2.bf16.msra.mxu0 %v11288_v61  ;;  %v11314_v61 = vld [vmem:[%s14678_s13 + $0x70] sm:$0xff]  }
 0x64e   : > { %9968 = vmatprep.subr.bf16.mxu0 %v11293_v30  ;;  %v11315_v30 = vld [vmem:[%s14678_s13 + $0x30] sm:$0xff]  }
 0x651   : > { %9969 = vmatpush2.bf16.msra.mxu0 %v11291_v11  ;;  %v11320_v11 = vld [vmem:[%s14678_s13 + $0x58] sm:$0xff]  }
 0x652   : > { %9970 = vmatprep.subr.bf16.mxu0 %v11296_v19  ;;  %v11321_v19 = vld [vmem:[%s14678_s13 + $0x18] sm:$0xff]  }
 0x655   : > { %9971 = vmatpush2.bf16.msra.mxu0 %v11294_v47  ;;  %v11323_v47 = vld [vmem:[%s14678_s13 + $0x10] sm:$0xff]  }
 0x656   : > { %9972 = vmatprep.subr.bf16.mxu0 %v11299_v43  ;;  %v14773_v43 = vld [vmem:[#allocation9_spill] sm:$0xff] }
 0x659   : > { %9973 = vmatpush2.bf16.msra.mxu0 %v11297_v29  ;;  %v9693_v29 = vsub.s32 0, %v14773_v43 }
 0x65a   : > { %9974 = vmatprep.subr.bf16.mxu0 %v11302_v40  ;;  %v9609_v40 = vld [vmem:[%s14675_s10] sm:$0x3] }
 0x65d   : > { %9975 = vmatpush2.bf16.msra.mxu0 %v11300_v36  ;;  %v9697_v36 = vsub.s32 1, %v14773_v43 }
 0x65e   : > { %9976 = vmatprep.subr.bf16.mxu0 %v11305_v42  ;;  %v9694_v42 = vrot.slane %v9609_v40, %v9693_v29 }
 0x661   : > { %9977 = vmatpush2.bf16.msra.mxu0 %v11303_v48  ;;  %v9698_v48 = vrot.slane %v9609_v40, %v9697_v36 }
 0x6ac   : > { %v10805_v35 = vpop.f32.mrf.mxu0 }
 0x6ae   : > { %v10806_v45 = vpop.f32.mrf.mxu0  ;;  %v10827_v46 = vpop.f32.mrf.mxu1 }
 0x6af   : > { %v10807_v5 = vadd.f32 %v10806_v45, %v10805_v35  ;;  %v11309_v35 = vld [vmem:[%s14676_s11 + $0x80] ss:$8 sps:$4 sm:$0xff]   ;;  %v11312_v45 = vld [vmem:[%s14678_s13 + $0x78] sm:$0xff]  }
 0x6b0   : > { %v10808_v49 = vpop.f32.mrf.mxu0  ;;  %v10828_v13 = vpop.f32.mrf.mxu1  ;;  %10886 = vmatprep.subr.bf16.mxu1 %v11312_v45 }
 0x6b1   : > { %v9382_v59 = vadd.f32 %v10807_v5, %v10429_v31  ;;  %v10829_v33 = vadd.f32 %v10828_v13, %v10827_v46  ;;  %v11313_v46 = vld [vmem:[%s14678_s13 + $0x38] sm:$0xff]   ;;  %v11316_v49 = vld [vmem:[%s14678_s13 + $0x68] sm:$0xff]  }
 0x6b2   : > { %v10809_v55 = vpop.f32.mrf.mxu0  ;;  %v10830_v28 = vpop.f32.mrf.mxu1  ;;  %v11317_v13 = vld [vmem:[%s14678_s13 + $0x28] sm:$0xff]  }
 0x6b3   : > { %v9422_v60 = vadd.f32 %v10829_v33, %v9382_v59  ;;  %v11318_v55 = vld [vmem:[%s14678_s13 + $0x60] sm:$0xff]   ;;  %v11324_v59 = vld [vmem:[%s14678_s13 + $0x48] sm:$0xff]  }
 0x6b4   : > { %v10831_v14 = vpop.f32.mrf.mxu1  ;;  %v11319_v28 = vld [vmem:[%s14678_s13 + $0x20] sm:$0xff]   ;;  %v11325_v33 = vld [vmem:[%s14678_s13 + $0x8] sm:$0xff]  }
 0x6b5   : > { %v11322_v14 = vld [vmem:[%s14678_s13 + $0x50] sm:$0xff]  }
 0x6cc   : > { %v10849_v21 = vpop.f32.mrf.mxu0 }
 0x6ce   : > { %v10850_v56 = vpop.f32.mrf.mxu0  ;;  %v10871_v41 = vpop.f32.mrf.mxu1 }
 0x6cf   : > { %v10851_v3 = vadd.f32 %v10850_v56, %v10849_v21 }
 0x6d0   : > { %v10852_v9 = vpop.f32.mrf.mxu0  ;;  %v10872_v39 = vpop.f32.mrf.mxu1 }
 0x6d1   : > { %v9462_v24 = vadd.f32 %v10851_v3, %v9422_v60  ;;  %v10873_v52 = vadd.f32 %v10872_v39, %v10871_v41  ;;  %v11326_v3 = vld [vmem:[%s14678_s13 + $0x40] sm:$0xff]  }
 0x6d2   : > { %v10853_v37 = vpop.f32.mrf.mxu0  ;;  %v10874_v57 = vpop.f32.mrf.mxu1  ;;  %v11327_v60 = vld [vmem:[%s14678_s13] sm:$0xff]  }
 0x6d3   : > { %v9502_v27 = vadd.f32 %v10873_v52, %v9462_v24  ;;  %v9778_v24 = vld [vmem:[%s14677_s12] sm:$0x3] }
 0x6d4   : > { %v10875_v23 = vpop.f32.mrf.mxu1  ;;  %v9943_v52 = vrot.slane %v9778_v24, %v9693_v29 }
 0x6ec   : > { %v9541_v20 = vpop.f32.mrf.mxu0 }
 0x6ed   : > { %v9542_v1 = vadd.f32 %v9541_v20, %v9502_v27  ;;  %v9947_v27 = vrot.slane %v9778_v24, %v9697_v36 }
 0x6ee   : > { %v11038_v54 = vpop.f32.mrf.mxu0 }
 0x6ef   : > { %v9547_v51 = vmax.f32 %v9542_v1, 0.0 }
 0x6f0   : > { %v9544_v38 = vpop.f32.mrf.mxu0 }
 0x6f1   : > { %v9548_v0 = vpack.c.bf16 %v9547_v51, %v9547_v51 }
 0x6f2   : > { %v11039_v17 = vpop.f32.mrf.mxu0 }
 0x6f3   : > { %v9556_v16 = vrot.slane %v9548_v0, %v11724_v7 }
 0x6f5   : > { %v9557_v25 = vcombine.high %v9556_v16, %v9556_v16  ;;  %v9564_v26 = vrot.slane %v9556_v16, %v11724_v7 }
 0x6f7   : > { %v9571_v34 = vrot.slane %v9557_v25, %v11724_v7  ;;  %v9574_v32 = vsel %vm9572_vm2, %v9564_v26, 4286644096  ;;  %v11308_v7 = vld [vmem:[%s14676_s11 + $0x94] ss:$8 sps:$4 sm:$0xff]  }
 0x6f8   : > { %9978 = vmatprep.subr.bf16.mxu0 %v11308_v7 }
 0x6f9   : > { %v9577_v12 = vsel %vm9572_vm2, %v9571_v34, 4286644096  ;;  %9979 = vmatpush2.bf16.msra.mxu0 %v11306_v18 }
 0x6fa   : > { %v9579_v50 = vmax.bf16 %v9577_v12, %v9574_v32  ;;  %9980 = vmatprep.subr.bf16.mxu0 %v11311_v63  ;;  %v10027_v32 = vld [vmem:[%s14679_s14] sm:$0x1] }
 0x6fc   : > { %v9581_v44 = vsel %vm9572_vm2, %v9579_v50, 4286644096 }
 0x6fd   : > { %v9583_v2 = vunpack.i.l.bf16 %v9581_v44  ;;  %v9584_v15 = vunpack.i.h.bf16 %v9581_v44  ;;  %9981 = vmatpush2.bf16.msra.mxu0 %v11309_v35 }
 0x6ff   : > { %v9585_v10 = vmax.f32 %v9583_v2, %v9584_v15 }
 0x701   : > { %v9586_v22 = vrot.slane %v9585_v10, 4 }
 0x703   : > { %v9587_v62 = vmax.f32 %v9585_v10, %v9586_v22 }
 0x705   : > { %v9588_v58 = vrot.slane %v9587_v62, 2 }
 0x707   : > { %v9589_v4 = vmax.f32 %v9587_v62, %v9588_v58 }
 0x709   : > { %v9590_v6 = vrot.slane %v9589_v4, 1 }
 0x70b   : > { %v9591_v8 = vmax.f32 %v9589_v4, %v9590_v6 }
 0x70d   : > { %v9592_v53 = vpack.i.bf16 %v9591_v8, %v9591_v8 }
 0x70f   : > { %9734 = vmatmul.mubr.bf16.vlgmr.msra.gmra.mxu1 %v9592_v53 }
 0x710   : > { %10887 = vmatpush3.bf16.msra.mxu1 %v11313_v46 }
 0x711   : > { %10888 = vmatprep.subr.bf16.mxu1 %v11314_v61 }
 0x714   : > { %10889 = vmatpush3.bf16.msra.mxu1 %v11315_v30 }
 0x715   : > { %10890 = vmatprep.subr.bf16.mxu1 %v11316_v49 }
 0x718   : > { %10891 = vmatpush3.bf16.msra.mxu1 %v11317_v13 }
 0x719   : > { %10892 = vmatprep.subr.bf16.mxu1 %v11318_v55 }
 0x71c   : > { %10893 = vmatpush3.bf16.msra.mxu1 %v11319_v28 }
 0x71d   : > { %10894 = vmatprep.subr.bf16.mxu1 %v11320_v11 }
 0x720   : > { %10895 = vmatpush3.bf16.msra.mxu1 %v11321_v19 }
 0x721   : > { %10896 = vmatprep.subr.bf16.mxu1 %v11322_v14 }
 0x724   : > { %10897 = vmatpush3.bf16.msra.mxu1 %v11323_v47 }
 0x725   : > { %10898 = vmatprep.subr.bf16.mxu1 %v11324_v59 }
 0x728   : > { %10899 = vmatpush3.bf16.msra.mxu1 %v11325_v33 }
 0x729   : > { %10900 = vmatprep.subr.bf16.mxu1 %v11326_v3 }
 0x72c   : > { %10901 = vmatpush3.bf16.msra.mxu1 %v11327_v60 }
 0x7cf   : > { %v9735_v21 = vpop.f32.mrf.mxu1 }
 0x7d0   : > { %v9736_v56 = vadd.f32 %v9735_v21, %v9694_v42 }
 0x7d1   : > { %v9737_v41 = vpop.f32.mrf.mxu1 }
 0x7d2   : > { %v9738_v9 = vadd.f32 %v9737_v41, %v9698_v48  ;;  %v9742_v39 = vmax.f32 %v9736_v56, 0.0 }
 0x7d3   : > { %v9739_v37 = vpop.f32.mrf.mxu1 }
 0x7d4   : > { %v9743_v57 = vmax.f32 %v9738_v9, 0.0  ;;  %v9744_v31 = vpack.c.bf16 %v9742_v39, %v9742_v39 }
 0x7d5   : > { %v9740_v23 = vpop.f32.mrf.mxu1 }
 0x7d6   : > { %v9745_v5 = vpack.c.bf16 %v9743_v57, %v9743_v57 }
 0x7d8   : > { %9982 = vmatprep.mubr.bf16.mxu0 %v9745_v5 }
 0x7d9   : > { %9983 = vmatmul.mubr.bf16.vlgmr.msra.gmra.mxu0 %v9744_v31 }
 0x899   : > { %v9984_v20 = vpop.f32.mrf.mxu0 }
 0x89a   : > { %v9985_v1 = vadd.f32 %v9984_v20, %v9943_v52 }
 0x89b   : > { %v9986_v54 = vpop.f32.mrf.mxu0 }
 0x89c   : > { %v9987_v51 = vadd.f32 %v9986_v54, %v9947_v27  ;;  %v9991_v38 = vmax.f32 %v9985_v1, 0.0 }
 0x89d   : > { %v9988_v0 = vpop.f32.mrf.mxu0 }
 0x89e   : > { %v9992_v17 = vmax.f32 %v9987_v51, 0.0  ;;  %v9993_v26 = vpack.c.bf16 %v9991_v38, %v9991_v38 }
 0x89f   : > { %v9989_v16 = vpop.f32.mrf.mxu0 }
 0x8a0   : > { %v9994_v25 = vpack.c.bf16 %v9992_v17, %v9992_v17 }
 0x8a2   : > { %10156 = vmatprep.mubr.bf16.mxu1 %v9994_v25 }
 0x8a3   : > { %10157 = vmatmul.mubr.bf16.vlgmr.msra.gmra.mxu1 %v9993_v26 }
 0x963   : > { %v10902_v34 = vpop.f32.mrf.mxu1 }
 0x965   : > { %v10903_v12 = vpop.f32.mrf.mxu1 }
 0x966   : > { %v10904_v50 = vadd.f32 %v10903_v12, %v10902_v34 }
 0x967   : > { %v10905_v44 = vpop.f32.mrf.mxu1 }
 0x968   : > { %v10159_v2 = vadd.f32 %v10904_v50, %v10027_v32 }
 0x969   : > { %v10906_v15 = vpop.f32.mrf.mxu1 }
 0x96a   : > { %10165 = vst.msk [vmem:[%s486_s17] sm:$0x1] %vm10164_vm3, %v10159_v2 }
 0x96b   : > { %11342 = shalt.err (!%p11339_p3)
}
 0x96c   : > { %s11343_s16 = scalar_lea.hbm %s14630_s20, 16  ;;  %s11347_s0 = scalar_lea.hbm %s14680_s15, 32 }
 0x96d   : > { %p11344_p4 = scmp.ne.s32.totalorder %s14630_s20, %s11343_s16  ;;  %p11348_p9 = scmp.lt.s32.totalorder %s14630_s20, %s14680_s15 }
 0x96e   : > { %p11349_p10 = scmp.lt.s32.totalorder %s11347_s0, %s11343_s16 }
 0x96f   : > { %p11345_p7 = pnand %p11344_p4, %p11525_p5 }
 0x970   : > { %p11350_p11 = por %p11349_p10, %p11348_p9 }
 0x971   : > { %p11346_p8 = pneg %p11345_p7 }
 0x973   : > { %p11351_p12 = pnand %p11350_p11, %p11346_p8 }
 0x975   : > { %11354 = shalt.err (!%p11351_p12)
}
 0x976   : > { %11040 = dma.vmem_to_hbm [thread:$0]  (%p11525_p5), %s10180_s23, 16, %s14630_s20, %s10167_s26  }
 0x977 PF: > { %p11046_p13 = scmp.ge.s32.totalorder %s11389_s21, 2  ;;  %s10191_s29 = sand.u32 1, %s11377_s18  }
 0x978   : > { %s10192_s25 = scalar_lea.sflag [#allocation3], %s10191_s29 }
 0x979   : > { %p11043_p0 = pnand %p11046_p13, %p11529_p6 }
 0x97b   : > { %p11044_p1 = pneg %p11043_p0 }
 0x97d   : > { %11372 = dma.done.wait (%p11044_p1), %s10192_s25, 16  }
 0x97e   : > { %11374 = vsyncadd (%p11044_p1), %s10192_s25, 4294967280  ;;  %s14775_s21 = sld [smem:[#allocation6_spill]]  ;;  %s14778_s18 = smov %s11381_s19 }
 0x97f   : > { %s14776_s16 = sld [smem:[#allocation5_spill]] }
 0x980   : > { %s14777_s20 = sld [smem:[#allocation7_spill]] }
 0x984   : > { %p25_p2 = scmp.ge.s32.totalorder %s14775_s21, 4  }
 0x985   : > { %s14779_s19 = smov %s14776_s16 }
 0x986   :  { %27 = sbr.rel (!%p25_p2) target bundleno = 5 (0x5), region = 115 }
 0x98b   :  { %10196 = vsyncpa [#allocation3], 1 }
 0x98c   :  { %10198 = vsyncpa [#allocation3 + $0x1], 1 }

</bundles_post_ra>
